<compile_context>
chip_gen: v7x
topology: tpu7x:2x2x1
jax: 0.10.0
libtpu: 0.0.40
codegen_flags: <defaults>
</compile_context>

<pallas_src>
import functools
import math

import numpy as np
import jax
import jax.numpy as jnp
from jax.experimental import pallas as pl
from jax.experimental.pallas import tpu as pltpu

INV_SQRT_3 = 1.0 / math.sqrt(3.0)
EPS = 1e-8


# --------------------------------------------------------------------------
# helpers
# --------------------------------------------------------------------------

def _round_up(x, m):
    return ((x + m - 1) // m) * m


def _rows(tm, ncols):
    return pl.BlockSpec((tm, ncols), lambda i: (i, 0))


def _full(shape):
    return pl.BlockSpec(shape, lambda *_: (0,) * len(shape))


def _sigmoid(x):
    return 1.0 / (1.0 + jnp.exp(-x))


# --------------------------------------------------------------------------
# Pallas kernels
# --------------------------------------------------------------------------

def _edge_init_kernel(r_ref, ev_ref, freq_ref, wb_ref, filt_ref, beta_ref, *, cutoff):
    """Bessel RBF * cosine cutoff and beta_ij = phi_b(edge_vectors), fused."""
    r = r_ref[...]                                        # [TE, 1]
    norm = math.sqrt(2.0 / cutoff)
    bessel = norm * jnp.sin(r * freq_ref[...]) / jnp.maximum(r, 1e-8)   # exact 1/r
    fc = 0.5 * (jnp.cos((math.pi / cutoff) * r) + 1.0)
    fc = jnp.where(r < cutoff, fc, 0.0)
    filt_ref[...] = bessel * fc                           # [TE, R]
    # three K=3 products packed as one block-diagonal [9, 3H] GEMM
    beta_ref[...] = jnp.dot(ev_ref[...], wb_ref[...], preferred_element_type=jnp.float32)


def pallas_edge_init(rij, ev, freqs, wb_big, *, te, n_tiles, cutoff, R, H):
    E_pad = rij.shape[0]
    kernel = functools.partial(_edge_init_kernel, cutoff=cutoff)
    return pl.pallas_call(
        kernel,
        out_shape=(jax.ShapeDtypeStruct((E_pad, R), jnp.float32),
                   jax.ShapeDtypeStruct((E_pad, 3 * H), jnp.float32)),
        grid=(n_tiles,),
        in_specs=[_rows(te, 1), _rows(te, 9), _full((1, R)), _full((9, 3 * H))],
        out_specs=(_rows(te, R), _rows(te, 3 * H)),
        compiler_params=pltpu.CompilerParams(dimension_semantics=("parallel",)),
    )(rij, ev, freqs, wb_big)


def _vinit_kernel(s_ref, vew_ref, veb_ref, w1_ref, b1_ref, w2_ref, b2_ref,
                  sv_ref, hv_ref, *, H, alpha):
    """vector_embedding + spherical parametrisation + layer-0 iac MLP, fused."""
    s = s_ref[...]                                        # [TM, H]
    sph = jnp.dot(s, vew_ref[...], preferred_element_type=jnp.float32) + veb_ref[...]
    a, b, c = sph[:, :H], sph[:, H:2 * H], sph[:, 2 * H:]
    sa = jnp.sin(a)
    vx = sa * jnp.cos(b) * c * alpha
    vy = sa * jnp.sin(b) * c * alpha
    vz = jnp.cos(a) * c * alpha
    v_flat = jnp.concatenate([vx, vy, vz], axis=-1)       # [TM, 3H]
    sv_ref[...] = jnp.concatenate([s, v_flat], axis=-1)   # lane-dense [TM, 4H]
    # inter_atomic_comm[0]: H -> H (swish) -> 3H
    h = jnp.dot(s, w1_ref[...], preferred_element_type=jnp.float32) + b1_ref[...]
    h = h * _sigmoid(h)
    h = jnp.dot(h, w2_ref[...], preferred_element_type=jnp.float32) + b2_ref[...]
    hv_ref[...] = jnp.concatenate([h, v_flat], axis=-1)   # gather source [TM, 6H]


def pallas_vinit(s, vew, veb, w1, b1, w2, b2, *, tm, n_tiles, H, alpha=1.0):
    N_pad = s.shape[0]
    kernel = functools.partial(_vinit_kernel, H=H, alpha=alpha)
    return pl.pallas_call(
        kernel,
        out_shape=(jax.ShapeDtypeStruct((N_pad, 4 * H), jnp.float32),
                   jax.ShapeDtypeStruct((N_pad, 6 * H), jnp.float32)),
        grid=(n_tiles,),
        in_specs=[_rows(tm, H), _full((H, 3 * H)), _full((1, 3 * H)),
                  _full((H, H)), _full((1, H)), _full((H, 3 * H)), _full((1, 3 * H))],
        out_specs=(_rows(tm, 4 * H), _rows(tm, 6 * H)),
        compiler_params=pltpu.CompilerParams(dimension_semantics=("parallel",)),
    )(s, vew, veb.reshape(1, 3 * H), w1, b1.reshape(1, H), w2, b2.reshape(1, 3 * H))


def _edge_msg_kernel(filt_ref, beta_ref, hvj_ref, valid_ref, wcg_ref, bcg_ref,
                     out_ref, *, H):
    """Per-layer radial filter + per-edge message construction (pure edge-row map)."""
    phi_r = (jnp.dot(filt_ref[...], wcg_ref[...], preferred_element_type=jnp.float32)
             + bcg_ref[...])                              # [TE, 3H]
    hvj = hvj_ref[...]                                    # [TE, 6H] = [h_j | V_j]
    phi = phi_r * hvj[:, :3 * H]
    phi_b, phi_d, phi_v = phi[:, :H], phi[:, H:2 * H], phi[:, 2 * H:]
    beta = beta_ref[...]
    vj = hvj[:, 3 * H:]
    pieces = [phi_b]
    for d in range(3):
        lo, hi = d * H, (d + 1) * H
        pieces.append(phi_d * beta[:, lo:hi] + INV_SQRT_3 * phi_v * vj[:, lo:hi])
    # padded edges carry valid==0 -> zero message (safe under segment_sum)
    out_ref[...] = jnp.concatenate(pieces, axis=-1) * valid_ref[...]   # [TE, 4H]


def pallas_edge_msg(filt, beta, hv_j, valid_e, wcg, bcg, *, te, n_tiles, H):
    E_pad, R = filt.shape
    kernel = functools.partial(_edge_msg_kernel, H=H)
    return pl.pallas_call(
        kernel,
        out_shape=jax.ShapeDtypeStruct((E_pad, 4 * H), jnp.float32),
        grid=(n_tiles,),
        in_specs=[_rows(te, R), _rows(te, 3 * H), _rows(te, 6 * H), _rows(te, 1),
                  _full((R, 3 * H)), _full((1, 3 * H))],
        out_specs=_rows(te, 4 * H),
        compiler_params=pltpu.CompilerParams(dimension_semantics=("parallel",)),
    )(filt, beta, hv_j, valid_e, wcg, bcg.reshape(1, 3 * H))


def _node_update_kernel(sv_ref, m_ref, vu_ref, w1_ref, b1_ref, w2_ref, b2_ref,
                        nb_ref, nw1_ref, nb1_ref, nw2_ref, nb2_ref,
                        sv_out_ref, nxt_ref, *, H, emit_hv):
    """Residual + vector_update + safe_norm + atom-wise MLP + gate, fused with the
    NEXT layer's iac MLP (emit_hv=True) or the decoder head (emit_hv=False)."""
    sv = sv_ref[...]
    m = m_ref[...]
    s1 = sv[:, :H] + m[:, :H]
    vu = vu_ref[...]                                      # [H, H] shared across xyz
    v1, uv = [], []
    for d in range(3):                                    # 3 small GEMMs, no kron
        lo, hi = (d + 1) * H, (d + 2) * H
        v1d = sv[:, lo:hi] + m[:, lo:hi]
        v1.append(v1d)
        uv.append(jnp.dot(v1d, vu, preferred_element_type=jnp.float32))
    vnorm = jnp.sqrt(uv[0] ** 2 + uv[1] ** 2 + uv[2] ** 2 + EPS)
    reps = jnp.concatenate([s1, vnorm], axis=-1)          # [TM, 2H]
    hmid = jnp.dot(reps, w1_ref[...], preferred_element_type=jnp.float32) + b1_ref[...]
    hmid = hmid * _sigmoid(hmid)                          # swish
    phi_vm = jnp.dot(hmid, w2_ref[...], preferred_element_type=jnp.float32) + b2_ref[...]
    gate = phi_vm[:, H:] * _sigmoid(vnorm + nb_ref[...])
    s_new = s1 + phi_vm[:, :H]
    v_new = [v1[d] + uv[d] * gate for d in range(3)]
    sv_out_ref[...] = jnp.concatenate([s_new] + v_new, axis=-1)   # lane-dense [TM, 4H]
    # fused "next" MLP on s_new
    n = jnp.dot(s_new, nw1_ref[...], preferred_element_type=jnp.float32) + nb1_ref[...]
    n = n * _sigmoid(n)
    n = jnp.dot(n, nw2_ref[...], preferred_element_type=jnp.float32) + nb2_ref[...]
    if emit_hv:
        nxt_ref[...] = jnp.concatenate([n] + v_new, axis=-1)       # [h_next | V_new]
    else:
        nxt_ref[...] = n                                           # decoder per-atom out


def pallas_node_update(sv, msum, vu_W, w1, b1, w2, b2, nl_bias,
                       nw1, nb1, nw2, nb2, *, tm, n_tiles, H, emit_hv):
    N_pad = sv.shape[0]
    Kh = nw1.shape[1]
    Ko = nw2.shape[1]
    nxt_cols = Ko + 3 * H if emit_hv else Ko
    kernel = functools.partial(_node_update_kernel, H=H, emit_hv=emit_hv)
    return pl.pallas_call(
        kernel,
        out_shape=(jax.ShapeDtypeStruct((N_pad, 4 * H), jnp.float32),
                   jax.ShapeDtypeStruct((N_pad, nxt_cols), jnp.float32)),
        grid=(n_tiles,),
        in_specs=[_rows(tm, 4 * H), _rows(tm, 4 * H),
                  _full((H, H)),
                  _full((2 * H, H)), _full((1, H)),
                  _full((H, 2 * H)), _full((1, 2 * H)),
                  _full((1, H)),
                  _full((H, Kh)), _full((1, Kh)),
                  _full((Kh, Ko)), _full((1, Ko))],
        out_specs=(_rows(tm, 4 * H), _rows(tm, nxt_cols)),
        input_output_aliases={0: 0},                      # sv updated in place
        compiler_params=pltpu.CompilerParams(dimension_semantics=("parallel",)),
    )(sv, msum, vu_W, w1, b1.reshape(1, H), w2, b2.reshape(1, 2 * H),
      nl_bias.reshape(1, H), nw1, nb1.reshape(1, Kh), nw2, nb2.reshape(1, Ko))


# --------------------------------------------------------------------------
# Parameter init (deterministic, mirrors shapes from SaVeNet.__init__)
# --------------------------------------------------------------------------

def _xavier(key, fan_in, fan_out):
    a = math.sqrt(6.0 / (fan_in + fan_out))
    return jax.random.uniform(key, (fan_in, fan_out), jnp.float32, -a, a)


def init_params(key, H, L, R, max_z, dec_hidden):
    ks = iter(jax.random.split(key, 8 + 8 * L))
    emb = jax.random.normal(next(ks), (max_z, H), jnp.float32)
    params = {
        'emb': emb.at[0].set(0.0),                        # padding_idx = 0
        've_W': _xavier(next(ks), H, 3 * H),
        've_b': jnp.zeros((3 * H,), jnp.float32),
        'phi_cg_W': _xavier(next(ks), R, L * 3 * H),
        'phi_cg_b': jnp.zeros((L * 3 * H,), jnp.float32),
        'phi_b_W': _xavier(next(ks), 3, H),               # Dense(3, H, bias=False)
    }
    layers = []
    for _ in range(L):
        layers.append(dict(
            iac_W1=_xavier(next(ks), H, H), iac_b1=jnp.zeros((H,), jnp.float32),
            iac_W2=_xavier(next(ks), H, 3 * H), iac_b2=jnp.zeros((3 * H,), jnp.float32),
            awc_W1=_xavier(next(ks), 2 * H, H), awc_b1=jnp.zeros((H,), jnp.float32),
            awc_W2=_xavier(next(ks), H, 2 * H), awc_b2=jnp.zeros((2 * H,), jnp.float32),
            vu_W=_xavier(next(ks), H, H),                 # Dense(H, H, bias=False)
            nl_bias=jnp.zeros((H,), jnp.float32),
        ))
    params['layers'] = layers
    # TODO(synk): dec.Decoder definition not provided; standard 2-layer atom-wise
    # MLP head with sum pooling (mean/std/atomref are None) is used instead.
    params['dec_W1'] = _xavier(next(ks), H, dec_hidden)
    params['dec_b1'] = jnp.zeros((dec_hidden,), jnp.float32)
    params['dec_W2'] = _xavier(next(ks), dec_hidden, 1)
    params['dec_b2'] = jnp.zeros((1,), jnp.float32)
    return params


# --------------------------------------------------------------------------
# Forward pass (SaVeNetWrapper.forward)
# --------------------------------------------------------------------------

@functools.partial(jax.jit, static_argnames=("H", "L", "R", "cutoff", "num_mol"))
def savenet_forward(params, z, pos, batch_idx, edge_j, edge_i,
                    *, H, L, R, cutoff, num_mol):
    N = z.shape[0]
    E = edge_j.shape[0]

    # tiling: 8-aligned, capped at 128 node rows / 256 edge rows per tile
    N8 = _round_up(N, 8)
    TM = N8 if N8 <= 128 else 128
    N_pad = _round_up(N8, TM)
    E8 = _round_up(E, 8)
    TE = E8 if E8 <= 256 else 256
    E_pad = _round_up(E8, TE)
    n_nt = N_pad // TM
    n_et = E_pad // TE

    zp = jnp.pad(z, (0, N_pad - N))                       # padded atoms: z=0 -> zero emb
    posp = jnp.pad(pos.astype(jnp.float32), ((0, N_pad - N), (0, 0)))
    ej = jnp.pad(edge_j, (0, E_pad - E))                  # padded edges point at node 0,
    ei = jnp.pad(edge_i, (0, E_pad - E))                  # their messages are masked out
    e_valid = (jnp.arange(E_pad) < E).astype(jnp.float32).reshape(E_pad, 1)

    # ---- get_geometry (glue): rij, dir_ij, edge vector triad ----
    rvec = posp[ei] - posp[ej]
    rij = jnp.sqrt(jnp.sum(rvec ** 2, axis=-1))
    d_ij = rvec / jnp.maximum(rij, 1e-8)[:, None]
    t_ij = jnp.cross(posp[ej], posp[ei])
    o_ij = jnp.cross(d_ij, t_ij)
    ev = jnp.stack([d_ij, t_ij, o_ij], axis=-1).reshape(E_pad, 9)   # [(xyz),(d,t,o)]

    freqs = (jnp.arange(1, R + 1, dtype=jnp.float32) * (math.pi / cutoff)).reshape(1, R)
    wb_big = jnp.kron(jnp.eye(3, dtype=jnp.float32), params['phi_b_W'])   # [9, 3H]
    filt, beta = pallas_edge_init(rij.reshape(E_pad, 1), ev, freqs, wb_big,
                                  te=TE, n_tiles=n_et, cutoff=cutoff, R=R, H=H)

    # atom embedding; fused vector embedding + spherical init + layer-0 iac MLP
    # TODO(synk): vector_embed_dropout treated as identity (eval mode).
    s0 = params['emb'][zp]                                # [N_pad, H]
    p0 = params['layers'][0]
    sv, hv = pallas_vinit(s0, params['ve_W'], params['ve_b'],
                          p0['iac_W1'], p0['iac_b1'], p0['iac_W2'], p0['iac_b2'],
                          tm=TM, n_tiles=n_nt, H=H)

    y = None
    for l in range(L):
        p = params['layers'][l]
        wcg = params['phi_cg_W'][:, l * 3 * H:(l + 1) * 3 * H]
        bcg = params['phi_cg_b'][l * 3 * H:(l + 1) * 3 * H]
        # index-driven gather (no one-hot matmul): hv = [iac_l(s) | V], rows at ej
        hv_j = jnp.take(hv, ej, axis=0)                   # [E_pad, 6H]
        merged = pallas_edge_msg(filt, beta, hv_j, e_valid, wcg, bcg,
                                 te=TE, n_tiles=n_et, H=H)
        # scatter-sum back to nodes (no [N,E] matrices, no O(E*N*H) FLOPs)
        msum = jax.ops.segment_sum(merged, ei, num_segments=N_pad)   # [N_pad, 4H]

        if l + 1 < L:
            pn = params['layers'][l + 1]
            nw1, nb1, nw2, nb2 = pn['iac_W1'], pn['iac_b1'], pn['iac_W2'], pn['iac_b2']
            emit_hv = True
        else:
            nw1, nb1 = params['dec_W1'], params['dec_b1']
            nw2, nb2 = params['dec_W2'], params['dec_b2']
            emit_hv = False
        sv, nxt = pallas_node_update(sv, msum, p['vu_W'],
                                     p['awc_W1'], p['awc_b1'], p['awc_W2'], p['awc_b2'],
                                     p['nl_bias'], nw1, nb1, nw2, nb2,
                                     tm=TM, n_tiles=n_nt, H=H, emit_hv=emit_hv)
        if emit_hv:
            hv = nxt                                      # gather source for next layer
        else:
            y = nxt                                       # per-atom decoder output

    # sum-pool the (masked) per-atom predictions over each molecule
    valid = (jnp.arange(N_pad) < N).astype(jnp.float32)[:, None]
    y = y * valid
    bidx = jnp.pad(batch_idx, (0, N_pad - N))
    out = jax.ops.segment_sum(y, bidx, num_segments=num_mol)         # [B, 1]
    s_out = sv[:N, :H]
    V_out = sv[:N, H:].reshape(N, 3, H)
    return out, s_out, V_out


# --------------------------------------------------------------------------
# main
# --------------------------------------------------------------------------

if __name__ == "__main__":
    H = 32          # hidden_dim
    L = 2           # num_encoder
    R = 20          # num_rbf
    cutoff = 5.0
    max_z = 100
    N = 8           # atoms
    B = 1           # molecules

    key = jax.random.PRNGKey(0)
    kp, kz, kinit = jax.random.split(key, 3)

    params = init_params(kinit, H, L, R, max_z, dec_hidden=H // 2)

    z = jax.random.randint(kz, (N,), 1, max_z)
    pos = jax.random.normal(kp, (N, 3), jnp.float32)
    batch_idx = jnp.zeros((N,), jnp.int32)

    # fully-connected edge list (all ordered pairs j != i), static indices
    jj, ii = np.meshgrid(np.arange(N), np.arange(N), indexing='ij')
    mask = jj != ii
    edge_j = jnp.asarray(jj[mask], dtype=jnp.int32)
    edge_i = jnp.asarray(ii[mask], dtype=jnp.int32)

    out, s_out, V_out = savenet_forward(
        params, z, pos, batch_idx, edge_j, edge_i,
        H=H, L=L, R=R, cutoff=cutoff, num_mol=B)

    jax.block_until_ready((out, s_out, V_out))
    assert out.shape == (B, 1)
    assert s_out.shape == (N, H)
    assert V_out.shape == (N, 3, H)
    assert bool(jnp.all(jnp.isfinite(out)))
    assert bool(jnp.all(jnp.isfinite(s_out)))
    assert bool(jnp.all(jnp.isfinite(V_out)))
    print("KERNEL_OK")
</pallas_src>

<mosaic_0001>
module attributes {stable_mosaic.version = 11 : i64} {
  func.func @_edge_init_kernel(%arg0: i32, %arg1: memref<56x1xf32, #tpu.memory_space<vmem>>, %arg2: memref<56x9xf32, #tpu.memory_space<vmem>>, %arg3: memref<1x20xf32, #tpu.memory_space<vmem>>, %arg4: memref<9x96xf32, #tpu.memory_space<vmem>>, %arg5: memref<56x20xf32, #tpu.memory_space<vmem>>, %arg6: memref<56x96xf32, #tpu.memory_space<vmem>>) attributes {dimension_semantics = [#tpu.dimension_semantics<parallel>], iteration_bounds = array<i64: 1>, scalar_prefetch = 0 : i64, scratch_operands = 0 : i64, tpu.core_type = #tpu.core_type<tc>, window_params = [{transform_indices = @transform_0, window_bounds = array<i64: 56, 1>}, {transform_indices = @transform_1, window_bounds = array<i64: 56, 9>}, {pipeline_mode = #tpu.pipeline_mode<synchronous>, transform_indices = @transform_2, window_bounds = array<i64: 1, 20>}, {pipeline_mode = #tpu.pipeline_mode<synchronous>, transform_indices = @transform_3, window_bounds = array<i64: 9, 96>}, {transform_indices = @transform_4, window_bounds = array<i64: 56, 20>}, {transform_indices = @transform_5, window_bounds = array<i64: 56, 96>}]} {
    %c0 = arith.constant 0 : index
    %c0_0 = arith.constant 0 : index
    %0 = vector.load %arg1[%c0, %c0_0] : memref<56x1xf32, #tpu.memory_space<vmem>>, vector<56x1xf32>
    %c0_1 = arith.constant 0 : index
    %c0_2 = arith.constant 0 : index
    %1 = vector.load %arg3[%c0_1, %c0_2] : memref<1x20xf32, #tpu.memory_space<vmem>>, vector<1x20xf32>
    %2 = vector.broadcast %0 : vector<56x1xf32> to vector<56x20xf32>
    %3 = vector.broadcast %1 : vector<1x20xf32> to vector<56x20xf32>
    %4 = arith.mulf %2, %3 : vector<56x20xf32>
    %5 = math.sin %4 : vector<56x20xf32>
    %cst = arith.constant 0.632455527 : f32
    %6 = vector.broadcast %cst : f32 to vector<56x20xf32>
    %7 = arith.mulf %6, %5 : vector<56x20xf32>
    %cst_3 = arith.constant 9.99999993E-9 : f32
    %8 = vector.broadcast %cst_3 : f32 to vector<56x1xf32>
    %9 = arith.maximumf %0, %8 : vector<56x1xf32>
    %10 = vector.broadcast %9 : vector<56x1xf32> to vector<56x20xf32>
    %11 = arith.divf %7, %10 : vector<56x20xf32>
    %cst_4 = arith.constant 0.628318548 : f32
    %12 = vector.broadcast %cst_4 : f32 to vector<56x1xf32>
    %13 = arith.mulf %12, %0 : vector<56x1xf32>
    %14 = math.cos %13 : vector<56x1xf32>
    %cst_5 = arith.constant 1.000000e+00 : f32
    %15 = vector.broadcast %cst_5 : f32 to vector<56x1xf32>
    %16 = arith.addf %14, %15 : vector<56x1xf32>
    %cst_6 = arith.constant 5.000000e-01 : f32
    %17 = vector.broadcast %cst_6 : f32 to vector<56x1xf32>
    %18 = arith.mulf %17, %16 : vector<56x1xf32>
    %cst_7 = arith.constant 5.000000e+00 : f32
    %19 = vector.broadcast %cst_7 : f32 to vector<56x1xf32>
    %20 = arith.cmpf olt, %0, %19 : vector<56x1xf32>
    %cst_8 = arith.constant 0.000000e+00 : f32
    %21 = vector.broadcast %cst_8 : f32 to vector<56x1xf32>
    %22 = arith.select %20, %18, %21 : vector<56x1xi1>, vector<56x1xf32>
    %23 = vector.broadcast %22 : vector<56x1xf32> to vector<56x20xf32>
    %24 = arith.mulf %11, %23 : vector<56x20xf32>
    %c0_9 = arith.constant 0 : index
    %c0_10 = arith.constant 0 : index
    %25 = vector.load %arg5[%c0_9, %c0_10] : memref<56x20xf32, #tpu.memory_space<vmem>>, vector<56x20xf32>
    tpu.vector_store %arg5[%c0_9, %c0_10], %24 {strides = array<i32>} : memref<56x20xf32, #tpu.memory_space<vmem>>, vector<56x20xf32>,
    %c0_11 = arith.constant 0 : index
    %c0_12 = arith.constant 0 : index
    %26 = vector.load %arg2[%c0_11, %c0_12] : memref<56x9xf32, #tpu.memory_space<vmem>>, vector<56x9xf32>
    %c0_13 = arith.constant 0 : index
    %c0_14 = arith.constant 0 : index
    %27 = vector.load %arg4[%c0_13, %c0_14] : memref<9x96xf32, #tpu.memory_space<vmem>>, vector<9x96xf32>
    %cst_15 = arith.constant dense<0.000000e+00> : vector<56x96xf32>
    %28 = tpu.matmul %26, %27, %cst_15 {dimension_numbers = #tpu.dot_dimension_numbers<[1], [0], [0], [1], [0, 0, 1, 1], [], []>} : vector<56x9xf32>, vector<9x96xf32>, vector<56x96xf32> -> vector<56x96xf32>
    %c0_16 = arith.constant 0 : index
    %c0_17 = arith.constant 0 : index
    %29 = vector.load %arg6[%c0_16, %c0_17] : memref<56x96xf32, #tpu.memory_space<vmem>>, vector<56x96xf32>
    tpu.vector_store %arg6[%c0_16, %c0_17], %28 {strides = array<i32>} : memref<56x96xf32, #tpu.memory_space<vmem>>, vector<56x96xf32>,
    return
  }
  func.func @transform_0(%arg0: i32) -> (i32, i32) {
    %c0_i32 = arith.constant 0 : i32
    %c0_i32_0 = arith.constant 0 : i32
    return %arg0, %c0_i32 : i32, i32
  }
  func.func @transform_1(%arg0: i32) -> (i32, i32) {
    %c0_i32 = arith.constant 0 : i32
    %c0_i32_0 = arith.constant 0 : i32
    return %arg0, %c0_i32 : i32, i32
  }
  func.func @transform_2(%arg0: i32) -> (i32, i32) {
    %c0_i32 = arith.constant 0 : i32
    %c0_i32_0 = arith.constant 0 : i32
    %c0_i32_1 = arith.constant 0 : i32
    return %c0_i32, %c0_i32_0 : i32, i32
  }
  func.func @transform_3(%arg0: i32) -> (i32, i32) {
    %c0_i32 = arith.constant 0 : i32
    %c0_i32_0 = arith.constant 0 : i32
    %c0_i32_1 = arith.constant 0 : i32
    return %c0_i32, %c0_i32_0 : i32, i32
  }
  func.func @transform_4(%arg0: i32) -> (i32, i32) {
    %c0_i32 = arith.constant 0 : i32
    %c0_i32_0 = arith.constant 0 : i32
    return %arg0, %c0_i32 : i32, i32
  }
  func.func @transform_5(%arg0: i32) -> (i32, i32) {
    %c0_i32 = arith.constant 0 : i32
    %c0_i32_0 = arith.constant 0 : i32
    return %arg0, %c0_i32 : i32, i32
  }
}

module attributes {stable_mosaic.version = 11 : i64} {
  func.func @_vinit_kernel(%arg0: i32, %arg1: memref<8x32xf32, #tpu.memory_space<vmem>>, %arg2: memref<32x96xf32, #tpu.memory_space<vmem>>, %arg3: memref<1x96xf32, #tpu.memory_space<vmem>>, %arg4: memref<32x32xf32, #tpu.memory_space<vmem>>, %arg5: memref<1x32xf32, #tpu.memory_space<vmem>>, %arg6: memref<32x96xf32, #tpu.memory_space<vmem>>, %arg7: memref<1x96xf32, #tpu.memory_space<vmem>>, %arg8: memref<8x128xf32, #tpu.memory_space<vmem>>, %arg9: memref<8x192xf32, #tpu.memory_space<vmem>>) attributes {dimension_semantics = [#tpu.dimension_semantics<parallel>], iteration_bounds = array<i64: 1>, scalar_prefetch = 0 : i64, scratch_operands = 0 : i64, tpu.core_type = #tpu.core_type<tc>, window_params = [{transform_indices = @transform_0, window_bounds = array<i64: 8, 32>}, {pipeline_mode = #tpu.pipeline_mode<synchronous>, transform_indices = @transform_1, window_bounds = array<i64: 32, 96>}, {pipeline_mode = #tpu.pipeline_mode<synchronous>, transform_indices = @transform_2, window_bounds = array<i64: 1, 96>}, {pipeline_mode = #tpu.pipeline_mode<synchronous>, transform_indices = @transform_3, window_bounds = array<i64: 32, 32>}, {pipeline_mode = #tpu.pipeline_mode<synchronous>, transform_indices = @transform_4, window_bounds = array<i64: 1, 32>}, {pipeline_mode = #tpu.pipeline_mode<synchronous>, transform_indices = @transform_5, window_bounds = array<i64: 32, 96>}, {pipeline_mode = #tpu.pipeline_mode<synchronous>, transform_indices = @transform_6, window_bounds = array<i64: 1, 96>}, {transform_indices = @transform_7, window_bounds = array<i64: 8, 128>}, {transform_indices = @transform_8, window_bounds = array<i64: 8, 192>}]} {
    %c0 = arith.constant 0 : index
    %c0_0 = arith.constant 0 : index
    %0 = vector.load %arg1[%c0, %c0_0] : memref<8x32xf32, #tpu.memory_space<vmem>>, vector<8x32xf32>
    %c0_1 = arith.constant 0 : index
    %c0_2 = arith.constant 0 : index
    %1 = vector.load %arg2[%c0_1, %c0_2] : memref<32x96xf32, #tpu.memory_space<vmem>>, vector<32x96xf32>
    %cst = arith.constant dense<0.000000e+00> : vector<8x96xf32>
    %2 = tpu.matmul %0, %1, %cst {dimension_numbers = #tpu.dot_dimension_numbers<[1], [0], [0], [1], [0, 0, 1, 1], [], []>} : vector<8x32xf32>, vector<32x96xf32>, vector<8x96xf32> -> vector<8x96xf32>
    %c0_3 = arith.constant 0 : index
    %c0_4 = arith.constant 0 : index
    %3 = vector.load %arg3[%c0_3, %c0_4] : memref<1x96xf32, #tpu.memory_space<vmem>>, vector<1x96xf32>
    %4 = vector.broadcast %3 : vector<1x96xf32> to vector<8x96xf32>
    %5 = arith.addf %2, %4 : vector<8x96xf32>
    %6 = vector.extract_strided_slice %5 {offsets = [0, 0], sizes = [8, 32], strides = [1, 1]} : vector<8x96xf32> to vector<8x32xf32>
    %7 = vector.extract_strided_slice %5 {offsets = [0, 32], sizes = [8, 32], strides = [1, 1]} : vector<8x96xf32> to vector<8x32xf32>
    %8 = vector.extract_strided_slice %5 {offsets = [0, 64], sizes = [8, 32], strides = [1, 1]} : vector<8x96xf32> to vector<8x32xf32>
    %9 = math.sin %6 : vector<8x32xf32>
    %10 = math.cos %7 : vector<8x32xf32>
    %11 = arith.mulf %9, %10 : vector<8x32xf32>
    %12 = arith.mulf %11, %8 : vector<8x32xf32>
    %cst_5 = arith.constant 1.000000e+00 : f32
    %13 = vector.broadcast %cst_5 : f32 to vector<8x32xf32>
    %14 = arith.mulf %12, %13 : vector<8x32xf32>
    %15 = math.sin %7 : vector<8x32xf32>
    %16 = arith.mulf %9, %15 : vector<8x32xf32>
    %17 = arith.mulf %16, %8 : vector<8x32xf32>
    %cst_6 = arith.constant 1.000000e+00 : f32
    %18 = vector.broadcast %cst_6 : f32 to vector<8x32xf32>
    %19 = arith.mulf %17, %18 : vector<8x32xf32>
    %20 = math.cos %6 : vector<8x32xf32>
    %21 = arith.mulf %20, %8 : vector<8x32xf32>
    %cst_7 = arith.constant 1.000000e+00 : f32
    %22 = vector.broadcast %cst_7 : f32 to vector<8x32xf32>
    %23 = arith.mulf %21, %22 : vector<8x32xf32>
    %24 = tpu.concatenate %14, %19, %23 in 1 : vector<8x32xf32>, vector<8x32xf32>, vector<8x32xf32> -> vector<8x96xf32>
    %25 = tpu.concatenate %0, %24 in 1 : vector<8x32xf32>, vector<8x96xf32> -> vector<8x128xf32>
    %c0_8 = arith.constant 0 : index
    %c0_9 = arith.constant 0 : index
    %26 = vector.load %arg8[%c0_8, %c0_9] : memref<8x128xf32, #tpu.memory_space<vmem>>, vector<8x128xf32>
    tpu.vector_store %arg8[%c0_8, %c0_9], %25 {strides = array<i32>} : memref<8x128xf32, #tpu.memory_space<vmem>>, vector<8x128xf32>,
    %c0_10 = arith.constant 0 : index
    %c0_11 = arith.constant 0 : index
    %27 = vector.load %arg4[%c0_10, %c0_11] : memref<32x32xf32, #tpu.memory_space<vmem>>, vector<32x32xf32>
    %cst_12 = arith.constant dense<0.000000e+00> : vector<8x32xf32>
    %28 = tpu.matmul %0, %27, %cst_12 {dimension_numbers = #tpu.dot_dimension_numbers<[1], [0], [0], [1], [0, 0, 1, 1], [], []>} : vector<8x32xf32>, vector<32x32xf32>, vector<8x32xf32> -> vector<8x32xf32>
    %c0_13 = arith.constant 0 : index
    %c0_14 = arith.constant 0 : index
    %29 = vector.load %arg5[%c0_13, %c0_14] : memref<1x32xf32, #tpu.memory_space<vmem>>, vector<1x32xf32>
    %30 = vector.broadcast %29 : vector<1x32xf32> to vector<8x32xf32>
    %31 = arith.addf %28, %30 : vector<8x32xf32>
    %cst_15 = arith.constant 0.000000e+00 : f32
    %32 = vector.broadcast %cst_15 : f32 to vector<8x32xf32>
    %33 = arith.subf %32, %31 : vector<8x32xf32>
    %34 = math.exp %33 : vector<8x32xf32>
    %cst_16 = arith.constant 1.000000e+00 : f32
    %35 = vector.broadcast %cst_16 : f32 to vector<8x32xf32>
    %36 = arith.addf %35, %34 : vector<8x32xf32>
    %cst_17 = arith.constant 1.000000e+00 : f32
    %37 = vector.broadcast %cst_17 : f32 to vector<8x32xf32>
    %38 = arith.divf %37, %36 : vector<8x32xf32>
    %39 = arith.mulf %31, %38 : vector<8x32xf32>
    %c0_18 = arith.constant 0 : index
    %c0_19 = arith.constant 0 : index
    %40 = vector.load %arg6[%c0_18, %c0_19] : memref<32x96xf32, #tpu.memory_space<vmem>>, vector<32x96xf32>
    %cst_20 = arith.constant dense<0.000000e+00> : vector<8x96xf32>
    %41 = tpu.matmul %39, %40, %cst_20 {dimension_numbers = #tpu.dot_dimension_numbers<[1], [0], [0], [1], [0, 0, 1, 1], [], []>} : vector<8x32xf32>, vector<32x96xf32>, vector<8x96xf32> -> vector<8x96xf32>
    %c0_21 = arith.constant 0 : index
    %c0_22 = arith.constant 0 : index
    %42 = vector.load %arg7[%c0_21, %c0_22] : memref<1x96xf32, #tpu.memory_space<vmem>>, vector<1x96xf32>
    %43 = vector.broadcast %42 : vector<1x96xf32> to vector<8x96xf32>
    %44 = arith.addf %41, %43 : vector<8x96xf32>
    %45 = tpu.concatenate %44, %24 in 1 : vector<8x96xf32>, vector<8x96xf32> -> vector<8x192xf32>
    %c0_23 = arith.constant 0 : index
    %c0_24 = arith.constant 0 : index
    %46 = vector.load %arg9[%c0_23, %c0_24] : memref<8x192xf32, #tpu.memory_space<vmem>>, vector<8x192xf32>
    tpu.vector_store %arg9[%c0_23, %c0_24], %45 {strides = array<i32>} : memref<8x192xf32, #tpu.memory_space<vmem>>, vector<8x192xf32>,
    return
  }
  func.func @transform_0(%arg0: i32) -> (i32, i32) {
    %c0_i32 = arith.constant 0 : i32
    %c0_i32_0 = arith.constant 0 : i32
    return %arg0, %c0_i32 : i32, i32
  }
  func.func @transform_1(%arg0: i32) -> (i32, i32) {
    %c0_i32 = arith.constant 0 : i32
    %c0_i32_0 = arith.constant 0 : i32
    %c0_i32_1 = arith.constant 0 : i32
    return %c0_i32, %c0_i32_0 : i32, i32
  }
  func.func @transform_2(%arg0: i32) -> (i32, i32) {
    %c0_i32 = arith.constant 0 : i32
    %c0_i32_0 = arith.constant 0 : i32
    %c0_i32_1 = arith.constant 0 : i32
    return %c0_i32, %c0_i32_0 : i32, i32
  }
  func.func @transform_3(%arg0: i32) -> (i32, i32) {
    %c0_i32 = arith.constant 0 : i32
    %c0_i32_0 = arith.constant 0 : i32
    %c0_i32_1 = arith.constant 0 : i32
    return %c0_i32, %c0_i32_0 : i32, i32
  }
  func.func @transform_4(%arg0: i32) -> (i32, i32) {
    %c0_i32 = arith.constant 0 : i32
    %c0_i32_0 = arith.constant 0 : i32
    %c0_i32_1 = arith.constant 0 : i32
    return %c0_i32, %c0_i32_0 : i32, i32
  }
  func.func @transform_5(%arg0: i32) -> (i32, i32) {
    %c0_i32 = arith.constant 0 : i32
    %c0_i32_0 = arith.constant 0 : i32
    %c0_i32_1 = arith.constant 0 : i32
    return %c0_i32, %c0_i32_0 : i32, i32
  }
  func.func @transform_6(%arg0: i32) -> (i32, i32) {
    %c0_i32 = arith.constant 0 : i32
    %c0_i32_0 = arith.constant 0 : i32
    %c0_i32_1 = arith.constant 0 : i32
    return %c0_i32, %c0_i32_0 : i32, i32
  }
  func.func @transform_7(%arg0: i32) -> (i32, i32) {
    %c0_i32 = arith.constant 0 : i32
    %c0_i32_0 = arith.constant 0 : i32
    return %arg0, %c0_i32 : i32, i32
  }
  func.func @transform_8(%arg0: i32) -> (i32, i32) {
    %c0_i32 = arith.constant 0 : i32
    %c0_i32_0 = arith.constant 0 : i32
    return %arg0, %c0_i32 : i32, i32
  }
}

module attributes {stable_mosaic.version = 11 : i64} {
  func.func @_edge_msg_kernel(%arg0: i32, %arg1: memref<56x20xf32, #tpu.memory_space<vmem>>, %arg2: memref<56x96xf32, #tpu.memory_space<vmem>>, %arg3: memref<56x192xf32, #tpu.memory_space<vmem>>, %arg4: memref<56x1xf32, #tpu.memory_space<vmem>>, %arg5: memref<20x96xf32, #tpu.memory_space<vmem>>, %arg6: memref<1x96xf32, #tpu.memory_space<vmem>>, %arg7: memref<56x128xf32, #tpu.memory_space<vmem>>) attributes {dimension_semantics = [#tpu.dimension_semantics<parallel>], iteration_bounds = array<i64: 1>, scalar_prefetch = 0 : i64, scratch_operands = 0 : i64, tpu.core_type = #tpu.core_type<tc>, window_params = [{transform_indices = @transform_0, window_bounds = array<i64: 56, 20>}, {transform_indices = @transform_1, window_bounds = array<i64: 56, 96>}, {transform_indices = @transform_2, window_bounds = array<i64: 56, 192>}, {transform_indices = @transform_3, window_bounds = array<i64: 56, 1>}, {pipeline_mode = #tpu.pipeline_mode<synchronous>, transform_indices = @transform_4, window_bounds = array<i64: 20, 96>}, {pipeline_mode = #tpu.pipeline_mode<synchronous>, transform_indices = @transform_5, window_bounds = array<i64: 1, 96>}, {transform_indices = @transform_6, window_bounds = array<i64: 56, 128>}]} {
    %c0 = arith.constant 0 : index
    %c0_0 = arith.constant 0 : index
    %0 = vector.load %arg1[%c0, %c0_0] : memref<56x20xf32, #tpu.memory_space<vmem>>, vector<56x20xf32>
    %c0_1 = arith.constant 0 : index
    %c0_2 = arith.constant 0 : index
    %1 = vector.load %arg5[%c0_1, %c0_2] : memref<20x96xf32, #tpu.memory_space<vmem>>, vector<20x96xf32>
    %cst = arith.constant dense<0.000000e+00> : vector<56x96xf32>
    %2 = tpu.matmul %0, %1, %cst {dimension_numbers = #tpu.dot_dimension_numbers<[1], [0], [0], [1], [0, 0, 1, 1], [], []>} : vector<56x20xf32>, vector<20x96xf32>, vector<56x96xf32> -> vector<56x96xf32>
    %c0_3 = arith.constant 0 : index
    %c0_4 = arith.constant 0 : index
    %3 = vector.load %arg6[%c0_3, %c0_4] : memref<1x96xf32, #tpu.memory_space<vmem>>, vector<1x96xf32>
    %4 = vector.broadcast %3 : vector<1x96xf32> to vector<56x96xf32>
    %5 = arith.addf %2, %4 : vector<56x96xf32>
    %c0_5 = arith.constant 0 : index
    %c0_6 = arith.constant 0 : index
    %6 = vector.load %arg3[%c0_5, %c0_6] : memref<56x192xf32, #tpu.memory_space<vmem>>, vector<56x192xf32>
    %7 = vector.extract_strided_slice %6 {offsets = [0, 0], sizes = [56, 96], strides = [1, 1]} : vector<56x192xf32> to vector<56x96xf32>
    %8 = arith.mulf %5, %7 : vector<56x96xf32>
    %9 = vector.extract_strided_slice %8 {offsets = [0, 0], sizes = [56, 32], strides = [1, 1]} : vector<56x96xf32> to vector<56x32xf32>
    %10 = vector.extract_strided_slice %8 {offsets = [0, 32], sizes = [56, 32], strides = [1, 1]} : vector<56x96xf32> to vector<56x32xf32>
    %11 = vector.extract_strided_slice %8 {offsets = [0, 64], sizes = [56, 32], strides = [1, 1]} : vector<56x96xf32> to vector<56x32xf32>
    %c0_7 = arith.constant 0 : index
    %c0_8 = arith.constant 0 : index
    %12 = vector.load %arg2[%c0_7, %c0_8] : memref<56x96xf32, #tpu.memory_space<vmem>>, vector<56x96xf32>
    %13 = vector.extract_strided_slice %6 {offsets = [0, 96], sizes = [56, 96], strides = [1, 1]} : vector<56x192xf32> to vector<56x96xf32>
    %14 = vector.extract_strided_slice %12 {offsets = [0, 0], sizes = [56, 32], strides = [1, 1]} : vector<56x96xf32> to vector<56x32xf32>
    %15 = arith.mulf %10, %14 : vector<56x32xf32>
    %cst_9 = arith.constant 0.577350259 : f32
    %16 = vector.broadcast %cst_9 : f32 to vector<56x32xf32>
    %17 = arith.mulf %16, %11 : vector<56x32xf32>
    %18 = vector.extract_strided_slice %13 {offsets = [0, 0], sizes = [56, 32], strides = [1, 1]} : vector<56x96xf32> to vector<56x32xf32>
    %19 = arith.mulf %17, %18 : vector<56x32xf32>
    %20 = arith.addf %15, %19 : vector<56x32xf32>
    %21 = vector.extract_strided_slice %12 {offsets = [0, 32], sizes = [56, 32], strides = [1, 1]} : vector<56x96xf32> to vector<56x32xf32>
    %22 = arith.mulf %10, %21 : vector<56x32xf32>
    %cst_10 = arith.constant 0.577350259 : f32
    %23 = vector.broadcast %cst_10 : f32 to vector<56x32xf32>
    %24 = arith.mulf %23, %11 : vector<56x32xf32>
    %25 = vector.extract_strided_slice %13 {offsets = [0, 32], sizes = [56, 32], strides = [1, 1]} : vector<56x96xf32> to vector<56x32xf32>
    %26 = arith.mulf %24, %25 : vector<56x32xf32>
    %27 = arith.addf %22, %26 : vector<56x32xf32>
    %28 = vector.extract_strided_slice %12 {offsets = [0, 64], sizes = [56, 32], strides = [1, 1]} : vector<56x96xf32> to vector<56x32xf32>
    %29 = arith.mulf %10, %28 : vector<56x32xf32>
    %cst_11 = arith.constant 0.577350259 : f32
    %30 = vector.broadcast %cst_11 : f32 to vector<56x32xf32>
    %31 = arith.mulf %30, %11 : vector<56x32xf32>
    %32 = vector.extract_strided_slice %13 {offsets = [0, 64], sizes = [56, 32], strides = [1, 1]} : vector<56x96xf32> to vector<56x32xf32>
    %33 = arith.mulf %31, %32 : vector<56x32xf32>
    %34 = arith.addf %29, %33 : vector<56x32xf32>
    %35 = tpu.concatenate %9, %20, %27, %34 in 1 : vector<56x32xf32>, vector<56x32xf32>, vector<56x32xf32>, vector<56x32xf32> -> vector<56x128xf32>
    %c0_12 = arith.constant 0 : index
    %c0_13 = arith.constant 0 : index
    %36 = vector.load %arg4[%c0_12, %c0_13] : memref<56x1xf32, #tpu.memory_space<vmem>>, vector<56x1xf32>
    %37 = vector.broadcast %36 : vector<56x1xf32> to vector<56x128xf32>
    %38 = arith.mulf %35, %37 : vector<56x128xf32>
    %c0_14 = arith.constant 0 : index
    %c0_15 = arith.constant 0 : index
    %39 = vector.load %arg7[%c0_14, %c0_15] : memref<56x128xf32, #tpu.memory_space<vmem>>, vector<56x128xf32>
    tpu.vector_store %arg7[%c0_14, %c0_15], %38 {strides = array<i32>} : memref<56x128xf32, #tpu.memory_space<vmem>>, vector<56x128xf32>,
    return
  }
  func.func @transform_0(%arg0: i32) -> (i32, i32) {
    %c0_i32 = arith.constant 0 : i32
    %c0_i32_0 = arith.constant 0 : i32
    return %arg0, %c0_i32 : i32, i32
  }
  func.func @transform_1(%arg0: i32) -> (i32, i32) {
    %c0_i32 = arith.constant 0 : i32
    %c0_i32_0 = arith.constant 0 : i32
    return %arg0, %c0_i32 : i32, i32
  }
  func.func @transform_2(%arg0: i32) -> (i32, i32) {
    %c0_i32 = arith.constant 0 : i32
    %c0_i32_0 = arith.constant 0 : i32
    return %arg0, %c0_i32 : i32, i32
  }
  func.func @transform_3(%arg0: i32) -> (i32, i32) {
    %c0_i32 = arith.constant 0 : i32
    %c0_i32_0 = arith.constant 0 : i32
    return %arg0, %c0_i32 : i32, i32
  }
  func.func @transform_4(%arg0: i32) -> (i32, i32) {
    %c0_i32 = arith.constant 0 : i32
    %c0_i32_0 = arith.constant 0 : i32
    %c0_i32_1 = arith.constant 0 : i32
    return %c0_i32, %c0_i32_0 : i32, i32
  }
  func.func @transform_5(%arg0: i32) -> (i32, i32) {
    %c0_i32 = arith.constant 0 : i32
    %c0_i32_0 = arith.constant 0 : i32
    %c0_i32_1 = arith.constant 0 : i32
    return %c0_i32, %c0_i32_0 : i32, i32
  }
  func.func @transform_6(%arg0: i32) -> (i32, i32) {
    %c0_i32 = arith.constant 0 : i32
    %c0_i32_0 = arith.constant 0 : i32
    return %arg0, %c0_i32 : i32, i32
  }
}

module attributes {stable_mosaic.version = 11 : i64} {
  func.func @_node_update_kernel(%arg0: i32, %arg1: memref<8x128xf32, #tpu.memory_space<vmem>>, %arg2: memref<8x128xf32, #tpu.memory_space<vmem>>, %arg3: memref<32x32xf32, #tpu.memory_space<vmem>>, %arg4: memref<64x32xf32, #tpu.memory_space<vmem>>, %arg5: memref<1x32xf32, #tpu.memory_space<vmem>>, %arg6: memref<32x64xf32, #tpu.memory_space<vmem>>, %arg7: memref<1x64xf32, #tpu.memory_space<vmem>>, %arg8: memref<1x32xf32, #tpu.memory_space<vmem>>, %arg9: memref<32x16xf32, #tpu.memory_space<vmem>>, %arg10: memref<1x16xf32, #tpu.memory_space<vmem>>, %arg11: memref<16x1xf32, #tpu.memory_space<vmem>>, %arg12: memref<1x1xf32, #tpu.memory_space<vmem>>, %arg13: memref<8x128xf32, #tpu.memory_space<vmem>>, %arg14: memref<8x1xf32, #tpu.memory_space<vmem>>) attributes {dimension_semantics = [#tpu.dimension_semantics<parallel>], iteration_bounds = array<i64: 1>, scalar_prefetch = 0 : i64, scratch_operands = 0 : i64, tpu.core_type = #tpu.core_type<tc>, window_params = [{transform_indices = @transform_0, window_bounds = array<i64: 8, 128>}, {transform_indices = @transform_1, window_bounds = array<i64: 8, 128>}, {pipeline_mode = #tpu.pipeline_mode<synchronous>, transform_indices = @transform_2, window_bounds = array<i64: 32, 32>}, {pipeline_mode = #tpu.pipeline_mode<synchronous>, transform_indices = @transform_3, window_bounds = array<i64: 64, 32>}, {pipeline_mode = #tpu.pipeline_mode<synchronous>, transform_indices = @transform_4, window_bounds = array<i64: 1, 32>}, {pipeline_mode = #tpu.pipeline_mode<synchronous>, transform_indices = @transform_5, window_bounds = array<i64: 32, 64>}, {pipeline_mode = #tpu.pipeline_mode<synchronous>, transform_indices = @transform_6, window_bounds = array<i64: 1, 64>}, {pipeline_mode = #tpu.pipeline_mode<synchronous>, transform_indices = @transform_7, window_bounds = array<i64: 1, 32>}, {pipeline_mode = #tpu.pipeline_mode<synchronous>, transform_indices = @transform_8, window_bounds = array<i64: 32, 16>}, {pipeline_mode = #tpu.pipeline_mode<synchronous>, transform_indices = @transform_9, window_bounds = array<i64: 1, 16>}, {pipeline_mode = #tpu.pipeline_mode<synchronous>, transform_indices = @transform_10, window_bounds = array<i64: 16, 1>}, {pipeline_mode = #tpu.pipeline_mode<synchronous>, transform_indices = @transform_11, window_bounds = array<i64: 1, 1>}, {transform_indices = @transform_12, window_bounds = array<i64: 8, 128>}, {transform_indices = @transform_13, window_bounds = array<i64: 8, 1>}]} {
    %c0 = arith.constant 0 : index
    %c0_0 = arith.constant 0 : index
    %0 = vector.load %arg1[%c0, %c0_0] : memref<8x128xf32, #tpu.memory_space<vmem>>, vector<8x128xf32>
    %c0_1 = arith.constant 0 : index
    %c0_2 = arith.constant 0 : index
    %1 = vector.load %arg2[%c0_1, %c0_2] : memref<8x128xf32, #tpu.memory_space<vmem>>, vector<8x128xf32>
    %2 = vector.extract_strided_slice %0 {offsets = [0, 0], sizes = [8, 32], strides = [1, 1]} : vector<8x128xf32> to vector<8x32xf32>
    %3 = vector.extract_strided_slice %1 {offsets = [0, 0], sizes = [8, 32], strides = [1, 1]} : vector<8x128xf32> to vector<8x32xf32>
    %4 = arith.addf %2, %3 : vector<8x32xf32>
    %c0_3 = arith.constant 0 : index
    %c0_4 = arith.constant 0 : index
    %5 = vector.load %arg3[%c0_3, %c0_4] : memref<32x32xf32, #tpu.memory_space<vmem>>, vector<32x32xf32>
    %6 = vector.extract_strided_slice %0 {offsets = [0, 32], sizes = [8, 32], strides = [1, 1]} : vector<8x128xf32> to vector<8x32xf32>
    %7 = vector.extract_strided_slice %1 {offsets = [0, 32], sizes = [8, 32], strides = [1, 1]} : vector<8x128xf32> to vector<8x32xf32>
    %8 = arith.addf %6, %7 : vector<8x32xf32>
    %cst = arith.constant dense<0.000000e+00> : vector<8x32xf32>
    %9 = tpu.matmul %8, %5, %cst {dimension_numbers = #tpu.dot_dimension_numbers<[1], [0], [0], [1], [0, 0, 1, 1], [], []>} : vector<8x32xf32>, vector<32x32xf32>, vector<8x32xf32> -> vector<8x32xf32>
    %10 = vector.extract_strided_slice %0 {offsets = [0, 64], sizes = [8, 32], strides = [1, 1]} : vector<8x128xf32> to vector<8x32xf32>
    %11 = vector.extract_strided_slice %1 {offsets = [0, 64], sizes = [8, 32], strides = [1, 1]} : vector<8x128xf32> to vector<8x32xf32>
    %12 = arith.addf %10, %11 : vector<8x32xf32>
    %cst_5 = arith.constant dense<0.000000e+00> : vector<8x32xf32>
    %13 = tpu.matmul %12, %5, %cst_5 {dimension_numbers = #tpu.dot_dimension_numbers<[1], [0], [0], [1], [0, 0, 1, 1], [], []>} : vector<8x32xf32>, vector<32x32xf32>, vector<8x32xf32> -> vector<8x32xf32>
    %14 = vector.extract_strided_slice %0 {offsets = [0, 96], sizes = [8, 32], strides = [1, 1]} : vector<8x128xf32> to vector<8x32xf32>
    %15 = vector.extract_strided_slice %1 {offsets = [0, 96], sizes = [8, 32], strides = [1, 1]} : vector<8x128xf32> to vector<8x32xf32>
    %16 = arith.addf %14, %15 : vector<8x32xf32>
    %cst_6 = arith.constant dense<0.000000e+00> : vector<8x32xf32>
    %17 = tpu.matmul %16, %5, %cst_6 {dimension_numbers = #tpu.dot_dimension_numbers<[1], [0], [0], [1], [0, 0, 1, 1], [], []>} : vector<8x32xf32>, vector<32x32xf32>, vector<8x32xf32> -> vector<8x32xf32>
    %18 = arith.mulf %9, %9 : vector<8x32xf32>
    %19 = arith.mulf %13, %13 : vector<8x32xf32>
    %20 = arith.addf %18, %19 : vector<8x32xf32>
    %21 = arith.mulf %17, %17 : vector<8x32xf32>
    %22 = arith.addf %20, %21 : vector<8x32xf32>
    %cst_7 = arith.constant 9.99999993E-9 : f32
    %23 = vector.broadcast %cst_7 : f32 to vector<8x32xf32>
    %24 = arith.addf %22, %23 : vector<8x32xf32>
    %25 = math.sqrt %24 : vector<8x32xf32>
    %26 = tpu.concatenate %4, %25 in 1 : vector<8x32xf32>, vector<8x32xf32> -> vector<8x64xf32>
    %c0_8 = arith.constant 0 : index
    %c0_9 = arith.constant 0 : index
    %27 = vector.load %arg4[%c0_8, %c0_9] : memref<64x32xf32, #tpu.memory_space<vmem>>, vector<64x32xf32>
    %cst_10 = arith.constant dense<0.000000e+00> : vector<8x32xf32>
    %28 = tpu.matmul %26, %27, %cst_10 {dimension_numbers = #tpu.dot_dimension_numbers<[1], [0], [0], [1], [0, 0, 1, 1], [], []>} : vector<8x64xf32>, vector<64x32xf32>, vector<8x32xf32> -> vector<8x32xf32>
    %c0_11 = arith.constant 0 : index
    %c0_12 = arith.constant 0 : index
    %29 = vector.load %arg5[%c0_11, %c0_12] : memref<1x32xf32, #tpu.memory_space<vmem>>, vector<1x32xf32>
    %30 = vector.broadcast %29 : vector<1x32xf32> to vector<8x32xf32>
    %31 = arith.addf %28, %30 : vector<8x32xf32>
    %cst_13 = arith.constant 0.000000e+00 : f32
    %32 = vector.broadcast %cst_13 : f32 to vector<8x32xf32>
    %33 = arith.subf %32, %31 : vector<8x32xf32>
    %34 = math.exp %33 : vector<8x32xf32>
    %cst_14 = arith.constant 1.000000e+00 : f32
    %35 = vector.broadcast %cst_14 : f32 to vector<8x32xf32>
    %36 = arith.addf %35, %34 : vector<8x32xf32>
    %cst_15 = arith.constant 1.000000e+00 : f32
    %37 = vector.broadcast %cst_15 : f32 to vector<8x32xf32>
    %38 = arith.divf %37, %36 : vector<8x32xf32>
    %39 = arith.mulf %31, %38 : vector<8x32xf32>
    %c0_16 = arith.constant 0 : index
    %c0_17 = arith.constant 0 : index
    %40 = vector.load %arg6[%c0_16, %c0_17] : memref<32x64xf32, #tpu.memory_space<vmem>>, vector<32x64xf32>
    %cst_18 = arith.constant dense<0.000000e+00> : vector<8x64xf32>
    %41 = tpu.matmul %39, %40, %cst_18 {dimension_numbers = #tpu.dot_dimension_numbers<[1], [0], [0], [1], [0, 0, 1, 1], [], []>} : vector<8x32xf32>, vector<32x64xf32>, vector<8x64xf32> -> vector<8x64xf32>
    %c0_19 = arith.constant 0 : index
    %c0_20 = arith.constant 0 : index
    %42 = vector.load %arg7[%c0_19, %c0_20] : memref<1x64xf32, #tpu.memory_space<vmem>>, vector<1x64xf32>
    %43 = vector.broadcast %42 : vector<1x64xf32> to vector<8x64xf32>
    %44 = arith.addf %41, %43 : vector<8x64xf32>
    %45 = vector.extract_strided_slice %44 {offsets = [0, 32], sizes = [8, 32], strides = [1, 1]} : vector<8x64xf32> to vector<8x32xf32>
    %c0_21 = arith.constant 0 : index
    %c0_22 = arith.constant 0 : index
    %46 = vector.load %arg8[%c0_21, %c0_22] : memref<1x32xf32, #tpu.memory_space<vmem>>, vector<1x32xf32>
    %47 = vector.broadcast %46 : vector<1x32xf32> to vector<8x32xf32>
    %48 = arith.addf %25, %47 : vector<8x32xf32>
    %cst_23 = arith.constant 0.000000e+00 : f32
    %49 = vector.broadcast %cst_23 : f32 to vector<8x32xf32>
    %50 = arith.subf %49, %48 : vector<8x32xf32>
    %51 = math.exp %50 : vector<8x32xf32>
    %cst_24 = arith.constant 1.000000e+00 : f32
    %52 = vector.broadcast %cst_24 : f32 to vector<8x32xf32>
    %53 = arith.addf %52, %51 : vector<8x32xf32>
    %cst_25 = arith.constant 1.000000e+00 : f32
    %54 = vector.broadcast %cst_25 : f32 to vector<8x32xf32>
    %55 = arith.divf %54, %53 : vector<8x32xf32>
    %56 = arith.mulf %45, %55 : vector<8x32xf32>
    %57 = vector.extract_strided_slice %44 {offsets = [0, 0], sizes = [8, 32], strides = [1, 1]} : vector<8x64xf32> to vector<8x32xf32>
    %58 = arith.addf %4, %57 : vector<8x32xf32>
    %59 = arith.mulf %9, %56 : vector<8x32xf32>
    %60 = arith.addf %8, %59 : vector<8x32xf32>
    %61 = arith.mulf %13, %56 : vector<8x32xf32>
    %62 = arith.addf %12, %61 : vector<8x32xf32>
    %63 = arith.mulf %17, %56 : vector<8x32xf32>
    %64 = arith.addf %16, %63 : vector<8x32xf32>
    %65 = tpu.concatenate %58, %60, %62, %64 in 1 : vector<8x32xf32>, vector<8x32xf32>, vector<8x32xf32>, vector<8x32xf32> -> vector<8x128xf32>
    %c0_26 = arith.constant 0 : index
    %c0_27 = arith.constant 0 : index
    %66 = vector.load %arg13[%c0_26, %c0_27] : memref<8x128xf32, #tpu.memory_space<vmem>>, vector<8x128xf32>
    tpu.vector_store %arg13[%c0_26, %c0_27], %65 {strides = array<i32>} : memref<8x128xf32, #tpu.memory_space<vmem>>, vector<8x128xf32>,
    %c0_28 = arith.constant 0 : index
    %c0_29 = arith.constant 0 : index
    %67 = vector.load %arg9[%c0_28, %c0_29] : memref<32x16xf32, #tpu.memory_space<vmem>>, vector<32x16xf32>
    %cst_30 = arith.constant dense<0.000000e+00> : vector<8x16xf32>
    %68 = tpu.matmul %58, %67, %cst_30 {dimension_numbers = #tpu.dot_dimension_numbers<[1], [0], [0], [1], [0, 0, 1, 1], [], []>} : vector<8x32xf32>, vector<32x16xf32>, vector<8x16xf32> -> vector<8x16xf32>
    %c0_31 = arith.constant 0 : index
    %c0_32 = arith.constant 0 : index
    %69 = vector.load %arg10[%c0_31, %c0_32] : memref<1x16xf32, #tpu.memory_space<vmem>>, vector<1x16xf32>
    %70 = vector.broadcast %69 : vector<1x16xf32> to vector<8x16xf32>
    %71 = arith.addf %68, %70 : vector<8x16xf32>
    %cst_33 = arith.constant 0.000000e+00 : f32
    %72 = vector.broadcast %cst_33 : f32 to vector<8x16xf32>
    %73 = arith.subf %72, %71 : vector<8x16xf32>
    %74 = math.exp %73 : vector<8x16xf32>
    %cst_34 = arith.constant 1.000000e+00 : f32
    %75 = vector.broadcast %cst_34 : f32 to vector<8x16xf32>
    %76 = arith.addf %75, %74 : vector<8x16xf32>
    %cst_35 = arith.constant 1.000000e+00 : f32
    %77 = vector.broadcast %cst_35 : f32 to vector<8x16xf32>
    %78 = arith.divf %77, %76 : vector<8x16xf32>
    %79 = arith.mulf %71, %78 : vector<8x16xf32>
    %c0_36 = arith.constant 0 : index
    %c0_37 = arith.constant 0 : index
    %80 = vector.load %arg11[%c0_36, %c0_37] : memref<16x1xf32, #tpu.memory_space<vmem>>, vector<16x1xf32>
    %cst_38 = arith.constant dense<0.000000e+00> : vector<8x1xf32>
    %81 = tpu.matmul %79, %80, %cst_38 {dimension_numbers = #tpu.dot_dimension_numbers<[1], [0], [0], [1], [0, 0, 1, 1], [], []>} : vector<8x16xf32>, vector<16x1xf32>, vector<8x1xf32> -> vector<8x1xf32>
    %c0_39 = arith.constant 0 : index
    %c0_40 = arith.constant 0 : index
    %82 = vector.load %arg12[%c0_39, %c0_40] : memref<1x1xf32, #tpu.memory_space<vmem>>, vector<1x1xf32>
    %83 = vector.broadcast %82 : vector<1x1xf32> to vector<8x1xf32>
    %84 = arith.addf %81, %83 : vector<8x1xf32>
    %c0_41 = arith.constant 0 : index
    %c0_42 = arith.constant 0 : index
    %85 = vector.load %arg14[%c0_41, %c0_42] : memref<8x1xf32, #tpu.memory_space<vmem>>, vector<8x1xf32>
    tpu.vector_store %arg14[%c0_41, %c0_42], %84 {strides = array<i32>} : memref<8x1xf32, #tpu.memory_space<vmem>>, vector<8x1xf32>,
    return
  }
  func.func @transform_0(%arg0: i32) -> (i32, i32) {
    %c0_i32 = arith.constant 0 : i32
    %c0_i32_0 = arith.constant 0 : i32
    return %arg0, %c0_i32 : i32, i32
  }
  func.func @transform_1(%arg0: i32) -> (i32, i32) {
    %c0_i32 = arith.constant 0 : i32
    %c0_i32_0 = arith.constant 0 : i32
    return %arg0, %c0_i32 : i32, i32
  }
  func.func @transform_2(%arg0: i32) -> (i32, i32) {
    %c0_i32 = arith.constant 0 : i32
    %c0_i32_0 = arith.constant 0 : i32
    %c0_i32_1 = arith.constant 0 : i32
    return %c0_i32, %c0_i32_0 : i32, i32
  }
  func.func @transform_3(%arg0: i32) -> (i32, i32) {
    %c0_i32 = arith.constant 0 : i32
    %c0_i32_0 = arith.constant 0 : i32
    %c0_i32_1 = arith.constant 0 : i32
    return %c0_i32, %c0_i32_0 : i32, i32
  }
  func.func @transform_4(%arg0: i32) -> (i32, i32) {
    %c0_i32 = arith.constant 0 : i32
    %c0_i32_0 = arith.constant 0 : i32
    %c0_i32_1 = arith.constant 0 : i32
    return %c0_i32, %c0_i32_0 : i32, i32
  }
  func.func @transform_5(%arg0: i32) -> (i32, i32) {
    %c0_i32 = arith.constant 0 : i32
    %c0_i32_0 = arith.constant 0 : i32
    %c0_i32_1 = arith.constant 0 : i32
    return %c0_i32, %c0_i32_0 : i32, i32
  }
  func.func @transform_6(%arg0: i32) -> (i32, i32) {
    %c0_i32 = arith.constant 0 : i32
    %c0_i32_0 = arith.constant 0 : i32
    %c0_i32_1 = arith.constant 0 : i32
    return %c0_i32, %c0_i32_0 : i32, i32
  }
  func.func @transform_7(%arg0: i32) -> (i32, i32) {
    %c0_i32 = arith.constant 0 : i32
    %c0_i32_0 = arith.constant 0 : i32
    %c0_i32_1 = arith.constant 0 : i32
    return %c0_i32, %c0_i32_0 : i32, i32
  }
  func.func @transform_8(%arg0: i32) -> (i32, i32) {
    %c0_i32 = arith.constant 0 : i32
    %c0_i32_0 = arith.constant 0 : i32
    %c0_i32_1 = arith.constant 0 : i32
    return %c0_i32, %c0_i32_0 : i32, i32
  }
  func.func @transform_9(%arg0: i32) -> (i32, i32) {
    %c0_i32 = arith.constant 0 : i32
    %c0_i32_0 = arith.constant 0 : i32
    %c0_i32_1 = arith.constant 0 : i32
    return %c0_i32, %c0_i32_0 : i32, i32
  }
  func.func @transform_10(%arg0: i32) -> (i32, i32) {
    %c0_i32 = arith.constant 0 : i32
    %c0_i32_0 = arith.constant 0 : i32
    %c0_i32_1 = arith.constant 0 : i32
    return %c0_i32, %c0_i32_0 : i32, i32
  }
  func.func @transform_11(%arg0: i32) -> (i32, i32) {
    %c0_i32 = arith.constant 0 : i32
    %c0_i32_0 = arith.constant 0 : i32
    %c0_i32_1 = arith.constant 0 : i32
    return %c0_i32, %c0_i32_0 : i32, i32
  }
  func.func @transform_12(%arg0: i32) -> (i32, i32) {
    %c0_i32 = arith.constant 0 : i32
    %c0_i32_0 = arith.constant 0 : i32
    return %arg0, %c0_i32 : i32, i32
  }
  func.func @transform_13(%arg0: i32) -> (i32, i32) {
    %c0_i32 = arith.constant 0 : i32
    %c0_i32_0 = arith.constant 0 : i32
    return %arg0, %c0_i32 : i32, i32
  }
}

module attributes {stable_mosaic.version = 11 : i64} {
  func.func @_node_update_kernel(%arg0: i32, %arg1: memref<8x128xf32, #tpu.memory_space<vmem>>, %arg2: memref<8x128xf32, #tpu.memory_space<vmem>>, %arg3: memref<32x32xf32, #tpu.memory_space<vmem>>, %arg4: memref<64x32xf32, #tpu.memory_space<vmem>>, %arg5: memref<1x32xf32, #tpu.memory_space<vmem>>, %arg6: memref<32x64xf32, #tpu.memory_space<vmem>>, %arg7: memref<1x64xf32, #tpu.memory_space<vmem>>, %arg8: memref<1x32xf32, #tpu.memory_space<vmem>>, %arg9: memref<32x32xf32, #tpu.memory_space<vmem>>, %arg10: memref<1x32xf32, #tpu.memory_space<vmem>>, %arg11: memref<32x96xf32, #tpu.memory_space<vmem>>, %arg12: memref<1x96xf32, #tpu.memory_space<vmem>>, %arg13: memref<8x128xf32, #tpu.memory_space<vmem>>, %arg14: memref<8x192xf32, #tpu.memory_space<vmem>>) attributes {dimension_semantics = [#tpu.dimension_semantics<parallel>], iteration_bounds = array<i64: 1>, scalar_prefetch = 0 : i64, scratch_operands = 0 : i64, tpu.core_type = #tpu.core_type<tc>, window_params = [{transform_indices = @transform_0, window_bounds = array<i64: 8, 128>}, {transform_indices = @transform_1, window_bounds = array<i64: 8, 128>}, {pipeline_mode = #tpu.pipeline_mode<synchronous>, transform_indices = @transform_2, window_bounds = array<i64: 32, 32>}, {pipeline_mode = #tpu.pipeline_mode<synchronous>, transform_indices = @transform_3, window_bounds = array<i64: 64, 32>}, {pipeline_mode = #tpu.pipeline_mode<synchronous>, transform_indices = @transform_4, window_bounds = array<i64: 1, 32>}, {pipeline_mode = #tpu.pipeline_mode<synchronous>, transform_indices = @transform_5, window_bounds = array<i64: 32, 64>}, {pipeline_mode = #tpu.pipeline_mode<synchronous>, transform_indices = @transform_6, window_bounds = array<i64: 1, 64>}, {pipeline_mode = #tpu.pipeline_mode<synchronous>, transform_indices = @transform_7, window_bounds = array<i64: 1, 32>}, {pipeline_mode = #tpu.pipeline_mode<synchronous>, transform_indices = @transform_8, window_bounds = array<i64: 32, 32>}, {pipeline_mode = #tpu.pipeline_mode<synchronous>, transform_indices = @transform_9, window_bounds = array<i64: 1, 32>}, {pipeline_mode = #tpu.pipeline_mode<synchronous>, transform_indices = @transform_10, window_bounds = array<i64: 32, 96>}, {pipeline_mode = #tpu.pipeline_mode<synchronous>, transform_indices = @transform_11, window_bounds = array<i64: 1, 96>}, {transform_indices = @transform_12, window_bounds = array<i64: 8, 128>}, {transform_indices = @transform_13, window_bounds = array<i64: 8, 192>}]} {
    %c0 = arith.constant 0 : index
    %c0_0 = arith.constant 0 : index
    %0 = vector.load %arg1[%c0, %c0_0] : memref<8x128xf32, #tpu.memory_space<vmem>>, vector<8x128xf32>
    %c0_1 = arith.constant 0 : index
    %c0_2 = arith.constant 0 : index
    %1 = vector.load %arg2[%c0_1, %c0_2] : memref<8x128xf32, #tpu.memory_space<vmem>>, vector<8x128xf32>
    %2 = vector.extract_strided_slice %0 {offsets = [0, 0], sizes = [8, 32], strides = [1, 1]} : vector<8x128xf32> to vector<8x32xf32>
    %3 = vector.extract_strided_slice %1 {offsets = [0, 0], sizes = [8, 32], strides = [1, 1]} : vector<8x128xf32> to vector<8x32xf32>
    %4 = arith.addf %2, %3 : vector<8x32xf32>
    %c0_3 = arith.constant 0 : index
    %c0_4 = arith.constant 0 : index
    %5 = vector.load %arg3[%c0_3, %c0_4] : memref<32x32xf32, #tpu.memory_space<vmem>>, vector<32x32xf32>
    %6 = vector.extract_strided_slice %0 {offsets = [0, 32], sizes = [8, 32], strides = [1, 1]} : vector<8x128xf32> to vector<8x32xf32>
    %7 = vector.extract_strided_slice %1 {offsets = [0, 32], sizes = [8, 32], strides = [1, 1]} : vector<8x128xf32> to vector<8x32xf32>
    %8 = arith.addf %6, %7 : vector<8x32xf32>
    %cst = arith.constant dense<0.000000e+00> : vector<8x32xf32>
    %9 = tpu.matmul %8, %5, %cst {dimension_numbers = #tpu.dot_dimension_numbers<[1], [0], [0], [1], [0, 0, 1, 1], [], []>} : vector<8x32xf32>, vector<32x32xf32>, vector<8x32xf32> -> vector<8x32xf32>
    %10 = vector.extract_strided_slice %0 {offsets = [0, 64], sizes = [8, 32], strides = [1, 1]} : vector<8x128xf32> to vector<8x32xf32>
    %11 = vector.extract_strided_slice %1 {offsets = [0, 64], sizes = [8, 32], strides = [1, 1]} : vector<8x128xf32> to vector<8x32xf32>
    %12 = arith.addf %10, %11 : vector<8x32xf32>
    %cst_5 = arith.constant dense<0.000000e+00> : vector<8x32xf32>
    %13 = tpu.matmul %12, %5, %cst_5 {dimension_numbers = #tpu.dot_dimension_numbers<[1], [0], [0], [1], [0, 0, 1, 1], [], []>} : vector<8x32xf32>, vector<32x32xf32>, vector<8x32xf32> -> vector<8x32xf32>
    %14 = vector.extract_strided_slice %0 {offsets = [0, 96], sizes = [8, 32], strides = [1, 1]} : vector<8x128xf32> to vector<8x32xf32>
    %15 = vector.extract_strided_slice %1 {offsets = [0, 96], sizes = [8, 32], strides = [1, 1]} : vector<8x128xf32> to vector<8x32xf32>
    %16 = arith.addf %14, %15 : vector<8x32xf32>
    %cst_6 = arith.constant dense<0.000000e+00> : vector<8x32xf32>
    %17 = tpu.matmul %16, %5, %cst_6 {dimension_numbers = #tpu.dot_dimension_numbers<[1], [0], [0], [1], [0, 0, 1, 1], [], []>} : vector<8x32xf32>, vector<32x32xf32>, vector<8x32xf32> -> vector<8x32xf32>
    %18 = arith.mulf %9, %9 : vector<8x32xf32>
    %19 = arith.mulf %13, %13 : vector<8x32xf32>
    %20 = arith.addf %18, %19 : vector<8x32xf32>
    %21 = arith.mulf %17, %17 : vector<8x32xf32>
    %22 = arith.addf %20, %21 : vector<8x32xf32>
    %cst_7 = arith.constant 9.99999993E-9 : f32
    %23 = vector.broadcast %cst_7 : f32 to vector<8x32xf32>
    %24 = arith.addf %22, %23 : vector<8x32xf32>
    %25 = math.sqrt %24 : vector<8x32xf32>
    %26 = tpu.concatenate %4, %25 in 1 : vector<8x32xf32>, vector<8x32xf32> -> vector<8x64xf32>
    %c0_8 = arith.constant 0 : index
    %c0_9 = arith.constant 0 : index
    %27 = vector.load %arg4[%c0_8, %c0_9] : memref<64x32xf32, #tpu.memory_space<vmem>>, vector<64x32xf32>
    %cst_10 = arith.constant dense<0.000000e+00> : vector<8x32xf32>
    %28 = tpu.matmul %26, %27, %cst_10 {dimension_numbers = #tpu.dot_dimension_numbers<[1], [0], [0], [1], [0, 0, 1, 1], [], []>} : vector<8x64xf32>, vector<64x32xf32>, vector<8x32xf32> -> vector<8x32xf32>
    %c0_11 = arith.constant 0 : index
    %c0_12 = arith.constant 0 : index
    %29 = vector.load %arg5[%c0_11, %c0_12] : memref<1x32xf32, #tpu.memory_space<vmem>>, vector<1x32xf32>
    %30 = vector.broadcast %29 : vector<1x32xf32> to vector<8x32xf32>
    %31 = arith.addf %28, %30 : vector<8x32xf32>
    %cst_13 = arith.constant 0.000000e+00 : f32
    %32 = vector.broadcast %cst_13 : f32 to vector<8x32xf32>
    %33 = arith.subf %32, %31 : vector<8x32xf32>
    %34 = math.exp %33 : vector<8x32xf32>
    %cst_14 = arith.constant 1.000000e+00 : f32
    %35 = vector.broadcast %cst_14 : f32 to vector<8x32xf32>
    %36 = arith.addf %35, %34 : vector<8x32xf32>
    %cst_15 = arith.constant 1.000000e+00 : f32
    %37 = vector.broadcast %cst_15 : f32 to vector<8x32xf32>
    %38 = arith.divf %37, %36 : vector<8x32xf32>
    %39 = arith.mulf %31, %38 : vector<8x32xf32>
    %c0_16 = arith.constant 0 : index
    %c0_17 = arith.constant 0 : index
    %40 = vector.load %arg6[%c0_16, %c0_17] : memref<32x64xf32, #tpu.memory_space<vmem>>, vector<32x64xf32>
    %cst_18 = arith.constant dense<0.000000e+00> : vector<8x64xf32>
    %41 = tpu.matmul %39, %40, %cst_18 {dimension_numbers = #tpu.dot_dimension_numbers<[1], [0], [0], [1], [0, 0, 1, 1], [], []>} : vector<8x32xf32>, vector<32x64xf32>, vector<8x64xf32> -> vector<8x64xf32>
    %c0_19 = arith.constant 0 : index
    %c0_20 = arith.constant 0 : index
    %42 = vector.load %arg7[%c0_19, %c0_20] : memref<1x64xf32, #tpu.memory_space<vmem>>, vector<1x64xf32>
    %43 = vector.broadcast %42 : vector<1x64xf32> to vector<8x64xf32>
    %44 = arith.addf %41, %43 : vector<8x64xf32>
    %45 = vector.extract_strided_slice %44 {offsets = [0, 32], sizes = [8, 32], strides = [1, 1]} : vector<8x64xf32> to vector<8x32xf32>
    %c0_21 = arith.constant 0 : index
    %c0_22 = arith.constant 0 : index
    %46 = vector.load %arg8[%c0_21, %c0_22] : memref<1x32xf32, #tpu.memory_space<vmem>>, vector<1x32xf32>
    %47 = vector.broadcast %46 : vector<1x32xf32> to vector<8x32xf32>
    %48 = arith.addf %25, %47 : vector<8x32xf32>
    %cst_23 = arith.constant 0.000000e+00 : f32
    %49 = vector.broadcast %cst_23 : f32 to vector<8x32xf32>
    %50 = arith.subf %49, %48 : vector<8x32xf32>
    %51 = math.exp %50 : vector<8x32xf32>
    %cst_24 = arith.constant 1.000000e+00 : f32
    %52 = vector.broadcast %cst_24 : f32 to vector<8x32xf32>
    %53 = arith.addf %52, %51 : vector<8x32xf32>
    %cst_25 = arith.constant 1.000000e+00 : f32
    %54 = vector.broadcast %cst_25 : f32 to vector<8x32xf32>
    %55 = arith.divf %54, %53 : vector<8x32xf32>
    %56 = arith.mulf %45, %55 : vector<8x32xf32>
    %57 = vector.extract_strided_slice %44 {offsets = [0, 0], sizes = [8, 32], strides = [1, 1]} : vector<8x64xf32> to vector<8x32xf32>
    %58 = arith.addf %4, %57 : vector<8x32xf32>
    %59 = arith.mulf %9, %56 : vector<8x32xf32>
    %60 = arith.addf %8, %59 : vector<8x32xf32>
    %61 = arith.mulf %13, %56 : vector<8x32xf32>
    %62 = arith.addf %12, %61 : vector<8x32xf32>
    %63 = arith.mulf %17, %56 : vector<8x32xf32>
    %64 = arith.addf %16, %63 : vector<8x32xf32>
    %65 = tpu.concatenate %58, %60, %62, %64 in 1 : vector<8x32xf32>, vector<8x32xf32>, vector<8x32xf32>, vector<8x32xf32> -> vector<8x128xf32>
    %c0_26 = arith.constant 0 : index
    %c0_27 = arith.constant 0 : index
    %66 = vector.load %arg13[%c0_26, %c0_27] : memref<8x128xf32, #tpu.memory_space<vmem>>, vector<8x128xf32>
    tpu.vector_store %arg13[%c0_26, %c0_27], %65 {strides = array<i32>} : memref<8x128xf32, #tpu.memory_space<vmem>>, vector<8x128xf32>,
    %c0_28 = arith.constant 0 : index
    %c0_29 = arith.constant 0 : index
    %67 = vector.load %arg9[%c0_28, %c0_29] : memref<32x32xf32, #tpu.memory_space<vmem>>, vector<32x32xf32>
    %cst_30 = arith.constant dense<0.000000e+00> : vector<8x32xf32>
    %68 = tpu.matmul %58, %67, %cst_30 {dimension_numbers = #tpu.dot_dimension_numbers<[1], [0], [0], [1], [0, 0, 1, 1], [], []>} : vector<8x32xf32>, vector<32x32xf32>, vector<8x32xf32> -> vector<8x32xf32>
    %c0_31 = arith.constant 0 : index
    %c0_32 = arith.constant 0 : index
    %69 = vector.load %arg10[%c0_31, %c0_32] : memref<1x32xf32, #tpu.memory_space<vmem>>, vector<1x32xf32>
    %70 = vector.broadcast %69 : vector<1x32xf32> to vector<8x32xf32>
    %71 = arith.addf %68, %70 : vector<8x32xf32>
    %cst_33 = arith.constant 0.000000e+00 : f32
    %72 = vector.broadcast %cst_33 : f32 to vector<8x32xf32>
    %73 = arith.subf %72, %71 : vector<8x32xf32>
    %74 = math.exp %73 : vector<8x32xf32>
    %cst_34 = arith.constant 1.000000e+00 : f32
    %75 = vector.broadcast %cst_34 : f32 to vector<8x32xf32>
    %76 = arith.addf %75, %74 : vector<8x32xf32>
    %cst_35 = arith.constant 1.000000e+00 : f32
    %77 = vector.broadcast %cst_35 : f32 to vector<8x32xf32>
    %78 = arith.divf %77, %76 : vector<8x32xf32>
    %79 = arith.mulf %71, %78 : vector<8x32xf32>
    %c0_36 = arith.constant 0 : index
    %c0_37 = arith.constant 0 : index
    %80 = vector.load %arg11[%c0_36, %c0_37] : memref<32x96xf32, #tpu.memory_space<vmem>>, vector<32x96xf32>
    %cst_38 = arith.constant dense<0.000000e+00> : vector<8x96xf32>
    %81 = tpu.matmul %79, %80, %cst_38 {dimension_numbers = #tpu.dot_dimension_numbers<[1], [0], [0], [1], [0, 0, 1, 1], [], []>} : vector<8x32xf32>, vector<32x96xf32>, vector<8x96xf32> -> vector<8x96xf32>
    %c0_39 = arith.constant 0 : index
    %c0_40 = arith.constant 0 : index
    %82 = vector.load %arg12[%c0_39, %c0_40] : memref<1x96xf32, #tpu.memory_space<vmem>>, vector<1x96xf32>
    %83 = vector.broadcast %82 : vector<1x96xf32> to vector<8x96xf32>
    %84 = arith.addf %81, %83 : vector<8x96xf32>
    %85 = tpu.concatenate %84, %60, %62, %64 in 1 : vector<8x96xf32>, vector<8x32xf32>, vector<8x32xf32>, vector<8x32xf32> -> vector<8x192xf32>
    %c0_41 = arith.constant 0 : index
    %c0_42 = arith.constant 0 : index
    %86 = vector.load %arg14[%c0_41, %c0_42] : memref<8x192xf32, #tpu.memory_space<vmem>>, vector<8x192xf32>
    tpu.vector_store %arg14[%c0_41, %c0_42], %85 {strides = array<i32>} : memref<8x192xf32, #tpu.memory_space<vmem>>, vector<8x192xf32>,
    return
  }
  func.func @transform_0(%arg0: i32) -> (i32, i32) {
    %c0_i32 = arith.constant 0 : i32
    %c0_i32_0 = arith.constant 0 : i32
    return %arg0, %c0_i32 : i32, i32
  }
  func.func @transform_1(%arg0: i32) -> (i32, i32) {
    %c0_i32 = arith.constant 0 : i32
    %c0_i32_0 = arith.constant 0 : i32
    return %arg0, %c0_i32 : i32, i32
  }
  func.func @transform_2(%arg0: i32) -> (i32, i32) {
    %c0_i32 = arith.constant 0 : i32
    %c0_i32_0 = arith.constant 0 : i32
    %c0_i32_1 = arith.constant 0 : i32
    return %c0_i32, %c0_i32_0 : i32, i32
  }
  func.func @transform_3(%arg0: i32) -> (i32, i32) {
    %c0_i32 = arith.constant 0 : i32
    %c0_i32_0 = arith.constant 0 : i32
    %c0_i32_1 = arith.constant 0 : i32
    return %c0_i32, %c0_i32_0 : i32, i32
  }
  func.func @transform_4(%arg0: i32) -> (i32, i32) {
    %c0_i32 = arith.constant 0 : i32
    %c0_i32_0 = arith.constant 0 : i32
    %c0_i32_1 = arith.constant 0 : i32
    return %c0_i32, %c0_i32_0 : i32, i32
  }
  func.func @transform_5(%arg0: i32) -> (i32, i32) {
    %c0_i32 = arith.constant 0 : i32
    %c0_i32_0 = arith.constant 0 : i32
    %c0_i32_1 = arith.constant 0 : i32
    return %c0_i32, %c0_i32_0 : i32, i32
  }
  func.func @transform_6(%arg0: i32) -> (i32, i32) {
    %c0_i32 = arith.constant 0 : i32
    %c0_i32_0 = arith.constant 0 : i32
    %c0_i32_1 = arith.constant 0 : i32
    return %c0_i32, %c0_i32_0 : i32, i32
  }
  func.func @transform_7(%arg0: i32) -> (i32, i32) {
    %c0_i32 = arith.constant 0 : i32
    %c0_i32_0 = arith.constant 0 : i32
    %c0_i32_1 = arith.constant 0 : i32
    return %c0_i32, %c0_i32_0 : i32, i32
  }
  func.func @transform_8(%arg0: i32) -> (i32, i32) {
    %c0_i32 = arith.constant 0 : i32
    %c0_i32_0 = arith.constant 0 : i32
    %c0_i32_1 = arith.constant 0 : i32
    return %c0_i32, %c0_i32_0 : i32, i32
  }
  func.func @transform_9(%arg0: i32) -> (i32, i32) {
    %c0_i32 = arith.constant 0 : i32
    %c0_i32_0 = arith.constant 0 : i32
    %c0_i32_1 = arith.constant 0 : i32
    return %c0_i32, %c0_i32_0 : i32, i32
  }
  func.func @transform_10(%arg0: i32) -> (i32, i32) {
    %c0_i32 = arith.constant 0 : i32
    %c0_i32_0 = arith.constant 0 : i32
    %c0_i32_1 = arith.constant 0 : i32
    return %c0_i32, %c0_i32_0 : i32, i32
  }
  func.func @transform_11(%arg0: i32) -> (i32, i32) {
    %c0_i32 = arith.constant 0 : i32
    %c0_i32_0 = arith.constant 0 : i32
    %c0_i32_1 = arith.constant 0 : i32
    return %c0_i32, %c0_i32_0 : i32, i32
  }
  func.func @transform_12(%arg0: i32) -> (i32, i32) {
    %c0_i32 = arith.constant 0 : i32
    %c0_i32_0 = arith.constant 0 : i32
    return %arg0, %c0_i32 : i32, i32
  }
  func.func @transform_13(%arg0: i32) -> (i32, i32) {
    %c0_i32 = arith.constant 0 : i32
    %c0_i32_0 = arith.constant 0 : i32
    return %arg0, %c0_i32 : i32, i32
  }
}

</mosaic_0001>

<bundles_post_ra>
// kernel: savenet_forward.7
= control target key start
LH: loop header
LB: loop body
LE: loop exit
PB: predicated region body
PF: predicated region fallthrough
CT: control target
= control target key end

     0   :  { %v646_v0 = vmov 0.0|0.0   ;;  %vm647_vm0 = vmmov 0   ;;  %v648_v4 = vmov 0.0   ;;  %vm40_vm1 = vcmask 261120   ;;  %s801_s1 = inlined_call_operand.vmem [shape: f32[32,96], index: 1, kind: input, shape index: {}]   ;;  %s802_s3 = inlined_call_operand.vmem [shape: f32[32,32], index: 3, kind: input, shape index: {}]   ;;  %s803_s0 = inlined_call_operand.vmem [shape: f32[8,32], index: 0, kind: input, shape index: {}]   ;;  %s804_s5 = inlined_call_operand.vmem [shape: f32[32,96], index: 5, kind: input, shape index: {}]   ;;  %s805_s2 = inlined_call_operand.vmem [shape: f32[1,96], index: 2, kind: input, shape index: {}]   ;;  %s806_s4 = inlined_call_operand.vmem [shape: f32[1,32], index: 4, kind: input, shape index: {}]   ;;  %s807_s6 = inlined_call_operand.vmem [shape: f32[1,96], index: 6, kind: input, shape index: {}]   ;;  %s808_s8 = inlined_call_operand.vmem [shape: f32[8,192], index: 8, kind: output, shape index: {1}]   ;;  %s809_s7 = inlined_call_operand.vmem [shape: f32[8,128], index: 7, kind: output, shape index: {0}]  }
   0x1   :  { %604 = vmatprep.subr.bf16.mxu0 %v646_v0  ;;  %v29_v1 = vld [vmem:[%s801_s1] sm:$0xff]  ;;  %v30_v2 = vld [vmem:[%s801_s1 + $0x8] sm:$0xff]  ;;  %v31_v3 = vld [vmem:[%s801_s1 + $0x10] sm:$0xff]  ;;  %579 = vmatprep.mubr.msk.f32.mxu0 %vm647_vm0, %v648_v4  ;;  %v649_v42 = vmov 683565275  }
   0x2   :  { %v605_v5 = vpack.c.bf16 %v30_v2, %v29_v1  ;;  %v32_v6 = vld [vmem:[%s801_s1 + $0x18] sm:$0xff]  ;;  %610 = vmatprep.subr.bf16.mxu1 %v646_v0  ;;  %v355_v7 = vld [vmem:[%s802_s3] sm:$0xff]  ;;  %590 = vmatprep.mubr.msk.f32.mxu1 %vm647_vm0, %v648_v4  ;;  %v356_v8 = vld [vmem:[%s802_s3 + $0x8] sm:$0xff]  ;;  %v650_v44 = vmov 2475754826  }
   0x3   :  { %v357_v9 = vld [vmem:[%s802_s3 + $0x10] sm:$0xff]  ;;  %v358_v10 = vld [vmem:[%s802_s3 + $0x18] sm:$0xff]  ;;  %v608_v11 = vpack.c.bf16 %v32_v6, %v31_v3  ;;  %v611_v12 = vpack.c.bf16 %v356_v8, %v355_v7  ;;  %v732_v14 = vld [vmem:[%s803_s0] sm:$0xff]  ;;  %v651_v47 = vmov 2131351028  }
   0x4   :  { %606 = vmatpush3.bf16.msra.mxu0 %v605_v5  ;;  %v614_v13 = vpack.c.bf16 %v358_v10, %v357_v9  ;;  %v443_v15 = vld [vmem:[%s804_s5] sm:$0xff]  ;;  %v444_v16 = vld [vmem:[%s804_s5 + $0x8] sm:$0xff]  ;;  %v445_v18 = vld [vmem:[%s804_s5 + $0x10] sm:$0xff]  ;;  %v652_v50 = vmov 2102212464  }
   0x5   :  { %607 = vmatprep.subr.bf16.mxu0 %v646_v0  ;;  %612 = vmatpush3.bf16.msra.mxu1 %v611_v12  ;;  %v617_v17 = vpack.c.bf16 %v444_v16, %v443_v15  ;;  %v446_v19 = vld [vmem:[%s804_s5 + $0x18] sm:$0xff]  ;;  %v542_v21 = vld [vmem:[%s805_s2] ss:$0 sm:$0xff]  ;;  %v653_v53 = vmov 920167782   ;;  %s655_s2 = smov 96  }
   0x6   :  { %613 = vmatprep.subr.bf16.mxu1 %v646_v0  ;;  %v620_v20 = vpack.c.bf16 %v446_v19, %v445_v18  ;;  %v552_v25 = vld [vmem:[%s806_s4] ss:$0 sm:$0xff]  ;;  %v654_v56 = vmov 1326507024   ;;  %s656_s4 = smov 64   ;;  %s657_s5 = smov 32  }
   0x8   :  { %609 = vmatpush3.bf16.msra.mxu0 %v608_v11 }
   0x9   :  { %616 = vmatprep.subr.bf16.mxu0 %v646_v0  ;;  %615 = vmatpush3.bf16.msra.mxu1 %v614_v13 }
   0xb   :  { %580 = vmatmul.mubr.msk.f32.vlgmr.msra.gmra.mrb[0].mxu0 %vm40_vm1, %v732_v14 }
   0xc   :  { %601 = vmatprep.mubr.msk.f32.mxu0 %vm647_vm0, %v648_v4  ;;  %591 = vmatmul.mubr.msk.f32.vlgmr.msra.gmra.mrb[0].mxu1 %vm40_vm1, %v732_v14 }
   0xd   :  { %618 = vmatpush3.bf16.msra.mxu0 %v617_v17 }
   0xe   :  { %619 = vmatprep.subr.bf16.mxu0 %v646_v0 }
  0x11   :  { %621 = vmatpush3.bf16.msra.mxu0 %v620_v20 }
  0xde   :  { %v110_v22 = vpop.f32.mrb[0].mxu0 }
  0xdf   :  { %v754_v23 = vadd.f32 %v542_v21, %v110_v22  ;;  %v581_v24 = vpop.f32.mrb[1].mxu0  ;;  %v432_v26 = vpop.f32.mrb[0].mxu1 }
  0xe0   :  { %v592_v28 = vpop.f32.mrb[1].mxu1  ;;  %v760_v29 = vadd.f32 %v552_v25, %v432_v26 }
  0xe1   :  { %v117_v27 = vand.u32 2139095040, %v754_v23  ;;  %v114_v33 = vand.u32 2147483647, %v754_v23  ;;  %vm116_vm9 = vcmp.lt.s32.totalorder %v754_v23, 0 }
  0xe2   :  { %v436_v31 = vsub.f32 0.0, %v760_v29 }
  0xe3   :  { %v118_v30 = vshrl.u32 %v117_v27, 23  ;;  %v121_v36 = vand.u32 8388607, %v114_v33  ;;  %vm115_vm10 = vcmp.le.f32.partialorder %v114_v33, 0.7853982 }
  0xe4   :  { %v437_v34 = vmul.f32 1.442695, %v436_v31 }
  0xe5   :  { %v544_v32 = vadd.s32 4294967169, %v118_v30  ;;  %v122_v40 = vor.u32 8388608, %v121_v36 }
  0xe6   :  { %638 = vpow2.f32 %v437_v34 }
  0xe7   :  { %v124_v35 = vadd.s32 1, %v544_v32  ;;  %v162_v61 = vshll.u32 %v122_v40, 8 }
  0xe9   :  { %vm125_vm2 = vcmp.gt.s32.totalorder %v124_v35, 0 }
  0xea   :  { %v126_v37 = vsel %vm125_vm2, %v124_v35, 0  ;;  %vm206_vm2 = vweird.f32 %v754_v23 }
  0xeb   :  { %v128_v38 = vand.u32 31, %v126_v37  ;;  %v127_v41 = vshrl.u32 %v126_v37, 5 }
  0xed   :  { %v129_v39 = vsub.s32 32, %v128_v38  ;;  %v131_v43 = vshll.u32 %v649_v42, %v128_v38  ;;  %v134_v45 = vshll.u32 %v650_v44, %v128_v38  ;;  %v137_v49 = vshll.u32 %v651_v47, %v128_v38 }
  0xee   :  { %v140_v52 = vshll.u32 %v652_v50, %v128_v38  ;;  %v143_v55 = vshll.u32 %v653_v53, %v128_v38  ;;  %vm146_vm3 = vcmp.lt.s32.totalorder %v127_v41, 1  ;;  %vm149_vm4 = vcmp.lt.s32.totalorder %v127_v41, 4 }
  0xef   :  { %v132_v46 = vshrl.u32 %v650_v44, %v129_v39  ;;  %v135_v48 = vshrl.u32 %v651_v47, %v129_v39  ;;  %v138_v51 = vshrl.u32 %v652_v50, %v129_v39  ;;  %v141_v54 = vshrl.u32 %v653_v53, %v129_v39 }
  0xf0   :  { %v144_v57 = vshrl.u32 %v654_v56, %v129_v39  ;;  %v639_v62 = vpop.eup %638  ;;  %v130_v1 = vshrl.u32 %v649_v42, %v129_v39  ;;  %vm148_vm5 = vcmp.lt.s32.totalorder %v127_v41, 3  ;;  %vm147_vm6 = vcmp.lt.s32.totalorder %v127_v41, 2 }
  0xf1   :  { %v133_v58 = vor.u32 %v132_v46, %v131_v43  ;;  %v136_v59 = vor.u32 %v135_v48, %v134_v45  ;;  %v139_v60 = vor.u32 %v138_v51, %v137_v49  ;;  %v142_v63 = vor.u32 %v141_v54, %v140_v52 }
  0xf2   :  { %v145_v0 = vor.u32 %v144_v57, %v143_v55  ;;  %v439_v7 = vadd.f32 1.0, %v639_v62 }
  0xf3   :  { %v151_v2 = vsel %vm149_vm4, %v139_v60, 2102212464  ;;  %v154_v3 = vsel %vm146_vm3, %v133_v58, %v136_v59  ;;  %v158_v4 = vsel %vm146_vm3, %v136_v59, %v139_v60  ;;  %v155_v5 = vsel %vm149_vm4, %v142_v63, 920167782 }
  0xf4   :  { %v159_v6 = vsel %vm149_vm4, %v145_v0, 1326507024  ;;  %v150_v8 = vsel %vm146_vm3, %v130_v1, %v133_v58  ;;  %v156_v9 = vsel %vm148_vm5, %v139_v60, %v155_v5  ;;  %v152_v11 = vsel %vm148_vm5, %v136_v59, %v151_v2 }
  0xf5   :  { %v160_v10 = vsel %vm148_vm5, %v142_v63, %v159_v6  ;;  %v157_v12 = vsel %vm147_vm6, %v154_v3, %v156_v9  ;;  %640 = vrcp.f32 %v439_v7  ;;  %v153_v19 = vsel %vm147_vm6, %v150_v8, %v152_v11 }
  0xf6   :  { %v161_v13 = vsel %vm147_vm6, %v158_v4, %v160_v10  ;;  %v769_v17 = vmul.u32.u64.low %v162_v61, %v157_v12  ;;  %v770_v18 = vmul.u32.u64.high %v162_v61, %v157_v12, %v769_v17  ;;  %v169_v21 = vmul.u32 %v162_v61, %v153_v19  ;;  %v554_v19 = vld [vmem:[%s807_s6] ss:$0 sm:$0xff] }
  0xf7   :  { %v766_v15 = vmul.u32.u64.low %v162_v61, %v161_v13  ;;  %v767_v16 = vmul.u32.u64.high %v162_v61, %v161_v13, %v766_v15  ;;  %vm347_vm3 = vcmask 523264   ;;  %vm530_vm4 = vcmask 785408  }
  0xf8   :  { %v172_v20 = vadd.s32 1, %v770_v18 }
  0xf9   :  { %vm171_vm7 = vc.u32 %v767_v16, %v769_v17  ;;  %v170_v38 = vadd.s32 %v769_v17, %v767_v16 }
  0xfa   :  { %v173_v22 = vsel %vm171_vm7, %v172_v20, %v770_v18 }
  0xfb   :  { %v174_v24 = vadd.s32 %v173_v22, %v169_v21 }
  0xfd   :  { %v175_v26 = vadd.s32 536870912, %v174_v24 }
  0xff   :  { %v641_v25 = vpop.eup %640  ;;  %v176_v28 = vshrl.u32 %v175_v26, 30 }
 0x100   :  { %v442_v27 = vmul.f32 %v641_v25, %v760_v29 }
 0x101   :  { %v177_v30 = vshll.u32 %v176_v28, 30  ;;  %v200_v49 = vsub.s32 4, %v176_v28 }
 0x102   :  { %602 = vmatmul.mubr.msk.f32.vlgmr.msra.gmra.mrb[2].mxu0 %vm40_vm1, %v442_v27 }
 0x103   :  { %v178_v31 = vsub.s32 %v174_v24, %v177_v30  ;;  %v201_v52 = vsel %vm116_vm9, %v200_v49, %v176_v28 }
 0x104   :  { %v203_v54 = vsel %vm115_vm10, 0, %v201_v52 }
 0x105   :  { %v180_v32 = vsub.s32 0, %v178_v31  ;;  %v207_v55 = vadd.s32 3, %v203_v54  ;;  %v311_v56 = vand.u32 3, %v203_v54 }
 0x107   :  { %v545_v34 = vmin.u32 %v180_v32, %v178_v31  ;;  %v208_v57 = vand.u32 3, %v207_v55  ;;  %vm316_vm11 = vcmp.eq.s32.totalorder %v311_v56, 2  ;;  %vm313_vm13 = vcmp.eq.s32.totalorder %v311_v56, 0 }
 0x108   :  { %vm312_vm15 = vcmp.lt.s32.totalorder %v311_v56, 2 }
 0x109   :  { %v182_v35 = vclz %v545_v34  ;;  %vm213_vm12 = vcmp.eq.s32.totalorder %v208_v57, 2  ;;  %vm210_vm14 = vcmp.eq.s32.totalorder %v208_v57, 0  ;;  %vm209_vm0 = vcmp.lt.s32.totalorder %v208_v57, 2 }
 0x10b   :  { %v546_v36 = vadd.s32 4294967294, %v182_v35 }
 0x10d   :  { %vm547_vm8 = vcmp.lt.s32.totalorder %v546_v36, 0 }
 0x10e   :  { %v185_v37 = vsel %vm547_vm8, 0, %v546_v36 }
 0x10f   :  { %v186_v39 = vsub.s32 32, %v185_v37  ;;  %v190_v40 = vsub.s32 4294967266, %v185_v37  ;;  %v187_v41 = vshll.u32 %v178_v31, %v185_v37 }
 0x111   :  { %v188_v42 = vshrl.u32 %v170_v38, %v186_v39  ;;  %v191_v43 = vadd.s32 127, %v190_v40 }
 0x113   :  { %v189_v44 = vor.u32 %v188_v42, %v187_v41  ;;  %v192_v29 = vshll.u32 %v191_v43, 23 }
 0x115   :  { %v193_v45 = vor.u32 4788187, %v192_v29  ;;  %v196_v47 = vcvt.s32.f32 %v189_v44 }
 0x117   :  { %v194_v46 = vand.u32 2147483647, %v193_v45 }
 0x119   :  { %v197_v48 = vmul.f32 %v196_v47, %v194_v46 }
 0x11b   :  { %v198_v50 = vxor.u32 2147483648, %v197_v48 }
 0x11d   :  { %v199_v51 = vsel %vm116_vm9, %v198_v50, %v197_v48 }
 0x11e   :  { %v202_v53 = vsel %vm115_vm10, %v754_v23, %v199_v51 }
 0x11f   :  { %642 = vcosq.f32 %v202_v53 }
 0x120   :  { %644 = vsinq.f32 %v202_v53 }
 0x129   :  { %v643_v58 = vpop.eup %642 }
 0x12a   :  { %v645_v59 = vpop.eup %644  ;;  %v214_v60 = vxor.u32 2147483648, %v643_v58 }
 0x12b   :  { %v211_v61 = vxor.u32 2147483648, %v645_v59 }
 0x12c   :  { %v318_v62 = vsel %vm316_vm11, %v214_v60, %v645_v59  ;;  %v215_v33 = vsel %vm213_vm12, %v214_v60, %v645_v59 }
 0x12d   :  { %v315_v63 = vsel %vm313_vm13, %v643_v58, %v211_v61  ;;  %v212_v0 = vsel %vm210_vm14, %v643_v58, %v211_v61 }
 0x12e   :  { %v319_v1 = vsel %vm312_vm15, %v315_v63, %v318_v62  ;;  %v216_v2 = vsel %vm209_vm0, %v212_v0, %v215_v33 }
 0x12f   :  { %v320_v3 = vsel %vm206_vm2, nan, %v319_v1  ;;  %v217_v4 = vsel %vm206_vm2, nan, %v216_v2 }
 0x130   :  { %322 = vrot.lane.b32.xlu1 %v320_v3, %s655_s2  ;;  %332 = vrot.lane.b32.xlu0 %v217_v4, %s655_s2 }
 0x134   :  { %327 = vrot.lane.b32.xlu0 %v754_v23, %s656_s4 }
 0x1a2   :  { %v333_v5 = vpop.permute.xlu0 %332  ;;  %v323_v12 = vpop.permute.xlu1 %322 }
 0x1a3   :  { %v335_v6 = vmul.f32 %v333_v5, %v217_v4  ;;  %v325_v13 = vmul.f32 %v323_v12, %v217_v4 }
 0x1a6   :  { %v328_v7 = vpop.permute.xlu0 %327 }
 0x1a7   :  { %v336_v8 = vmul.f32 %v335_v6, %v328_v7  ;;  %v337_v9 = vmul.f32 %v328_v7, %v320_v3  ;;  %v330_v15 = vmul.f32 %v328_v7, %v325_v13 }
 0x1a9   :  { %343 = vrot.lane.b32.xlu0 %v337_v9, %s656_s4  ;;  %339 = vrot.lane.b32.xlu1 %v336_v8, %s657_s5 }
 0x1d5   :  { %v523_v10 = vpop.f32.mrb[2].mxu0 }
 0x1d6   :  { %v603_v11 = vpop.f32.mrb[3].mxu0  ;;  %v524_v20 = vadd.f32 %v554_v19, %v523_v10 }
 0x21b   :  { %v344_v16 = vpop.permute.xlu0 %343  ;;  %v340_v17 = vpop.permute.xlu1 %339 }
 0x21c   :  { %v346_v18 = vsel %vm40_vm1, %v330_v15, %v340_v17 }
 0x21d   :  { %v348_v23 = vsel %vm347_vm3, %v346_v18, %v344_v16 }
 0x21e   :  { %527 = vrot.lane.b32.xlu0 %v348_v23, %s655_s2  ;;  %350 = vrot.lane.b32.xlu1 %v348_v23, %s657_s5 }
 0x290   :  { %v528_v21 = vpop.permute.xlu0 %527  ;;  %v351_v22 = vpop.permute.xlu1 %350 }
 0x291   :  { %v531_v24 = vsel %vm530_vm4, %v524_v20, %v528_v21  ;;  %533 = vst.msk [vmem:[%s808_s8 + $0x8] sm:$0xff] %vm347_vm3, %v528_v21  ;;  %v353_v25 = vsel %vm40_vm1, %v732_v14, %v351_v22 }
 0x292   :  { %532 = vst [vmem:[%s808_s8] sm:$0xff] %v531_v24  ;;  %354 = vst [vmem:[%s809_s7] sm:$0xff] %v353_v25 }

// kernel: savenet_forward.6
= control target key start
LH: loop header
LB: loop body
LE: loop exit
PB: predicated region body
PF: predicated region fallthrough
CT: control target
= control target key end

     0   :  { %vm1703_vm0 = vcmask 1040384   ;;  %v2072_v0 = vmov 0   ;;  %vm2073_vm1 = vmmov 1   ;;  %v2074_v8 = vmov 0.0|0.0   ;;  %s3646_s0 = inlined_call_operand.vmem [shape: f32[56,1], index: 0, kind: input, shape index: {}]   ;;  %s3647_s3 = inlined_call_operand.vmem [shape: f32[9,96], index: 3, kind: input, shape index: {}]   ;;  %s3648_s1 = inlined_call_operand.vmem [shape: f32[56,9], index: 1, kind: input, shape index: {}]   ;;  %s3649_s2 = inlined_call_operand.vmem [shape: f32[1,20], index: 2, kind: input, shape index: {}]   ;;  %s3650_s5 = inlined_call_operand.vmem [shape: f32[56,96], index: 5, kind: output, shape index: {1}]   ;;  %s3651_s4 = inlined_call_operand.vmem [shape: f32[56,20], index: 4, kind: output, shape index: {0}]  }
   0x1   :  { %1996 = vset.pattern.permute.xlu1 %v2072_v0  ;;  %1995 = vset.pattern.permute.xlu0 %v2072_v0  ;;  %v2116_v1 = vld [vmem:[%s3646_s0 + $0x10] sm:$0xff]  ;;  %v2121_v2 = vld [vmem:[%s3646_s0] sm:$0xff]  ;;  %v1680_v6 = vld [vmem:[%s3647_s3 + $0x8] sm:$0x1]  ;;  %vm2075_vm3 = vmmov 0   ;;  %v2076_v14 = vmov 0.0  }
   0x2   :  { %v1679_v3 = vld [vmem:[%s3647_s3] sm:$0xff]  ;;  %39 = vperm.xlu1 %1996, %v2116_v1   ;;  %v2128_v4 = vmul.f32 0.62831855, %v2116_v1  ;;  %29 = vperm.xlu0 %1995, %v2121_v2   ;;  %v2132_v5 = vmul.f32 0.62831855, %v2121_v2  ;;  %vm2137_vm2 = vmpackc.low %vm1703_vm0, %vm2073_vm1  ;;  %v2144_v10 = vld [vmem:[%s3646_s0 + $0x18] sm:$0xff] }
   0x3   :  { %1922 = vmatprep.subr.bf16.mxu0 %v2074_v8  ;;  %v1923_v9 = vpack.c.bf16 %v1680_v6, %v1679_v3  ;;  %1926 = vmatprep.subr.bf16.mxu1 %v2074_v8  ;;  %v2149_v11 = vld [vmem:[%s3646_s0 + $0x8] sm:$0xff]  ;;  %v2161_v16 = vmul.f32 0.62831855, %v2144_v10  ;;  %v1672_v17 = vld [vmem:[%s3648_s1] sm:$0xff]  ;;  %vm1681_vm4 = vcmask 72704   ;;  %v25_v34 = vld [vmem:[%s3646_s0 + $0x30] sm:$0xff] }
   0x4   :  { %v1082_v12 = vand.u32 2139095040, %v2128_v4  ;;  %v876_v13 = vand.u32 2139095040, %v2132_v5  ;;  %1901 = vmatprep.mubr.msk.f32.mxu0 %vm2075_vm3, %v2076_v14  ;;  %v2155_v15 = vmul.f32 0.62831855, %v2149_v11  ;;  %1913 = vmatprep.mubr.msk.f32.mxu1 %vm2075_vm3, %v2076_v14  ;;  %v1676_v18 = vld [vmem:[%s3648_s1 + $0x20] sm:$0xff]  ;;  %v2174_v19 = vld [vmem:[%s3646_s0 + $0x28] sm:$0xff] }
   0x5   :  { %1925 = vmatpush3.bf16.msk.msra.mxu0 %vm2137_vm2, %v1923_v9  ;;  %1927 = vmatpush3.bf16.msk.msra.mxu1 %vm2137_vm2, %v1923_v9  ;;  %v23_v23 = vld [vmem:[%s3646_s0 + $0x20] sm:$0xff]  ;;  %v2185_v25 = vmul.f32 0.62831855, %v2174_v19  ;;  %v1185_v26 = vand.u32 2139095040, %v2161_v16  ;;  %v1673_v27 = vld [vmem:[%s3648_s1 + $0x8] sm:$0xff]  ;;  %v1674_v37 = vld [vmem:[%s3648_s1 + $0x10] sm:$0xff] }
   0x6   :  { %v1083_v20 = vshrl.u32 %v1082_v12, 23  ;;  %v877_v21 = vshrl.u32 %v876_v13, 23  ;;  %44 = vperm.xlu1 %1996, %v2144_v10   ;;  %34 = vperm.xlu0 %1995, %v2149_v11   ;;  %v979_v22 = vand.u32 2139095040, %v2155_v15  ;;  %v1677_v28 = vld [vmem:[%s3648_s1 + $0x28] sm:$0xff]  ;;  %v810_v31 = vmax.f32 %v2121_v2, 1e-08 }
   0x7   :  { %v2198_v33 = vmul.f32 0.62831855, %v23_v23  ;;  %v1391_v35 = vand.u32 2139095040, %v2185_v25  ;;  %v1186_v36 = vshrl.u32 %v1185_v26, 23  ;;  %v1678_v38 = vld [vmem:[%s3648_s1 + $0x30] sm:$0xff]  ;;  %v1675_v49 = vld [vmem:[%s3648_s1 + $0x18] sm:$0xff] }
   0x8   :  { %v1852_v24 = vadd.s32 4294967169, %v877_v21  ;;  %1902 = vmatmul.mubr.msk.f32.vlgmr.msra.gmra.mrb[0].mxu0 %vm1681_vm4, %v1672_v17  ;;  %1914 = vmatmul.mubr.msk.f32.vlgmr.msra.gmra.mrb[0].mxu1 %vm1681_vm4, %v1676_v18  ;;  %v1860_v29 = vadd.s32 4294967169, %v1083_v20  ;;  %v980_v32 = vshrl.u32 %v979_v22, 23  ;;  %v811_v41 = vmax.f32 %v2149_v11, 1e-08 }
   0x9   :  { %1904 = vmatprep.mubr.msk.f32.mxu0 %vm2075_vm3, %v2076_v14  ;;  %1916 = vmatprep.mubr.msk.f32.mxu1 %vm2075_vm3, %v2076_v14  ;;  %v812_v42 = vmax.f32 %v2116_v1, 1e-08  ;;  %v1288_v44 = vand.u32 2139095040, %v2198_v33  ;;  %v1392_v45 = vshrl.u32 %v1391_v35, 23  ;;  %v2217_v46 = vmul.f32 0.62831855, %v25_v34 }
   0xa   :  { %v883_v30 = vadd.s32 1, %v1852_v24  ;;  %54 = vperm.xlu1 %1996, %v2174_v19   ;;  %49 = vperm.xlu0 %1995, %v23_v23   ;;  %v1089_v39 = vadd.s32 1, %v1860_v29  ;;  %v1856_v43 = vadd.s32 4294967169, %v980_v32  ;;  %v1864_v48 = vadd.s32 4294967169, %v1186_v36 }
   0xb   :  { %v813_v50 = vmax.f32 %v2144_v10, 1e-08  ;;  %v814_v51 = vmax.f32 %v23_v23, 1e-08  ;;  %v1289_v53 = vshrl.u32 %v1288_v44, 23  ;;  %v1872_v54 = vadd.s32 4294967169, %v1392_v45 }
   0xc   :  { %vm884_vm5 = vcmp.gt.s32.totalorder %v883_v30, 0  ;;  %1905 = vmatmul.mubr.msk.f32.gmra.mrb[2].mxu0 %vm1681_vm4, %v1673_v27  ;;  %1917 = vmatmul.mubr.msk.f32.gmra.mrb[2].mxu1 %vm1681_vm4, %v1677_v28  ;;  %vm1090_vm6 = vcmp.gt.s32.totalorder %v1089_v39, 0  ;;  %v986_v52 = vadd.s32 1, %v1856_v43  ;;  %v1494_v55 = vand.u32 2139095040, %v2217_v46 }
   0xd   :  { %1907 = vmatprep.mubr.msk.f32.mxu0 %vm2075_vm3, %v2076_v14  ;;  %1919 = vmatprep.mubr.msk.f32.mxu1 %vm2075_vm3, %v2076_v14  ;;  %v885_v40 = vsel %vm884_vm5, %v883_v30, 0  ;;  %v2228_v56 = vsel %vm1090_vm6, %v1089_v39, 0  ;;  %v2230_v58 = vadd.s32 1, %v1864_v48  ;;  %v815_v59 = vmax.f32 %v2174_v19, 1e-08 }
   0xe   :  { %59 = vperm.xlu0 %1995, %v25_v34   ;;  %819 = vperm.xlu1 %1996, %v810_v31   ;;  %v887_v47 = vand.u32 31, %v885_v40  ;;  %v816_v60 = vmax.f32 %v25_v34, 1e-08  ;;  %v886_v61 = vshrl.u32 %v885_v40, 5  ;;  %vm987_vm7 = vcmp.gt.s32.totalorder %v986_v52, 0 }
   0xf   :  { %v1868_v62 = vadd.s32 4294967169, %v1289_v53  ;;  %v2233_v63 = vadd.s32 1, %v1872_v54  ;;  %v873_v0 = vand.u32 2147483647, %v2132_v5  ;;  %v2077_v1 = vmov 683565275  }
  0x10   :  { %1908 = vmatmul.mubr.msk.f32.gmra.mrb[4].mxu0 %vm1681_vm4, %v1674_v37  ;;  %1920 = vmatmul.mubr.msk.f32.gmra.mrb[4].mxu1 %vm1681_vm4, %v1678_v38  ;;  %v888_v57 = vsub.s32 32, %v887_v47  ;;  %v890_v3 = vshll.u32 %v2077_v1, %v887_v47  ;;  %v2078_v6 = vmov 2475754826   ;;  %v3656_v9 = vmov 2131351028  }
  0x11   :  { %1910 = vmatprep.mubr.msk.f32.mxu0 %vm2075_vm3, %v2076_v14  ;;  %v893_v8 = vshll.u32 %v2078_v6, %v887_v47  ;;  %v988_v12 = vsel %vm987_vm7, %v986_v52, 0  ;;  %v880_v13 = vand.u32 8388607, %v873_v0  ;;  %v896_v14 = vshll.u32 %v3656_v9, %v887_v47 }
  0x12   :  { %824 = vperm.xlu0 %1995, %v811_v41   ;;  %829 = vperm.xlu1 %1996, %v812_v42   ;;  %v891_v7 = vshrl.u32 %v2078_v6, %v888_v57  ;;  %v894_v10 = vshrl.u32 %v3656_v9, %v888_v57  ;;  %v889_v17 = vshrl.u32 %v2077_v1, %v888_v57  ;;  %vm905_vm8 = vcmp.lt.s32.totalorder %v886_v61, 1 }
  0x13   :  { %v881_v20 = vor.u32 8388608, %v880_v13  ;;  %v3654_v21 = vmov 2102212464   ;;  %v2081_v24 = vmov 920167782   ;;  %v990_v27 = vand.u32 31, %v988_v12 }
  0x14   :  { %1911 = vmatmul.mubr.msk.f32.gmra.mrb[6].mxu0 %vm1681_vm4, %v1675_v49  ;;  %v892_v18 = vor.u32 %v891_v7, %v890_v3  ;;  %v895_v19 = vor.u32 %v894_v10, %v893_v8  ;;  %v897_v22 = vshrl.u32 %v3654_v21, %v888_v57  ;;  %v899_v23 = vshll.u32 %v3654_v21, %v887_v47 }
  0x15   :  { %v900_v26 = vshrl.u32 %v2081_v24, %v888_v57  ;;  %v902_v28 = vshll.u32 %v2081_v24, %v887_v47  ;;  %v3658_v29 = vmov 1326507024   ;;  %vm906_vm9 = vcmp.lt.s32.totalorder %v886_v61, 2 }
  0x16   :  { %834 = vperm.xlu0 %1995, %v813_v50   ;;  %839 = vperm.xlu1 %1996, %v814_v51   ;;  %v903_v30 = vshrl.u32 %v3658_v29, %v888_v57  ;;  %v898_v31 = vor.u32 %v897_v22, %v896_v14  ;;  %vm907_vm10 = vcmp.lt.s32.totalorder %v886_v61, 3  ;;  %vm908_vm11 = vcmp.lt.s32.totalorder %v886_v61, 4 }
  0x17   :  { %v901_v32 = vor.u32 %v900_v26, %v899_v23  ;;  %vm1193_vm12 = vcmp.gt.s32.totalorder %v2230_v58, 0  ;;  %v909_v35 = vsel %vm905_vm8, %v889_v17, %v892_v18  ;;  %v913_v36 = vsel %vm905_vm8, %v892_v18, %v895_v19 }
  0x18   :  { %v904_v34 = vor.u32 %v903_v30, %v902_v28  ;;  %v921_v37 = vshll.u32 %v881_v20, 8  ;;  %v910_v38 = vsel %vm908_vm11, %v898_v31, 2102212464  ;;  %v917_v40 = vsel %vm905_vm8, %v895_v19, %v898_v31 }
  0x19   :  { %v914_v39 = vsel %vm908_vm11, %v901_v32, 920167782  ;;  %v976_v41 = vand.u32 2147483647, %v2155_v15  ;;  %v991_v42 = vsub.s32 32, %v990_v27  ;;  %v911_v43 = vsel %vm907_vm10, %v895_v19, %v910_v38 }
  0x1a   :  { %844 = vperm.xlu0 %1995, %v815_v59   ;;  %849 = vperm.xlu1 %1996, %v816_v60   ;;  %v915_v44 = vsel %vm907_vm10, %v898_v31, %v914_v39  ;;  %v918_v45 = vsel %vm908_vm11, %v904_v34, 1326507024  ;;  %v2256_v47 = vadd.s32 1, %v1868_v62  ;;  %v912_v48 = vsel %vm906_vm9, %v909_v35, %v911_v43 }
  0x1b   :  { %v916_v49 = vsel %vm906_vm9, %v913_v36, %v915_v44  ;;  %v919_v50 = vsel %vm907_vm10, %v901_v32, %v918_v45  ;;  %v989_v51 = vshrl.u32 %v988_v12, 5  ;;  %v928_v60 = vmul.u32 %v921_v37, %v912_v48 }
  0x1c   :  { %v920_v52 = vsel %vm906_vm9, %v917_v40, %v919_v50  ;;  %v2262_v53 = vmul.u32.u64.low %v921_v37, %v916_v49  ;;  %v2263_v54 = vmul.u32.u64.high %v921_v37, %v916_v49, %v2262_v53  ;;  %v983_v62 = vand.u32 8388607, %v976_v41 }
  0x1d   :  { %v2266_v57 = vmul.u32.u64.low %v921_v37, %v920_v52  ;;  %v2267_v59 = vmul.u32.u64.high %v921_v37, %v920_v52, %v2266_v57  ;;  %v993_v3 = vshll.u32 %v2077_v1, %v990_v27  ;;  %v994_v7 = vshrl.u32 %v2078_v6, %v991_v42 }
  0x1e   :  { %v996_v8 = vshll.u32 %v2078_v6, %v990_v27  ;;  %v997_v61 = vshrl.u32 %v3656_v9, %v991_v42  ;;  %v992_v10 = vshrl.u32 %v2077_v1, %v991_v42  ;;  %v999_v12 = vshll.u32 %v3656_v9, %v990_v27 }
  0x1f   :  { %v1000_v13 = vshrl.u32 %v3654_v21, %v991_v42  ;;  %v1002_v14 = vshll.u32 %v3654_v21, %v990_v27  ;;  %v931_v17 = vadd.s32 1, %v2263_v54  ;;  %v995_v18 = vor.u32 %v994_v7, %v993_v3 }
  0x20   :  { %v998_v19 = vor.u32 %v997_v61, %v996_v8  ;;  %v1003_v20 = vshrl.u32 %v2081_v24, %v991_v42  ;;  %vm930_vm13 = vc.u32 %v2267_v59, %v2262_v53  ;;  %v984_v22 = vor.u32 8388608, %v983_v62 }
  0x21   :  { %v1001_v23 = vor.u32 %v1000_v13, %v999_v12  ;;  %v1005_v26 = vshll.u32 %v2081_v24, %v990_v27  ;;  %v932_v28 = vsel %vm930_vm13, %v931_v17, %v2263_v54  ;;  %v1006_v31 = vshrl.u32 %v3658_v29, %v991_v42 }
  0x22   :  { %v1004_v30 = vor.u32 %v1003_v20, %v1002_v14  ;;  %vm1008_vm14 = vcmp.lt.s32.totalorder %v989_v51, 1  ;;  %v1194_v32 = vsel %vm1193_vm12, %v2230_v58, 0  ;;  %v933_v34 = vadd.s32 %v932_v28, %v928_v60 }
  0x23   :  { %vm1010_vm15 = vcmp.lt.s32.totalorder %v989_v51, 3  ;;  %vm1011_vm0 = vcmp.lt.s32.totalorder %v989_v51, 4  ;;  %v1007_v35 = vor.u32 %v1006_v31, %v1005_v26  ;;  %vm1009_vm1 = vcmp.lt.s32.totalorder %v989_v51, 2 }
  0x24   :  { %v1013_v36 = vsel %vm1011_vm0, %v1001_v23, 2102212464  ;;  %v1016_v37 = vsel %vm1008_vm14, %v995_v18, %v998_v19  ;;  %v934_v38 = vadd.s32 536870912, %v933_v34  ;;  %v1012_v39 = vsel %vm1008_vm14, %v992_v10, %v995_v18 }
  0x25   :  { %v1017_v27 = vsel %vm1011_vm0, %v1004_v30, 920167782  ;;  %v1020_v40 = vsel %vm1008_vm14, %v998_v19, %v1001_v23  ;;  %v1014_v43 = vsel %vm1010_vm15, %v998_v19, %v1013_v36  ;;  %v1021_v44 = vsel %vm1011_vm0, %v1007_v35, 1326507024 }
  0x26   :  { %v1018_v42 = vsel %vm1010_vm15, %v1001_v23, %v1017_v27  ;;  %v1024_v45 = vshll.u32 %v984_v22, 8  ;;  %v1093_v48 = vand.u32 31, %v2228_v56  ;;  %v2292_v58 = vshrl.u32 %v934_v38, 30 }
  0x27   :  { %v1019_v49 = vsel %vm1009_vm1, %v1016_v37, %v1018_v42  ;;  %v1022_v50 = vsel %vm1010_vm15, %v1004_v30, %v1021_v44  ;;  %v2296_v52 = vand.u32 31, %v1194_v32  ;;  %v1015_v3 = vsel %vm1009_vm1, %v1012_v39, %v1014_v43 }
  0x28   :  { %v1023_v54 = vsel %vm1009_vm1, %v1020_v40, %v1022_v50  ;;  %v2299_v57 = vmul.u32.u64.low %v1024_v45, %v1019_v49  ;;  %v2300_v60 = vmul.u32.u64.high %v1024_v45, %v1019_v49, %v2299_v57  ;;  %v936_v62 = vshll.u32 %v2292_v58, 30 }
  0x29   :  { %v2305_v7 = vmul.u32.u64.low %v1024_v45, %v1023_v54  ;;  %v2306_v8 = vmul.u32.u64.high %v1024_v45, %v1023_v54, %v2305_v7  ;;  %v2309_v61 = vshrl.u32 %v2228_v56, 5  ;;  %vm1399_vm2 = vcmp.gt.s32.totalorder %v2233_v63, 0 }
  0x2a   :  { %vm1296_vm3 = vcmp.gt.s32.totalorder %v2256_v47, 0  ;;  %v1094_v10 = vsub.s32 32, %v1093_v48  ;;  %v2313_v12 = vshrl.u32 %v1194_v32, 5  ;;  %v2315_v13 = vsub.s32 %v933_v34, %v936_v62 }
  0x2b   :  { %v1079_v14 = vand.u32 2147483647, %v2128_v4  ;;  %v2319_v51 = vsub.s32 32, %v2296_v52  ;;  %v2323_v17 = vshrl.u32 %v1494_v55, 23  ;;  %v1031_v56 = vmul.u32 %v1024_v45, %v1015_v3 }
  0x2c   :  { %v1034_v18 = vadd.s32 1, %v2300_v60  ;;  %v1400_v19 = vsel %vm1399_vm2, %v2233_v63, 0  ;;  %v2328_v20 = vsel %vm1296_vm3, %v2256_v47, 0  ;;  %v939_v22 = vsub.s32 0, %v2315_v13 }
  0x2d   :  { %vm1033_vm4 = vc.u32 %v2306_v8, %v2299_v57  ;;  %v2333_v23 = vshrl.u32 %v1400_v19, 5  ;;  %vm875_vm5 = vcmp.lt.s32.totalorder %v2132_v5, 0  ;;  %v929_v55 = vadd.s32 %v2262_v53, %v2267_v59 }
  0x2e   :  { %v1035_v26 = vsel %vm1033_vm4, %v1034_v18, %v2300_v60  ;;  %v1096_v28 = vshll.u32 %v2077_v1, %v1093_v48  ;;  %v1853_v63 = vmin.u32 %v939_v22, %v2315_v13  ;;  %v1086_v47 = vand.u32 8388607, %v1079_v14 }
  0x2f   :  { %v1097_v30 = vshrl.u32 %v2078_v6, %v1094_v10  ;;  %v1099_v31 = vshll.u32 %v2078_v6, %v1093_v48  ;;  %v1036_v32 = vadd.s32 %v1035_v26, %v1031_v56  ;;  %v1100_v34 = vshrl.u32 %v3656_v9, %v1094_v10 }
  0x30   :  { %v1102_v35 = vshll.u32 %v3656_v9, %v1093_v48  ;;  %v1103_v53 = vshrl.u32 %v3654_v21, %v1094_v10  ;;  %v941_v59 = vclz %v1853_v63  ;;  %v1105_v36 = vshll.u32 %v3654_v21, %v1093_v48 }
  0x31   :  { %v1106_v37 = vshrl.u32 %v2081_v24, %v1094_v10  ;;  %v1108_v38 = vshll.u32 %v2081_v24, %v1093_v48  ;;  %v959_v39 = vsub.s32 4, %v2292_v58  ;;  %v1037_v27 = vadd.s32 536870912, %v1036_v32 }
  0x32   :  { %v1095_v40 = vshrl.u32 %v2077_v1, %v1094_v10  ;;  %v1109_v43 = vshrl.u32 %v3658_v29, %v1094_v10  ;;  %v1854_v42 = vadd.s32 4294967294, %v941_v59  ;;  %v1087_v44 = vor.u32 8388608, %v1086_v47 }
  0x33   :  { %v1098_v45 = vor.u32 %v1097_v30, %v1096_v28  ;;  %v1107_v49 = vor.u32 %v1106_v37, %v1105_v36  ;;  %v2354_v50 = vshrl.u32 %v1037_v27, 30  ;;  %v1101_v54 = vor.u32 %v1100_v34, %v1099_v31 }
  0x34   :  { %v1104_v60 = vor.u32 %v1103_v53, %v1102_v35  ;;  %vm1114_vm6 = vcmp.lt.s32.totalorder %v2309_v61, 4  ;;  %vm1855_vm7 = vcmp.lt.s32.totalorder %v1854_v42, 0  ;;  %v1110_v62 = vor.u32 %v1109_v43, %v1108_v38 }
  0x35   :  { %vm1111_vm8 = vcmp.lt.s32.totalorder %v2309_v61, 1  ;;  %vm1113_vm9 = vcmp.lt.s32.totalorder %v2309_v61, 3  ;;  %v944_v48 = vsel %vm1855_vm7, 0, %v1854_v42  ;;  %v1039_v3 = vshll.u32 %v2354_v50, 30 }
  0x36   :  { %v1116_v7 = vsel %vm1114_vm6, %v1104_v60, 2102212464  ;;  %v1120_v10 = vsel %vm1114_vm6, %v1107_v49, 920167782  ;;  %v945_v56 = vsub.s32 32, %v944_v48  ;;  %v946_v18 = vshll.u32 %v2315_v13, %v944_v48 }
  0x37   :  { %v949_v22 = vsub.s32 4294967266, %v944_v48  ;;  %v960_v26 = vsel %vm875_vm5, %v959_v39, %v2292_v58  ;;  %v2368_v28 = vsub.s32 %v1036_v32, %v1039_v3  ;;  %vm1112_vm10 = vcmp.lt.s32.totalorder %v2309_v61, 2 }
  0x38   :  { %v1115_v63 = vsel %vm1111_vm8, %v1095_v40, %v1098_v45  ;;  %v1119_v47 = vsel %vm1111_vm8, %v1098_v45, %v1101_v54  ;;  %v947_v30 = vshrl.u32 %v929_v55, %v945_v56  ;;  %v1117_v13 = vsel %vm1113_vm9, %v1101_v54, %v1116_v7 }
  0x39   :  { %v950_v31 = vadd.s32 127, %v949_v22  ;;  %v1121_v34 = vsel %vm1113_vm9, %v1104_v60, %v1120_v10  ;;  %v1042_v58 = vsub.s32 0, %v2368_v28  ;;  %v1123_v32 = vsel %vm1111_vm8, %v1101_v54, %v1104_v60 }
  0x3a   :  { %v1124_v35 = vsel %vm1114_vm6, %v1110_v62, 1326507024  ;;  %v1127_v53 = vshll.u32 %v1087_v44, 8  ;;  %vm2386_vm11 = vcmp.le.f32.partialorder %v873_v0, 0.7853982  ;;  %v948_v59 = vor.u32 %v947_v30, %v946_v18 }
  0x3b   :  { %v951_v36 = vshll.u32 %v950_v31, 23  ;;  %v1125_v37 = vsel %vm1113_vm9, %v1107_v49, %v1124_v35  ;;  %v2392_v38 = vand.u32 31, %v1400_v19  ;;  %v962_v39 = vsel %vm2386_vm11, 0, %v960_v26 }
  0x3c   :  { %v1857_v27 = vmin.u32 %v1042_v58, %v2368_v28  ;;  %v1122_v40 = vsel %vm1112_vm10, %v1119_v47, %v1121_v34  ;;  %v955_v0 = vcvt.s32.f32 %v948_v59  ;;  %v1118_v42 = vsel %vm1112_vm10, %v1115_v63, %v1117_v13 }
  0x3d   :  { %v952_v43 = vor.u32 4788187, %v951_v36  ;;  %v1126_v44 = vsel %vm1112_vm10, %v1123_v32, %v1125_v37  ;;  %v1182_v54 = vand.u32 2147483647, %v2161_v16  ;;  %v2408_v60 = vshrl.u32 %v2328_v20, 5 }
  0x3e   :  { %v1044_v45 = vclz %v1857_v27  ;;  %v2403_v49 = vmul.u32.u64.low %v1127_v53, %v1126_v44  ;;  %v2404_v19 = vmul.u32.u64.high %v1127_v53, %v1126_v44, %v2403_v49  ;;  %v2415_v7 = vand.u32 31, %v2328_v20 }
  0x3f   :  { %v953_v62 = vand.u32 2147483647, %v952_v43  ;;  %v2410_v48 = vmul.u32.u64.low %v1127_v53, %v1122_v40  ;;  %v2411_v3 = vmul.u32.u64.high %v1127_v53, %v1122_v40, %v2410_v48  ;;  %v2418_v61 = vadd.s32 4294967169, %v2323_v17 }
  0x40   :  { %v2420_v10 = vand.u32 3, %v962_v39  ;;  %v1858_v56 = vadd.s32 4294967294, %v1044_v45  ;;  %v1032_v22 = vadd.s32 %v2299_v57, %v2306_v8  ;;  %v1062_v26 = vsub.s32 4, %v2354_v50 }
  0x41   :  { %v956_v18 = vmul.f32 %v955_v0, %v953_v62  ;;  %v1134_v63 = vmul.u32 %v1127_v53, %v1118_v42  ;;  %vm1136_vm13 = vc.u32 %v2404_v19, %v2410_v48  ;;  %v2429_v20 = vand.u32 8388607, %v1182_v54 }
  0x42   :  { %vm1859_vm12 = vcmp.lt.s32.totalorder %v1858_v56, 0  ;;  %v1198_v17 = vshrl.u32 %v2077_v1, %v2319_v51  ;;  %v1137_v31 = vadd.s32 1, %v2411_v3  ;;  %v1199_v57 = vshll.u32 %v2077_v1, %v2296_v52 }
  0x43   :  { %v957_v47 = vxor.u32 2147483648, %v956_v18  ;;  %v1047_v30 = vsel %vm1859_vm12, 0, %v1858_v56  ;;  %v1200_v58 = vshrl.u32 %v2078_v6, %v2319_v51  ;;  %vm978_vm14 = vcmp.lt.s32.totalorder %v2155_v15, 0 }
  0x44   :  { %v1048_v8 = vsub.s32 32, %v1047_v30  ;;  %v1049_v13 = vshll.u32 %v2368_v28, %v1047_v30  ;;  %v1052_v34 = vsub.s32 4294967266, %v1047_v30  ;;  %v1138_v35 = vsel %vm1136_vm13, %v1137_v31, %v2411_v3 }
  0x45   :  { %v958_v32 = vsel %vm875_vm5, %v957_v47, %v956_v18  ;;  %v1202_v53 = vshll.u32 %v2078_v6, %v2296_v52  ;;  %v1203_v59 = vshrl.u32 %v3656_v9, %v2319_v51  ;;  %v1139_v39 = vadd.s32 %v1138_v35, %v1134_v63 }
  0x46   :  { %v961_v28 = vsel %vm2386_vm11, %v2132_v5, %v958_v32  ;;  %v1050_v36 = vshrl.u32 %v1032_v22, %v1048_v8  ;;  %v1053_v37 = vadd.s32 127, %v1052_v34  ;;  %v1205_v27 = vshll.u32 %v3656_v9, %v2296_v52 }
  0x47   :  { %1997 = vcosq.f32 %v961_v28  ;;  %v1206_v40 = vshrl.u32 %v3654_v21, %v2319_v51  ;;  %v1208_v43 = vshll.u32 %v3654_v21, %v2296_v52  ;;  %vm2458_vm15 = vcmp.le.f32.partialorder %v976_v41, 0.7853982 }
  0x48   :  { %1999 = vsinq.f32 %v961_v28  ;;  %v1051_v55 = vor.u32 %v1050_v36, %v1049_v13  ;;  %v1054_v42 = vshll.u32 %v1053_v37, 23  ;;  %v1140_v44 = vadd.s32 536870912, %v1139_v39 }
  0x49   :  { %vm1081_vm0 = vcmp.lt.s32.totalorder %v2128_v4, 0  ;;  %v1201_v45 = vor.u32 %v1200_v58, %v1199_v57  ;;  %v1209_v49 = vshrl.u32 %v2081_v24, %v2319_v51  ;;  %v1211_v62 = vshll.u32 %v2081_v24, %v2296_v52 }
  0x4a   :  { %v1212_v3 = vshrl.u32 %v3658_v29, %v2319_v51  ;;  %vm968_vm1 = vcmp.eq.s32.totalorder %v2420_v10, 0  ;;  %v1055_v41 = vor.u32 4788187, %v1054_v42  ;;  %v1058_v56 = vcvt.s32.f32 %v1051_v55 }
  0x4b   :  { %v1141_v18 = vshrl.u32 %v1140_v44, 30  ;;  %v1204_v22 = vor.u32 %v1203_v59, %v1202_v53  ;;  %vm967_vm2 = vcmp.lt.s32.totalorder %v2420_v10, 2  ;;  %v1207_v63 = vor.u32 %v1206_v40, %v1205_v27 }
  0x4c   :  { %v1210_v47 = vor.u32 %v1209_v49, %v1208_v43  ;;  %v1213_v30 = vor.u32 %v1212_v3, %v1211_v62  ;;  %vm1217_vm3 = vcmp.lt.s32.totalorder %v2313_v12, 4  ;;  %vm965_vm4 = vweird.f32 %v2132_v5 }
  0x4d   :  { %vm971_vm5 = vcmp.eq.s32.totalorder %v2420_v10, 2  ;;  %v1056_v52 = vand.u32 2147483647, %v1055_v41  ;;  %v1142_v31 = vshll.u32 %v1141_v18, 30  ;;  %vm1214_vm6 = vcmp.lt.s32.totalorder %v2313_v12, 1 }
  0x4e   :  { %v1190_v51 = vor.u32 8388608, %v2429_v20  ;;  %vm1216_vm7 = vcmp.lt.s32.totalorder %v2313_v12, 3  ;;  %v1219_v57 = vsel %vm1217_vm3, %v1207_v63, 2102212464  ;;  %v1223_v8 = vsel %vm1217_vm3, %v1210_v47, 920167782 }
  0x4f   :  { %v1059_v13 = vmul.f32 %v1058_v56, %v1056_v52  ;;  %v1063_v34 = vsel %vm978_vm14, %v1062_v26, %v2354_v50  ;;  %v2484_v58 = vsub.s32 %v1139_v39, %v1142_v31  ;;  %v1165_v32 = vsub.s32 4, %v1141_v18 }
  0x50   :  { %vm1215_vm8 = vcmp.lt.s32.totalorder %v2313_v12, 2  ;;  %v1218_v20 = vsel %vm1214_vm6, %v1198_v17, %v1201_v45  ;;  %v1222_v35 = vsel %vm1214_vm6, %v1201_v45, %v1204_v22  ;;  %v1227_v53 = vsel %vm1217_vm3, %v1213_v30, 1326507024 }
  0x51   :  { %v1060_v59 = vxor.u32 2147483648, %v1059_v13  ;;  %v1145_v28 = vsub.s32 0, %v2484_v58  ;;  %v1220_v50 = vsel %vm1216_vm7, %v1204_v22, %v1219_v57  ;;  %v1224_v26 = vsel %vm1216_vm7, %v1207_v63, %v1223_v8  ;;  %v1998_v36 = vpop.eup %1997 }
  0x52   :  { %vm1608_vm9 = vcmp.lt.f32.partialorder %v2121_v2, 5.0  ;;  %v1065_v17 = vsel %vm2458_vm15, 0, %v1063_v34  ;;  %v1226_v37 = vsel %vm1214_vm6, %v1204_v22, %v1207_v63  ;;  %v1228_v39 = vsel %vm1216_vm7, %v1210_v47, %v1227_v53  ;;  %v2000_v40 = vpop.eup %1999 }
  0x53   :  { %v1230_v27 = vshll.u32 %v1190_v51, 8  ;;  %v972_v43 = vxor.u32 2147483648, %v1998_v36  ;;  %v1061_v55 = vsel %vm978_vm14, %v1060_v59, %v1059_v13  ;;  %v1861_v42 = vmin.u32 %v1145_v28, %v2484_v58 }
  0x54   :  { %v1166_v44 = vsel %vm1081_vm0, %v1165_v32, %v1141_v18  ;;  %v969_v45 = vxor.u32 2147483648, %v2000_v40  ;;  %v1064_v49 = vsel %vm2458_vm15, %v2155_v15, %v1061_v55  ;;  %v1221_v62 = vsel %vm1215_vm8, %v1218_v20, %v1220_v50 }
  0x55   :  { %v1225_v3 = vsel %vm1215_vm8, %v1222_v35, %v1224_v26  ;;  %v973_v41 = vsel %vm971_vm5, %v972_v43, %v2000_v40  ;;  %2001 = vcosq.f32 %v1064_v49  ;;  %v1147_v56 = vclz %v1861_v42 }
  0x56   :  { %v1229_v22 = vsel %vm1215_vm8, %v1226_v37, %v1228_v39  ;;  %v970_v18 = vsel %vm968_vm1, %v1998_v36, %v969_v45  ;;  %2003 = vsinq.f32 %v1064_v49  ;;  %v2533_v51 = vsub.s32 32, %v2392_v38 }
  0x57   :  { %v2523_v0 = vmul.u32.u64.low %v1230_v27, %v1229_v22  ;;  %v2524_v63 = vmul.u32.u64.high %v1230_v27, %v1229_v22, %v2523_v0  ;;  %v974_v47 = vsel %vm967_vm2, %v970_v18, %v973_v41  ;;  %v1862_v30 = vadd.s32 4294967294, %v1147_v56 }
  0x58   :  { %v2528_v52 = vmul.u32.u64.low %v1230_v27, %v1225_v3  ;;  %v2529_v31 = vmul.u32.u64.high %v1230_v27, %v1225_v3, %v2528_v52  ;;  %v1300_v12 = vsub.s32 32, %v2415_v7  ;;  %v975_v57 = vsel %vm965_vm4, nan, %v974_v47 }
  0x59   :  { %v1069_v8 = vand.u32 3, %v1065_v17  ;;  %v1594_v13 = vadd.f32 1.0, %v975_v57  ;;  %vm2540_vm10 = vcmp.le.f32.partialorder %v1079_v14, 0.7853982  ;;  %v1135_v34 = vadd.s32 %v2410_v48, %v2404_v19 }
  0x5a   :  { %vm1863_vm11 = vcmp.lt.s32.totalorder %v1862_v30, 0  ;;  %vm1068_vm12 = vweird.f32 %v2155_v15  ;;  %v1168_v20 = vsel %vm2540_vm10, 0, %v1166_v44  ;;  %v1237_v5 = vmul.u32 %v1230_v27, %v1221_v62 }
  0x5b   :  { %v1150_v32 = vsel %vm1863_vm11, 0, %v1862_v30  ;;  %vm1239_vm13 = vc.u32 %v2524_v63, %v2528_v52  ;;  %v1601_v35 = vmul.f32 0.5, %v1594_v13  ;;  %v2553_v28 = vadd.s32 1, %v2418_v61 }
  0x5c   :  { %v1151_v53 = vsub.s32 32, %v1150_v32  ;;  %v1152_v14 = vshll.u32 %v2484_v58, %v1150_v32  ;;  %v1155_v59 = vsub.s32 4294967266, %v1150_v32  ;;  %vm1070_vm14 = vcmp.lt.s32.totalorder %v1069_v8, 2 }
  0x5d   :  { %vm1071_vm15 = vcmp.eq.s32.totalorder %v1069_v8, 0  ;;  %v1240_v19 = vadd.s32 1, %v2529_v31  ;;  %v1615_v48 = vsel %vm1608_vm9, %v1601_v35, 0.0  ;;  %vm1074_vm1 = vcmp.eq.s32.totalorder %v1069_v8, 2 }
  0x5e   :  { %v1153_v50 = vshrl.u32 %v1135_v34, %v1151_v53  ;;  %v1156_v26 = vadd.s32 127, %v1155_v59  ;;  %1624 = vperm.xlu0 %1995, %v1615_v48   ;;  %v2558_v36 = vand.u32 3, %v1168_v20  ;;  %v1285_v58 = vand.u32 2147483647, %v2198_v33 }
  0x5f   :  { %v1241_v17 = vsel %vm1239_vm13, %v1240_v19, %v2529_v31  ;;  %v1302_v61 = vshll.u32 %v2077_v1, %v2415_v7  ;;  %v2002_v37 = vpop.eup %2001  ;;  %vm1609_vm2 = vcmp.lt.f32.partialorder %v2149_v11, 5.0  ;;  %v1303_v40 = vshrl.u32 %v2078_v6, %v1300_v12 }
  0x60   :  { %v1154_v39 = vor.u32 %v1153_v50, %v1152_v14  ;;  %v1157_v27 = vshll.u32 %v1156_v26, 23  ;;  %v1242_v2 = vadd.s32 %v1241_v17, %v1237_v5  ;;  %v2004_v43 = vpop.eup %2003  ;;  %v1075_v55 = vxor.u32 2147483648, %v2002_v37 }
  0x61   :  { %v1305_v42 = vshll.u32 %v2078_v6, %v2415_v7  ;;  %v1306_v44 = vshrl.u32 %v3656_v9, %v1300_v12  ;;  %v1308_v45 = vshll.u32 %v3656_v9, %v2415_v7  ;;  %v1072_v49 = vxor.u32 2147483648, %v2004_v43 }
  0x62   :  { %v1158_v62 = vor.u32 4788187, %v1157_v27  ;;  %v1161_v3 = vcvt.s32.f32 %v1154_v39  ;;  %v1243_v41 = vadd.s32 536870912, %v1242_v2  ;;  %v1076_v56 = vsel %vm1074_vm1, %v1075_v55, %v2004_v43 }
  0x63   :  { %v1309_v22 = vshrl.u32 %v3654_v21, %v1300_v12  ;;  %v1311_v18 = vshll.u32 %v3654_v21, %v2415_v7  ;;  %v1312_v0 = vshrl.u32 %v2081_v24, %v1300_v12  ;;  %v1073_v47 = vsel %vm1071_vm15, %v2002_v37, %v1072_v49 }
  0x64   :  { %v1159_v30 = vand.u32 2147483647, %v1158_v62  ;;  %v1244_v31 = vshrl.u32 %v1243_v41, 30  ;;  %v1301_v57 = vshrl.u32 %v2077_v1, %v1300_v12  ;;  %v1077_v13 = vsel %vm1070_vm14, %v1073_v47, %v1076_v56 }
  0x65   :  { %v1292_v34 = vand.u32 8388607, %v1285_v58  ;;  %v1314_v32 = vshll.u32 %v2081_v24, %v2415_v7  ;;  %v1315_v20 = vshrl.u32 %v3658_v29, %v1300_v12  ;;  %v1078_v5 = vsel %vm1068_vm12, nan, %v1077_v13 }
  0x66   :  { %v1162_v35 = vmul.f32 %v1161_v3, %v1159_v30  ;;  %v1245_v53 = vshll.u32 %v1244_v31, 30  ;;  %v1304_v14 = vor.u32 %v1303_v40, %v1302_v61  ;;  %v1595_v59 = vadd.f32 1.0, %v1078_v5 }
  0x67   :  { %v1307_v19 = vor.u32 %v1306_v44, %v1305_v42  ;;  %v1310_v48 = vor.u32 %v1309_v22, %v1308_v45  ;;  %v1313_v50 = vor.u32 %v1312_v0, %v1311_v18  ;;  %vm1317_vm3 = vcmp.lt.s32.totalorder %v2408_v60, 1 }
  0x68   :  { %v1163_v8 = vxor.u32 2147483648, %v1162_v35  ;;  %v2586_v26 = vsub.s32 %v1242_v2, %v1245_v53  ;;  %vm1320_vm4 = vcmp.lt.s32.totalorder %v2408_v60, 4  ;;  %v1602_v7 = vmul.f32 0.5, %v1595_v59 }
  0x69   :  { %v1293_v17 = vor.u32 8388608, %v1292_v34  ;;  %v1316_v12 = vor.u32 %v1315_v20, %v1314_v32  ;;  %vm1318_vm5 = vcmp.lt.s32.totalorder %v2408_v60, 2  ;;  %vm1319_vm6 = vcmp.lt.s32.totalorder %v2408_v60, 3 }
  0x6a   :  { %v1164_v15 = vsel %vm1081_vm0, %v1163_v8, %v1162_v35  ;;  %v1248_v61 = vsub.s32 0, %v2586_v26  ;;  %v1322_v37 = vsel %vm1320_vm4, %v1310_v48, 2102212464  ;;  %v1616_v39 = vsel %vm1609_vm2, %v1602_v7, 0.0  ;;  %v2067_v8 = vld [vmem:[%s3646_s0 + $0x10] sm:$0xff] }
  0x6b   :  { %v1167_v27 = vsel %vm2540_vm10, %v2128_v4, %v1164_v15  ;;  %v1325_v2 = vsel %vm1317_vm3, %v1304_v14, %v1307_v19  ;;  %v1326_v40 = vsel %vm1320_vm4, %v1313_v50, 920167782  ;;  %1629 = vperm.xlu1 %1996, %v1616_v39   ;;  %v1321_v55 = vsel %vm1317_vm3, %v1301_v57, %v1304_v14 }
  0x6c   :  { %2005 = vcosq.f32 %v1167_v27  ;;  %v1865_v43 = vmin.u32 %v1248_v61, %v2586_v26  ;;  %v1329_v11 = vsel %vm1317_vm3, %v1307_v19, %v1310_v48  ;;  %v1323_v10 = vsel %vm1319_vm6, %v1307_v19, %v1322_v37 }
  0x6d   :  { %2007 = vsinq.f32 %v1167_v27  ;;  %v1327_v42 = vsel %vm1319_vm6, %v1310_v48, %v1326_v40  ;;  %v1330_v44 = vsel %vm1320_vm4, %v1316_v12, 1326507024  ;;  %v1333_v3 = vshll.u32 %v1293_v17, 8 }
  0x6e   :  { %v1250_v45 = vclz %v1865_v43  ;;  %v1328_v49 = vsel %vm1318_vm5, %v1325_v2, %v1327_v42  ;;  %v1331_v62 = vsel %vm1319_vm6, %v1313_v50, %v1330_v44  ;;  %vm1184_vm0 = vcmp.lt.s32.totalorder %v2161_v16, 0 }
  0x6f   :  { %v1268_v41 = vsub.s32 4, %v1244_v31  ;;  %v1332_v56 = vsel %vm1318_vm5, %v1329_v11, %v1331_v62  ;;  %v1388_v22 = vand.u32 2147483647, %v2185_v25  ;;  %vm1173_vm7 = vcmp.lt.s32.totalorder %v2558_v36, 2 }
  0x70   :  { %v1866_v18 = vadd.s32 4294967294, %v1250_v45  ;;  %v1324_v0 = vsel %vm1318_vm5, %v1321_v55, %v1323_v10  ;;  %v2628_v47 = vmul.u32.u64.low %v1333_v3, %v1332_v56  ;;  %v2629_v30 = vmul.u32.u64.high %v1333_v3, %v1332_v56, %v2628_v47 }
  0x71   :  { %vm1171_vm8 = vweird.f32 %v2128_v4  ;;  %vm1174_vm9 = vcmp.eq.s32.totalorder %v2558_v36, 0  ;;  %vm1177_vm10 = vcmp.eq.s32.totalorder %v2558_v36, 2  ;;  %v1238_v34 = vadd.s32 %v2528_v52, %v2524_v63 }
  0x72   :  { %v2634_v57 = vmul.u32.u64.low %v1333_v3, %v1328_v49  ;;  %v2635_v13 = vmul.u32.u64.high %v1333_v3, %v1328_v49, %v2634_v57  ;;  %vm1867_vm11 = vcmp.lt.s32.totalorder %v1866_v18, 0  ;;  %v2642_v60 = vand.u32 8388607, %v1388_v22 }
  0x73   :  { %v1405_v32 = vshll.u32 %v2077_v1, %v2392_v38  ;;  %v1253_v20 = vsel %vm1867_vm11, 0, %v1866_v18  ;;  %v2648_v5 = vsel %vm1184_vm0, %v1268_v41, %v1244_v31  ;;  %v1340_v35 = vmul.u32 %v1333_v3, %v1324_v0 }
  0x74   :  { %v1406_v53 = vshrl.u32 %v2078_v6, %v2533_v51  ;;  %v1254_v14 = vsub.s32 32, %v1253_v20  ;;  %v1255_v63 = vshll.u32 %v2586_v26, %v1253_v20  ;;  %v1258_v52 = vsub.s32 4294967266, %v1253_v20 }
  0x75   :  { %v1404_v59 = vshrl.u32 %v2077_v1, %v2533_v51  ;;  %vm1502_vm12 = vcmp.gt.s32.totalorder %v2553_v28, 0  ;;  %vm1342_vm13 = vc.u32 %v2629_v30, %v2634_v57  ;;  %v1343_v19 = vadd.s32 1, %v2635_v13 }
  0x76   :  { %v1408_v31 = vshll.u32 %v2078_v6, %v2392_v38  ;;  %v1409_v48 = vshrl.u32 %v3656_v9, %v2533_v51  ;;  %v2006_v50 = vpop.eup %2005  ;;  %vm1610_vm14 = vcmp.lt.f32.partialorder %v2067_v8, 5.0  ;;  %v1256_v26 = vshrl.u32 %v1238_v34, %v1254_v14 }
  0x77   :  { %v1259_v7 = vadd.s32 127, %v1258_v52  ;;  %v1396_v17 = vor.u32 8388608, %v2642_v60  ;;  %v1407_v12 = vor.u32 %v1406_v53, %v1405_v32  ;;  %v2008_v15 = vpop.eup %2007  ;;  %v1178_v61 = vxor.u32 2147483648, %v2006_v50 }
  0x78   :  { %v1344_v37 = vsel %vm1342_vm13, %v1343_v19, %v2635_v13  ;;  %v1411_v39 = vshll.u32 %v3656_v9, %v2392_v38  ;;  %v1414_v27 = vshll.u32 %v3654_v21, %v2392_v38  ;;  %v1175_v2 = vxor.u32 2147483648, %v2008_v15 }
  0x79   :  { %v1257_v40 = vor.u32 %v1256_v26, %v1255_v63  ;;  %v1260_v43 = vshll.u32 %v1259_v7, 23  ;;  %v1345_v55 = vadd.s32 %v1344_v37, %v1340_v35  ;;  %v1179_v11 = vsel %vm1177_vm10, %v1178_v61, %v2008_v15 }
  0x7a   :  { %v1412_v10 = vshrl.u32 %v3654_v21, %v2533_v51  ;;  %v1415_v42 = vshrl.u32 %v2081_v24, %v2533_v51  ;;  %v1417_v44 = vshll.u32 %v2081_v24, %v2392_v38  ;;  %v1176_v45 = vsel %vm1174_vm9, %v2006_v50, %v1175_v2 }
  0x7b   :  { %v1261_v49 = vor.u32 4788187, %v1260_v43  ;;  %v1264_v62 = vcvt.s32.f32 %v1257_v40  ;;  %v1346_v3 = vadd.s32 536870912, %v1345_v55  ;;  %v1180_v41 = vsel %vm1173_vm7, %v1176_v45, %v1179_v11 }
  0x7c   :  { %v1410_v56 = vor.u32 %v1409_v48, %v1408_v31  ;;  %v1416_v18 = vor.u32 %v1415_v42, %v1414_v27  ;;  %v1418_v0 = vshrl.u32 %v3658_v29, %v2533_v51  ;;  %v1181_v47 = vsel %vm1171_vm8, nan, %v1180_v41 }
  0x7d   :  { %v1262_v13 = vand.u32 2147483647, %v1261_v49  ;;  %v2688_v34 = vshrl.u32 %v1346_v3, 30  ;;  %vm1420_vm15 = vcmp.lt.s32.totalorder %v2333_v23, 1  ;;  %v1596_v38 = vadd.f32 1.0, %v1181_v47 }
  0x7e   :  { %v1413_v60 = vor.u32 %v1412_v10, %v1411_v39  ;;  %vm1421_vm1 = vcmp.lt.s32.totalorder %v2333_v23, 2  ;;  %vm1423_vm2 = vcmp.lt.s32.totalorder %v2333_v23, 4  ;;  %v1419_v20 = vor.u32 %v1418_v0, %v1417_v44 }
  0x7f   :  { %v1265_v36 = vmul.f32 %v1264_v62, %v1262_v13  ;;  %v1348_v32 = vshll.u32 %v2688_v34, 30  ;;  %vm1422_vm3 = vcmp.lt.s32.totalorder %v2333_v23, 3  ;;  %v1603_v51 = vmul.f32 0.5, %v1596_v38 }
  0x80   :  { %v1425_v4 = vsel %vm1423_vm2, %v1413_v60, 2102212464  ;;  %v1428_v35 = vsel %vm1420_vm15, %v1407_v12, %v1410_v56  ;;  %v1429_v53 = vsel %vm1423_vm2, %v1416_v18, 920167782  ;;  %v1503_v14 = vsel %vm1502_vm12, %v2553_v28, 0 }
  0x81   :  { %vm2706_vm4 = vcmp.le.f32.partialorder %v1182_v54, 0.7853982  ;;  %v1266_v52 = vxor.u32 2147483648, %v1265_v36  ;;  %v2710_v19 = vsub.s32 %v1345_v55, %v1348_v32  ;;  %v1617_v31 = vsel %vm1610_vm14, %v1603_v51, 0.0 }
  0x82   :  { %v1271_v48 = vsel %vm2706_vm4, 0, %v2648_v5  ;;  %v1424_v50 = vsel %vm1420_vm15, %v1404_v59, %v1407_v12  ;;  %v1430_v28 = vsel %vm1422_vm3, %v1413_v60, %v1429_v53  ;;  %1634 = vperm.xlu0 %1995, %v1617_v31   ;;  %v1426_v8 = vsel %vm1422_vm3, %v1410_v56, %v1425_v4 }
  0x83   :  { %v1267_v54 = vsel %vm1184_vm0, %v1266_v52, %v1265_v36  ;;  %v1351_v26 = vsub.s32 0, %v2710_v19  ;;  %v1431_v7 = vsel %vm1421_vm1, %v1428_v35, %v1430_v28  ;;  %v1432_v59 = vsel %vm1420_vm15, %v1410_v56, %v1413_v60 }
  0x84   :  { %v1270_v5 = vsel %vm2706_vm4, %v2161_v16, %v1267_v54  ;;  %v1433_v12 = vsel %vm1423_vm2, %v1419_v20, 1326507024  ;;  %v1436_v15 = vshll.u32 %v1396_v17, 8  ;;  %v1505_v61 = vand.u32 31, %v1503_v14  ;;  %v2068_v20 = vld [vmem:[%s3646_s0 + $0x18] sm:$0xff] }
  0x85   :  { %2009 = vcosq.f32 %v1270_v5  ;;  %v1869_v37 = vmin.u32 %v1351_v26, %v2710_v19  ;;  %v1275_v39 = vand.u32 3, %v1271_v48  ;;  %v1427_v27 = vsel %vm1421_vm1, %v1424_v50, %v1426_v8 }
  0x86   :  { %2011 = vsinq.f32 %v1270_v5  ;;  %v1434_v2 = vsel %vm1422_vm3, %v1416_v18, %v1433_v12  ;;  %v2741_v55 = vmul.u32.u64.low %v1436_v15, %v1431_v7  ;;  %v2742_v11 = vmul.u32.u64.high %v1436_v15, %v1431_v7, %v2741_v55 }
  0x87   :  { %v1353_v40 = vclz %v1869_v37  ;;  %v1435_v43 = vsel %vm1421_vm1, %v1432_v59, %v1434_v2  ;;  %v2748_v42 = vshrl.u32 %v1503_v14, 5  ;;  %v1506_v44 = vsub.s32 32, %v1505_v61 }
  0x88   :  { %v2745_v17 = vmul.u32.u64.low %v1436_v15, %v1435_v43  ;;  %v2746_v10 = vmul.u32.u64.high %v1436_v15, %v1435_v43, %v2745_v17  ;;  %vm1274_vm5 = vweird.f32 %v2161_v16  ;;  %vm1276_vm6 = vcmp.lt.s32.totalorder %v1275_v39, 2 }
  0x89   :  { %v1870_v45 = vadd.s32 4294967294, %v1353_v40  ;;  %vm1277_vm0 = vcmp.eq.s32.totalorder %v1275_v39, 0  ;;  %vm1280_vm7 = vcmp.eq.s32.totalorder %v1275_v39, 2  ;;  %v1443_v49 = vmul.u32 %v1436_v15, %v1427_v27 }
  0x8a   :  { %v1341_v23 = vadd.s32 %v2634_v57, %v2629_v30  ;;  %v1371_v62 = vsub.s32 4, %v2688_v34  ;;  %v1446_v3 = vadd.s32 1, %v2742_v11  ;;  %vm1445_vm9 = vc.u32 %v2746_v10, %v2741_v55 }
  0x8b   :  { %vm1871_vm8 = vcmp.lt.s32.totalorder %v1870_v45, 0  ;;  %v1491_v56 = vand.u32 2147483647, %v2217_v46  ;;  %v1507_v18 = vshrl.u32 %v2077_v1, %v1506_v44  ;;  %v1508_v57 = vshll.u32 %v2077_v1, %v1505_v61 }
  0x8c   :  { %v1356_v41 = vsel %vm1871_vm8, 0, %v1870_v45  ;;  %v1447_v38 = vsel %vm1445_vm9, %v1446_v3, %v2742_v11  ;;  %v1509_v60 = vshrl.u32 %v2078_v6, %v1506_v44  ;;  %v1511_v36 = vshll.u32 %v2078_v6, %v1505_v61 }
  0x8d   :  { %v1357_v0 = vsub.s32 32, %v1356_v41  ;;  %v1358_v47 = vshll.u32 %v2710_v19, %v1356_v41  ;;  %v1361_v13 = vsub.s32 4294967266, %v1356_v41  ;;  %v1448_v30 = vadd.s32 %v1447_v38, %v1443_v49 }
  0x8e   :  { %vm1611_vm10 = vcmp.lt.f32.partialorder %v2068_v20, 5.0  ;;  %v1512_v35 = vshrl.u32 %v3656_v9, %v1506_v44  ;;  %v1514_v53 = vshll.u32 %v3656_v9, %v1505_v61  ;;  %vm1287_vm11 = vcmp.lt.s32.totalorder %v2198_v33, 0 }
  0x8f   :  { %v2010_v32 = vpop.eup %2009  ;;  %v1359_v51 = vshrl.u32 %v1341_v23, %v1357_v0  ;;  %v1362_v4 = vadd.s32 127, %v1361_v13  ;;  %v1449_v52 = vadd.s32 536870912, %v1448_v30  ;;  %v1515_v19 = vshrl.u32 %v3654_v21, %v1506_v44 }
  0x90   :  { %v2012_v14 = vpop.eup %2011  ;;  %v1281_v63 = vxor.u32 2147483648, %v2010_v32  ;;  %v1517_v31 = vshll.u32 %v3654_v21, %v1505_v61  ;;  %v1518_v54 = vshrl.u32 %v2081_v24, %v1506_v44  ;;  %v1498_v7 = vand.u32 8388607, %v1491_v56 }
  0x91   :  { %v1278_v48 = vxor.u32 2147483648, %v2012_v14  ;;  %v1360_v50 = vor.u32 %v1359_v51, %v1358_v47  ;;  %v1363_v28 = vshll.u32 %v1362_v4, 23  ;;  %v2774_v8 = vshrl.u32 %v1449_v52, 30  ;;  %v2835_v52 = vld [vmem:[%s3649_s2] ss:$0 sm:$0xff] }
  0x92   :  { %v1282_v26 = vsel %vm1280_vm7, %v1281_v63, %v2012_v14  ;;  %v1520_v5 = vshll.u32 %v2081_v24, %v1505_v61  ;;  %v1521_v37 = vshrl.u32 %v3658_v29, %v1506_v44  ;;  %v1510_v40 = vor.u32 %v1509_v60, %v1508_v57 }
  0x93   :  { %v1279_v59 = vsel %vm1277_vm0, %v2010_v32, %v1278_v48  ;;  %v1364_v12 = vor.u32 4788187, %v1363_v28  ;;  %v1367_v15 = vcvt.s32.f32 %v1360_v50  ;;  %v1451_v2 = vshll.u32 %v2774_v8, 30 }
  0x94   :  { %v1283_v27 = vsel %vm1276_vm6, %v1279_v59, %v1282_v26  ;;  %v1513_v43 = vor.u32 %v1512_v35, %v1511_v36  ;;  %v1516_v45 = vor.u32 %v1515_v19, %v1514_v53  ;;  %v1519_v49 = vor.u32 %v1518_v54, %v1517_v31  ;;  %v40_v19 = vpop.permute.xlu1 %39 }
  0x95   :  { %v1284_v11 = vsel %vm1274_vm5, nan, %v1283_v27  ;;  %v1365_v17 = vand.u32 2147483647, %v1364_v12  ;;  %v2785_v61 = vsub.s32 %v1448_v30, %v1451_v2  ;;  %vm1523_vm12 = vcmp.lt.s32.totalorder %v2748_v42, 1 }
  0x96   :  { %v1597_v23 = vadd.f32 1.0, %v1284_v11  ;;  %vm1526_vm13 = vcmp.lt.s32.totalorder %v2748_v42, 4  ;;  %vm2791_vm14 = vcmp.le.f32.partialorder %v1285_v58, 0.7853982  ;;  %v1499_v3 = vor.u32 8388608, %v1498_v7 }
  0x97   :  { %v1368_v44 = vmul.f32 %v1367_v15, %v1365_v17  ;;  %v1522_v16 = vor.u32 %v1521_v37, %v1520_v5  ;;  %v1454_v0 = vsub.s32 0, %v2785_v61  ;;  %vm1525_vm15 = vcmp.lt.s32.totalorder %v2748_v42, 3  ;;  %v30_v15 = vpop.permute.xlu0 %29 }
  0x98   :  { %v1604_v41 = vmul.f32 0.5, %v1597_v23  ;;  %v1528_v47 = vsel %vm1526_vm13, %v1516_v45, 2102212464  ;;  %vm1524_vm1 = vcmp.lt.s32.totalorder %v2748_v42, 2  ;;  %v1531_v58 = vsel %vm1523_vm12, %v1510_v40, %v1513_v43 }
  0x99   :  { %v1369_v13 = vxor.u32 2147483648, %v1368_v44  ;;  %v1532_v38 = vsel %vm1526_vm13, %v1519_v49, 920167782  ;;  %v1372_v57 = vsel %vm1287_vm11, %v1371_v62, %v2688_v34  ;;  %v1873_v60 = vmin.u32 %v1454_v0, %v2785_v61  ;;  %v2069_v0 = vld [vmem:[%s3646_s0 + $0x20] sm:$0xff] }
  0x9a   :  { %v1618_v30 = vsel %vm1611_vm10, %v1604_v41, 0.0  ;;  %v1527_v36 = vsel %vm1523_vm12, %v1507_v18, %v1510_v40  ;;  %v1529_v51 = vsel %vm1525_vm15, %v1513_v43, %v1528_v47  ;;  %v1533_v20 = vsel %vm1525_vm15, %v1516_v45, %v1532_v38 }
  0x9b   :  { %1639 = vperm.xlu1 %1996, %v1618_v30   ;;  %v1370_v32 = vsel %vm1287_vm11, %v1369_v13, %v1368_v44  ;;  %v1535_v4 = vsel %vm1523_vm12, %v1513_v43, %v1516_v45  ;;  %v1456_v62 = vclz %v1873_v60  ;;  %v1534_v18 = vsel %vm1524_vm1, %v1531_v58, %v1533_v20 }
  0x9c   :  { %v1373_v34 = vsel %vm2791_vm14, %v2198_v33, %v1370_v32  ;;  %v1536_v35 = vsel %vm1526_vm13, %v1522_v16, 1326507024  ;;  %v1374_v53 = vsel %vm2791_vm14, 0, %v1372_v57  ;;  %v1539_v63 = vshll.u32 %v1499_v3, 8 }
  0x9d   :  { %2013 = vcosq.f32 %v1373_v34  ;;  %v1537_v14 = vsel %vm1525_vm15, %v1519_v49, %v1536_v35  ;;  %v1874_v31 = vadd.s32 4294967294, %v1456_v62  ;;  %v1530_v48 = vsel %vm1524_vm1, %v1527_v36, %v1529_v51 }
  0x9e   :  { %2015 = vsinq.f32 %v1373_v34  ;;  %v1538_v50 = vsel %vm1524_vm1, %v1535_v4, %v1537_v14  ;;  %v2844_v26 = vmul.u32.u64.low %v1539_v63, %v1534_v18  ;;  %v2845_v7 = vmul.u32.u64.high %v1539_v63, %v1534_v18, %v2844_v26 }
  0x9f   :  { %v2841_v28 = vmul.u32.u64.low %v1539_v63, %v1538_v50  ;;  %v2842_v54 = vmul.u32.u64.high %v1539_v63, %v1538_v50, %v2841_v28  ;;  %v1444_v5 = vadd.s32 %v2741_v55, %v2746_v10  ;;  %vm1875_vm2 = vcmp.lt.s32.totalorder %v1874_v31, 0 }
  0xa0   :  { %v1474_v59 = vsub.s32 4, %v2774_v8  ;;  %v2852_v12 = vmul.f32 %v2835_v52, %v40_v19  ;;  %v1378_v37 = vand.u32 3, %v1374_v53  ;;  %vm2856_vm3 = vcmp.le.f32.partialorder %v1388_v22, 0.7853982  ;;  %v45_v19 = vpop.permute.xlu1 %44 }
  0xa1   :  { %vm1390_vm4 = vcmp.lt.s32.totalorder %v2185_v25, 0  ;;  %v1459_v27 = vsel %vm1875_vm2, 0, %v1874_v31  ;;  %vm1377_vm5 = vweird.f32 %v2198_v33  ;;  %v1546_v40 = vmul.u32 %v1539_v63, %v1530_v48 }
  0xa2   :  { %v1460_v55 = vsub.s32 32, %v1459_v27  ;;  %v1461_v10 = vshll.u32 %v2785_v61, %v1459_v27  ;;  %v1464_v2 = vsub.s32 4294967266, %v1459_v27  ;;  %vm1548_vm6 = vc.u32 %v2842_v54, %v2844_v26 }
  0xa3   :  { %v1549_v43 = vadd.s32 1, %v2845_v7  ;;  %v283_v22 = vand.u32 2147483647, %v2852_v12  ;;  %v2868_v11 = vmul.f32 %v2835_v52, %v30_v15  ;;  %v1475_v49 = vsel %vm1390_vm4, %v1474_v59, %v2774_v8 }
  0xa4   :  { %v1462_v17 = vshrl.u32 %v1444_v5, %v1460_v55  ;;  %v1465_v45 = vadd.s32 127, %v1464_v2  ;;  %v286_v23 = vand.u32 2139095040, %v2852_v12  ;;  %vm1379_vm0 = vcmp.lt.s32.totalorder %v1378_v37, 2 }
  0xa5   :  { %vm1380_vm7 = vcmp.eq.s32.totalorder %v1378_v37, 0  ;;  %vm1383_vm8 = vcmp.eq.s32.totalorder %v1378_v37, 2  ;;  %v1550_v61 = vsel %vm1548_vm6, %v1549_v43, %v2845_v7  ;;  %vm1612_vm9 = vcmp.lt.f32.partialorder %v2069_v0, 5.0  ;;  %v35_v7 = vpop.permute.xlu0 %34 }
  0xa6   :  { %v1463_v39 = vor.u32 %v1462_v17, %v1461_v10  ;;  %v1466_v44 = vshll.u32 %v1465_v45, 23  ;;  %v1551_v3 = vadd.s32 %v1550_v61, %v1546_v40  ;;  %v287_v16 = vshrl.u32 %v286_v23, 23 }
  0xa7   :  { %v2014_v41 = vpop.eup %2013  ;;  %v1477_v8 = vsel %vm2856_vm3, 0, %v1475_v49  ;;  %vm1493_vm10 = vcmp.lt.s32.totalorder %v2217_v46, 0  ;;  %v290_v47 = vand.u32 8388607, %v283_v22  ;;  %v78_v13 = vand.u32 2139095040, %v2868_v11 }
  0xa8   :  { %v2016_v58 = vpop.eup %2015  ;;  %v1384_v38 = vxor.u32 2147483648, %v2014_v41  ;;  %v1467_v30 = vor.u32 4788187, %v1466_v44  ;;  %v1470_v57 = vcvt.s32.f32 %v1463_v39  ;;  %v1552_v60 = vadd.s32 536870912, %v1551_v3 }
  0xa9   :  { %v1381_v36 = vxor.u32 2147483648, %v2016_v58  ;;  %v1832_v32 = vadd.s32 4294967169, %v287_v16  ;;  %v75_v51 = vand.u32 2147483647, %v2868_v11  ;;  %v79_v20 = vshrl.u32 %v78_v13, 23 }
  0xaa   :  { %v1385_v4 = vsel %vm1383_vm8, %v1384_v38, %v2016_v58  ;;  %v1468_v34 = vand.u32 2147483647, %v1467_v30  ;;  %vm2888_vm11 = vcmp.le.f32.partialorder %v1491_v56, 0.7853982  ;;  %v1553_v18 = vshrl.u32 %v1552_v60, 30 }
  0xab   :  { %v1382_v35 = vsel %vm1380_vm7, %v2014_v41, %v1381_v36  ;;  %v2893_v53 = vand.u32 3, %v1477_v8  ;;  %v293_v14 = vadd.s32 1, %v1832_v32  ;;  %v1824_v63 = vadd.s32 4294967169, %v79_v20 }
  0xac   :  { %v1386_v31 = vsel %vm1379_vm0, %v1382_v35, %v1385_v4  ;;  %v1471_v48 = vmul.f32 %v1470_v57, %v1468_v34  ;;  %v1554_v50 = vshll.u32 %v1553_v18, 30  ;;  %v1577_v28 = vsub.s32 4, %v1553_v18 }
  0xad   :  { %v1387_v56 = vsel %vm1377_vm5, nan, %v1386_v31  ;;  %v291_v5 = vor.u32 8388608, %v290_v47  ;;  %vm294_vm12 = vcmp.gt.s32.totalorder %v293_v14, 0  ;;  %v2900_v59 = vand.u32 8388607, %v75_v51 }
  0xae   :  { %v1598_v15 = vadd.f32 1.0, %v1387_v56  ;;  %v1472_v27 = vxor.u32 2147483648, %v1471_v48  ;;  %v2902_v55 = vsub.s32 %v1551_v3, %v1554_v50  ;;  %v2905_v37 = vmul.f32 %v2835_v52, %v45_v19 }
  0xaf   :  { %v2909_v10 = vsel %vm1493_vm10, %v1577_v28, %v1553_v18  ;;  %v295_v2 = vsel %vm294_vm12, %v293_v14, 0  ;;  %v85_v33 = vadd.s32 1, %v1824_v63  ;;  %v2912_v40 = vmul.f32 %v2835_v52, %v35_v7 }
  0xb0   :  { %v1605_v43 = vmul.f32 0.5, %v1598_v15  ;;  %v1473_v17 = vsel %vm1390_vm4, %v1472_v27, %v1471_v48  ;;  %v1547_v45 = vadd.s32 %v2844_v26, %v2842_v54  ;;  %v1557_v49 = vsub.s32 0, %v2902_v55  ;;  %v2070_v27 = vld [vmem:[%s3646_s0 + $0x28] sm:$0xff] }
  0xb1   :  { %v1476_v23 = vsel %vm2856_vm3, %v2185_v25, %v1473_v17  ;;  %v297_v61 = vand.u32 31, %v295_v2  ;;  %v2922_v39 = vshll.u32 %v291_v5, 8  ;;  %v83_v44 = vor.u32 8388608, %v2900_v59 }
  0xb2   :  { %v1619_v3 = vsel %vm1612_vm9, %v1605_v43, 0.0  ;;  %2017 = vcosq.f32 %v1476_v23  ;;  %v1877_v16 = vmin.u32 %v1557_v49, %v2902_v55  ;;  %v1580_v54 = vsel %vm2888_vm11, 0, %v2909_v10 }
  0xb3   :  { %1644 = vperm.xlu0 %1995, %v1619_v3   ;;  %2019 = vsinq.f32 %v1476_v23  ;;  %v2930_v26 = vshrl.u32 %v295_v2, 5  ;;  %v298_v42 = vsub.s32 32, %v297_v61  ;;  %vm86_vm13 = vcmp.gt.s32.totalorder %v85_v33, 0 }
  0xb4   :  { %vm1486_vm14 = vcmp.eq.s32.totalorder %v2893_v53, 2  ;;  %v1559_v41 = vclz %v1877_v16  ;;  %v300_v8 = vshll.u32 %v2077_v1, %v297_v61  ;;  %v303_v0 = vshll.u32 %v2078_v6, %v297_v61 }
  0xb5   :  { %v306_v47 = vshll.u32 %v3656_v9, %v297_v61  ;;  %vm1483_vm15 = vcmp.eq.s32.totalorder %v2893_v53, 0  ;;  %v299_v13 = vshrl.u32 %v2077_v1, %v298_v42  ;;  %v301_v58 = vshrl.u32 %v2078_v6, %v298_v42 }
  0xb6   :  { %v304_v38 = vshrl.u32 %v3656_v9, %v298_v42  ;;  %v307_v30 = vshrl.u32 %v3654_v21, %v298_v42  ;;  %vm1482_vm1 = vcmp.lt.s32.totalorder %v2893_v53, 2  ;;  %v1878_v57 = vadd.s32 4294967294, %v1559_v41 }
  0xb7   :  { %v309_v60 = vshll.u32 %v3654_v21, %v297_v61  ;;  %v310_v36 = vshrl.u32 %v2081_v24, %v298_v42  ;;  %v312_v32 = vshll.u32 %v2081_v24, %v297_v61  ;;  %vm1480_vm2 = vweird.f32 %v2185_v25 }
  0xb8   :  { %v302_v20 = vor.u32 %v301_v58, %v300_v8  ;;  %v305_v4 = vor.u32 %v304_v38, %v303_v0  ;;  %v308_v34 = vor.u32 %v307_v30, %v306_v47  ;;  %v313_v18 = vshrl.u32 %v3658_v29, %v298_v42 }
  0xb9   :  { %vm1879_vm3 = vcmp.lt.s32.totalorder %v1878_v57, 0  ;;  %v311_v35 = vor.u32 %v310_v36, %v309_v60  ;;  %vm315_vm4 = vcmp.lt.s32.totalorder %v2930_v26, 1  ;;  %v87_v14 = vsel %vm86_vm13, %v85_v33, 0 }
  0xba   :  { %v1562_v63 = vsel %vm1879_vm3, 0, %v1878_v57  ;;  %v314_v19 = vor.u32 %v313_v18, %v312_v32  ;;  %vm316_vm5 = vcmp.lt.s32.totalorder %v2930_v26, 2  ;;  %vm318_vm6 = vcmp.lt.s32.totalorder %v2930_v26, 4 }
  0xbb   :  { %v1563_v31 = vsub.s32 32, %v1562_v63  ;;  %v1564_v48 = vshll.u32 %v2902_v55, %v1562_v63  ;;  %v1567_v50 = vsub.s32 4294967266, %v1562_v63  ;;  %vm317_vm0 = vcmp.lt.s32.totalorder %v2930_v26, 3 }
  0xbc   :  { %v319_v28 = vsel %vm315_vm4, %v299_v13, %v302_v20  ;;  %v320_v7 = vsel %vm318_vm6, %v308_v34, 2102212464  ;;  %v323_v56 = vsel %vm315_vm4, %v302_v20, %v305_v4  ;;  %v324_v5 = vsel %vm318_vm6, %v311_v35, 920167782  ;;  %v2018_v15 = vpop.eup %2017 }
  0xbd   :  { %vm1613_vm7 = vcmp.lt.f32.partialorder %v2070_v27, 5.0  ;;  %v1565_v55 = vshrl.u32 %v1547_v45, %v1563_v31  ;;  %v1568_v2 = vadd.s32 127, %v1567_v50  ;;  %v325_v33 = vsel %vm317_vm0, %v308_v34, %v324_v5  ;;  %v2020_v17 = vpop.eup %2019 }
  0xbe   :  { %v327_v43 = vsel %vm315_vm4, %v305_v4, %v308_v34  ;;  %v1487_v49 = vxor.u32 2147483648, %v2018_v15  ;;  %v321_v23 = vsel %vm317_vm0, %v305_v4, %v320_v7  ;;  %v326_v61 = vsel %vm316_vm5, %v323_v56, %v325_v33 }
  0xbf   :  { %v328_v3 = vsel %vm318_vm6, %v314_v19, 1326507024  ;;  %v1484_v16 = vxor.u32 2147483648, %v2020_v17  ;;  %v1566_v45 = vor.u32 %v1565_v55, %v1564_v48  ;;  %v1569_v42 = vshll.u32 %v1568_v2, 23 }
  0xc0   :  { %v329_v41 = vsel %vm317_vm0, %v311_v35, %v328_v3  ;;  %v1488_v8 = vsel %vm1486_vm14, %v1487_v49, %v2020_v17  ;;  %v2981_v47 = vmul.u32.u64.low %v2922_v39, %v326_v61  ;;  %v2982_v13 = vmul.u32.u64.high %v2922_v39, %v326_v61, %v2981_v47 }
  0xc1   :  { %v330_v0 = vsel %vm316_vm5, %v327_v43, %v329_v41  ;;  %v1485_v58 = vsel %vm1483_vm15, %v2018_v15, %v1484_v16  ;;  %v1570_v38 = vor.u32 4788187, %v1569_v42  ;;  %v1573_v30 = vcvt.s32.f32 %v1566_v45 }
  0xc2   :  { %v322_v57 = vsel %vm316_vm5, %v319_v28, %v321_v23  ;;  %v1489_v60 = vsel %vm1482_vm1, %v1485_v58, %v1488_v8  ;;  %v2992_v36 = vmul.u32.u64.low %v2922_v39, %v330_v0  ;;  %v2993_v32 = vmul.u32.u64.high %v2922_v39, %v330_v0, %v2992_v36 }
  0xc3   :  { %v2995_v20 = vshrl.u32 %v87_v14, 5  ;;  %v1490_v4 = vsel %vm1480_vm2, nan, %v1489_v60  ;;  %v1571_v34 = vand.u32 2147483647, %v1570_v38  ;;  %v89_v18 = vand.u32 31, %v87_v14 }
  0xc4   :  { %v387_v35 = vand.u32 2147483647, %v2905_v37  ;;  %v1599_v63 = vadd.f32 1.0, %v1490_v4  ;;  %v3004_v53 = vand.u32 3, %v1580_v54  ;;  %v341_v26 = vadd.s32 1, %v2982_v13 }
  0xc5   :  { %v3009_v19 = vshll.u32 %v83_v44, 8  ;;  %v1574_v31 = vmul.f32 %v1573_v30, %v1571_v34  ;;  %v338_v25 = vmul.u32 %v2922_v39, %v322_v57  ;;  %v90_v48 = vsub.s32 32, %v89_v18 }
  0xc6   :  { %vm107_vm8 = vcmp.lt.s32.totalorder %v2995_v20, 1  ;;  %v1606_v14 = vmul.f32 0.5, %v1599_v63  ;;  %vm340_vm9 = vc.u32 %v2993_v32, %v2981_v47  ;;  %v92_v10 = vshll.u32 %v2077_v1, %v89_v18 }
  0xc7   :  { %v95_v54 = vshll.u32 %v2078_v6, %v89_v18  ;;  %v1575_v50 = vxor.u32 2147483648, %v1574_v31  ;;  %v342_v28 = vsel %vm340_vm9, %v341_v26, %v2982_v13  ;;  %v93_v59 = vshrl.u32 %v2078_v6, %v90_v48 }
  0xc8   :  { %v98_v44 = vshll.u32 %v3656_v9, %v89_v18  ;;  %v1620_v39 = vsel %vm1613_vm7, %v1606_v14, 0.0  ;;  %v343_v7 = vadd.s32 %v342_v28, %v338_v25  ;;  %v96_v56 = vshrl.u32 %v3656_v9, %v90_v48  ;;  %v55_v25 = vpop.permute.xlu1 %54 }
  0xc9   :  { %v99_v5 = vshrl.u32 %v3654_v21, %v90_v48  ;;  %1649 = vperm.xlu1 %1996, %v1620_v39   ;;  %v1576_v15 = vsel %vm1493_vm10, %v1575_v50, %v1574_v31  ;;  %v94_v55 = vor.u32 %v93_v59, %v92_v10  ;;  %v101_v2 = vshll.u32 %v3654_v21, %v89_v18 }
  0xca   :  { %v102_v33 = vshrl.u32 %v2081_v24, %v90_v48  ;;  %v1579_v43 = vsel %vm2888_vm11, %v2217_v46, %v1576_v15  ;;  %v344_v27 = vadd.s32 536870912, %v343_v7  ;;  %v97_v17 = vor.u32 %v96_v56, %v95_v54 }
  0xcb   :  { %v100_v49 = vor.u32 %v99_v5, %v98_v44  ;;  %2021 = vcosq.f32 %v1579_v43  ;;  %v104_v61 = vshll.u32 %v2081_v24, %v89_v18  ;;  %v105_v3 = vshrl.u32 %v3658_v29, %v90_v48 }
  0xcc   :  { %v103_v23 = vor.u32 %v102_v33, %v101_v2  ;;  %2023 = vsinq.f32 %v1579_v43  ;;  %v3032_v16 = vshrl.u32 %v344_v27, 30  ;;  %vm108_vm10 = vcmp.lt.s32.totalorder %v2995_v20, 2 }
  0xcd   :  { %vm110_vm12 = vcmp.lt.s32.totalorder %v2995_v20, 4  ;;  %v91_v45 = vshrl.u32 %v2077_v1, %v90_v48  ;;  %v106_v62 = vor.u32 %v105_v3, %v104_v61  ;;  %v115_v41 = vsel %vm107_vm8, %v94_v55, %v97_v17 }
  0xce   :  { %v112_v42 = vsel %vm110_vm12, %v100_v49, 2102212464  ;;  %v346_v8 = vshll.u32 %v3032_v16, 30  ;;  %vm109_vm11 = vcmp.lt.s32.totalorder %v2995_v20, 3  ;;  %v116_v0 = vsel %vm110_vm12, %v103_v23, 920167782 }
  0xcf   :  { %v119_v13 = vsel %vm107_vm8, %v97_v17, %v100_v49  ;;  %v111_v58 = vsel %vm107_vm8, %v91_v45, %v94_v55  ;;  %v117_v38 = vsel %vm109_vm11, %v100_v49, %v116_v0  ;;  %v120_v30 = vsel %vm110_vm12, %v106_v62, 1326507024  ;;  %v2071_v20 = vld [vmem:[%s3646_s0 + $0x30] sm:$0xff] }
  0xd0   :  { %v390_v57 = vand.u32 2139095040, %v2905_v37  ;;  %v3046_v60 = vsub.s32 %v343_v7, %v346_v8  ;;  %v113_v36 = vsel %vm109_vm11, %v97_v17, %v112_v42  ;;  %v118_v4 = vsel %vm108_vm10, %v115_v41, %v117_v38 }
  0xd1   :  { %v121_v34 = vsel %vm109_vm11, %v103_v23, %v120_v30  ;;  %v3053_v63 = vmul.u32.u64.low %v3009_v19, %v118_v4  ;;  %v3054_v26 = vmul.u32.u64.high %v3009_v19, %v118_v4, %v3053_v63  ;;  %v394_v54 = vand.u32 8388607, %v387_v35 }
  0xd2   :  { %v122_v18 = vsel %vm108_vm10, %v119_v13, %v121_v34  ;;  %v391_v31 = vshrl.u32 %v390_v57, 23  ;;  %v349_v48 = vsub.s32 0, %v3046_v60  ;;  %vm1583_vm13 = vweird.f32 %v2217_v46 }
  0xd3   :  { %v3059_v14 = vmul.u32.u64.low %v3009_v19, %v122_v18  ;;  %v3060_v10 = vmul.u32.u64.high %v3009_v19, %v122_v18, %v3059_v14  ;;  %v114_v50 = vsel %vm108_vm10, %v111_v58, %v113_v36  ;;  %v182_v59 = vand.u32 2139095040, %v2912_v40 }
  0xd4   :  { %v1836_v28 = vadd.s32 4294967169, %v391_v31  ;;  %vm1585_vm14 = vcmp.lt.s32.totalorder %v3004_v53, 2  ;;  %vm1586_vm15 = vcmp.eq.s32.totalorder %v3004_v53, 0  ;;  %v1833_v44 = vmin.u32 %v349_v48, %v3046_v60 }
  0xd5   :  { %v3072_v39 = vmul.f32 %v2835_v52, %v55_v25  ;;  %v2022_v7 = vpop.eup %2021  ;;  %vm1589_vm1 = vcmp.eq.s32.totalorder %v3004_v53, 2  ;;  %vm1614_vm2 = vcmp.lt.f32.partialorder %v2071_v20, 5.0  ;;  %v133_v56 = vadd.s32 1, %v3054_v26 }
  0xd6   :  { %v395_v5 = vor.u32 8388608, %v394_v54  ;;  %v397_v15 = vadd.s32 1, %v1836_v28  ;;  %v2024_v55 = vpop.eup %2023  ;;  %v1590_v2 = vxor.u32 2147483648, %v2022_v7  ;;  %v351_v33 = vclz %v1833_v44 }
  0xd7   :  { %v130_v43 = vmul.u32 %v3009_v19, %v114_v50  ;;  %vm132_vm3 = vc.u32 %v3060_v10, %v3053_v63  ;;  %v1587_v27 = vxor.u32 2147483648, %v2024_v55  ;;  %v183_v49 = vshrl.u32 %v182_v59, 23 }
  0xd8   :  { %v134_v17 = vsel %vm132_vm3, %v133_v56, %v3054_v26  ;;  %vm398_vm4 = vcmp.gt.s32.totalorder %v397_v15, 0  ;;  %v1591_v23 = vsel %vm1589_vm1, %v1590_v2, %v2024_v55  ;;  %v1834_v61 = vadd.s32 4294967294, %v351_v33 }
  0xd9   :  { %v135_v3 = vadd.s32 %v134_v17, %v130_v43  ;;  %v399_v45 = vsel %vm398_vm4, %v397_v15, 0  ;;  %v1588_v62 = vsel %vm1586_vm15, %v2022_v7, %v1587_v27  ;;  %v339_v42 = vadd.s32 %v2981_v47, %v2993_v32 }
  0xda   :  { %v401_v41 = vand.u32 31, %v399_v45  ;;  %v3087_v19 = vshll.u32 %v395_v5, 8  ;;  %v1592_v8 = vsel %vm1585_vm14, %v1588_v62, %v1591_v23  ;;  %vm1835_vm5 = vcmp.lt.s32.totalorder %v1834_v61, 0 }
  0xdb   :  { %v136_v0 = vadd.s32 536870912, %v135_v3  ;;  %v3091_v13 = vshrl.u32 %v399_v45, 5  ;;  %v1593_v58 = vsel %vm1583_vm13, nan, %v1592_v8  ;;  %v354_v38 = vsel %vm1835_vm5, 0, %v1834_v61 }
  0xdc   :  { %v402_v30 = vsub.s32 32, %v401_v41  ;;  %v3095_v57 = vadd.s32 4294967169, %v183_v49  ;;  %v1600_v36 = vadd.f32 1.0, %v1593_v58  ;;  %v355_v4 = vsub.s32 32, %v354_v38 }
  0xdd   :  { %v359_v47 = vsub.s32 4294967266, %v354_v38  ;;  %v404_v32 = vshll.u32 %v2077_v1, %v401_v41  ;;  %v356_v34 = vshll.u32 %v3046_v60, %v354_v38  ;;  %v3099_v53 = vshrl.u32 %v136_v0, 30 }
  0xde   :  { %v405_v18 = vshrl.u32 %v2078_v6, %v402_v30  ;;  %v407_v26 = vshll.u32 %v2078_v6, %v401_v41  ;;  %v1607_v31 = vmul.f32 0.5, %v1600_v36  ;;  %v357_v46 = vshrl.u32 %v339_v42, %v355_v4 }
  0xdf   :  { %v360_v25 = vadd.s32 127, %v359_v47  ;;  %v408_v48 = vshrl.u32 %v3656_v9, %v402_v30  ;;  %v138_v14 = vshll.u32 %v3099_v53, 30  ;;  %v410_v50 = vshll.u32 %v3656_v9, %v401_v41 }
  0xe0   :  { %v406_v54 = vor.u32 %v405_v18, %v404_v32  ;;  %v411_v28 = vshrl.u32 %v3654_v21, %v402_v30  ;;  %v1621_v60 = vsel %vm1614_vm2, %v1607_v31, 0.0  ;;  %v358_v59 = vor.u32 %v357_v46, %v356_v34  ;;  %v3124_v18 = vpop.f32.mrb[0].mxu0 }
  0xe1   :  { %v361_v44 = vshll.u32 %v360_v25, 23  ;;  %v409_v7 = vor.u32 %v408_v48, %v407_v26  ;;  %1654 = vperm.xlu0 %1995, %v1621_v60   ;;  %v3108_v56 = vsub.s32 %v135_v3, %v138_v14  ;;  %v413_v15 = vshll.u32 %v3654_v21, %v401_v41  ;;  %v1903_v48 = vpop.f32.mrb[1].mxu0  ;;  %v3133_v14 = vpop.f32.mrb[0].mxu1 }
  0xe2   :  { %v412_v5 = vor.u32 %v411_v28, %v410_v50  ;;  %v414_v55 = vshrl.u32 %v2081_v24, %v402_v30  ;;  %v403_v33 = vshrl.u32 %v2077_v1, %v402_v30  ;;  %v416_v43 = vshll.u32 %v2081_v24, %v401_v41  ;;  %v3141_v60 = vpop.f32.mrb[2].mxu0 }
  0xe3   :  { %v362_v2 = vor.u32 4788187, %v361_v44  ;;  %v417_v27 = vshrl.u32 %v3658_v29, %v402_v30  ;;  %v365_v20 = vcvt.s32.f32 %v358_v59  ;;  %v141_v17 = vsub.s32 0, %v3108_v56  ;;  %v1915_v59 = vpop.f32.mrb[1].mxu1 }
  0xe4   :  { %v415_v49 = vor.u32 %v414_v55, %v413_v15  ;;  %vm419_vm6 = vcmp.lt.s32.totalorder %v3091_v13, 1  ;;  %vm420_vm0 = vcmp.lt.s32.totalorder %v3091_v13, 2  ;;  %vm422_vm7 = vcmp.lt.s32.totalorder %v3091_v13, 4 }
  0xe5   :  { %v363_v23 = vand.u32 2147483647, %v362_v2  ;;  %v418_v61 = vor.u32 %v417_v27, %v416_v43  ;;  %v1825_v3 = vmin.u32 %v141_v17, %v3108_v56  ;;  %vm421_vm8 = vcmp.lt.s32.totalorder %v3091_v13, 3 }
  0xe6   :  { %v424_v45 = vsel %vm422_vm7, %v412_v5, 2102212464  ;;  %v427_v62 = vsel %vm419_vm6, %v406_v54, %v409_v7  ;;  %v423_v41 = vsel %vm419_vm6, %v403_v33, %v406_v54  ;;  %v428_v8 = vsel %vm422_vm7, %v415_v49, 920167782  ;;  %v3153_v33 = vpop.f32.mrb[2].mxu1 }
  0xe7   :  { %v366_v42 = vmul.f32 %v365_v20, %v363_v23  ;;  %v431_v0 = vsel %vm419_vm6, %v409_v7, %v412_v5  ;;  %v143_v58 = vclz %v1825_v3  ;;  %v425_v38 = vsel %vm421_vm8, %v409_v7, %v424_v45 }
  0xe8   :  { %v429_v30 = vsel %vm421_vm8, %v412_v5, %v428_v8  ;;  %v432_v36 = vsel %vm422_vm7, %v418_v61, 1326507024  ;;  %v179_v34 = vand.u32 2147483647, %v2912_v40  ;;  %v426_v54 = vsel %vm420_vm0, %v423_v41, %v425_v38  ;;  %v1906_v5 = vpop.f32.mrb[3].mxu0 }
  0xe9   :  { %v367_v4 = vxor.u32 2147483648, %v366_v42  ;;  %v430_v47 = vsel %vm420_vm0, %v427_v62, %v429_v30  ;;  %v433_v32 = vsel %vm421_vm8, %v415_v49, %v432_v36  ;;  %v1826_v26 = vadd.s32 4294967294, %v143_v58  ;;  %v3155_v43 = vpop.f32.mrb[4].mxu0 }
  0xea   :  { %v434_v31 = vsel %vm420_vm0, %v431_v0, %v433_v32  ;;  %v3129_v46 = vmul.u32.u64.low %v3087_v19, %v430_v47  ;;  %v3130_v25 = vmul.u32.u64.high %v3087_v19, %v430_v47, %v3129_v46  ;;  %vm285_vm9 = vcmp.lt.s32.totalorder %v2852_v12, 0  ;;  %v1909_v23 = vpop.f32.mrb[5].mxu0 }
  0xeb   :  { %v3138_v50 = vmul.u32.u64.low %v3087_v19, %v434_v31  ;;  %v3139_v28 = vmul.u32.u64.high %v3087_v19, %v434_v31, %v3138_v50  ;;  %vm1827_vm10 = vcmp.lt.s32.totalorder %v1826_v26, 0  ;;  %v189_v44 = vadd.s32 1, %v3095_v57 }
  0xec   :  { %v3653_v7 = vand.u32 2147483647, %v3072_v39  ;;  %v131_v15 = vadd.s32 %v3053_v63, %v3060_v10  ;;  %v146_v13 = vsel %vm1827_vm10, 0, %v1826_v26  ;;  %v3150_v55 = vand.u32 8388607, %v179_v34  ;;  %v1918_v63 = vpop.f32.mrb[3].mxu1 }
  0xed   :  { %v598_v2 = vand.u32 2139095040, %v3072_v39  ;;  %v3159_v57 = vsel %vm285_vm9, %v367_v4, %v366_v42  ;;  %v147_v27 = vsub.s32 32, %v146_v13  ;;  %v151_v20 = vsub.s32 4294967266, %v146_v13 }
  0xee   :  { %v442_v17 = vmul.u32 %v3087_v19, %v426_v54  ;;  %v148_v10 = vshll.u32 %v3108_v56, %v146_v13  ;;  %vm444_vm12 = vc.u32 %v3139_v28, %v3129_v46  ;;  %v445_v49 = vadd.s32 1, %v3130_v25 }
  0xef   :  { %vm190_vm11 = vcmp.gt.s32.totalorder %v189_v44, 0  ;;  %v149_v61 = vshrl.u32 %v131_v15, %v147_v27  ;;  %v152_v3 = vadd.s32 127, %v151_v20  ;;  %v599_v62 = vshrl.u32 %v598_v2, 23 }
  0xf0   :  { %v191_v45 = vsel %vm190_vm11, %v189_v44, 0  ;;  %v446_v42 = vsel %vm444_vm12, %v445_v49, %v3130_v25  ;;  %v187_v41 = vor.u32 8388608, %v3150_v55  ;;  %v3170_v38 = vand.u32 8388607, %v3653_v7 }
  0xf1   :  { %v192_v8 = vshrl.u32 %v191_v45, 5  ;;  %v193_v19 = vand.u32 31, %v191_v45  ;;  %v150_v0 = vor.u32 %v149_v61, %v148_v10  ;;  %v153_v58 = vshll.u32 %v152_v3, 23 }
  0xf2   :  { %v447_v56 = vadd.s32 %v446_v42, %v442_v17  ;;  %vm77_vm13 = vcmp.lt.s32.totalorder %v2868_v11, 0  ;;  %v1844_v47 = vadd.s32 4294967169, %v599_v62  ;;  %vm3177_vm14 = vcmp.le.f32.partialorder %v283_v22, 0.7853982 }
  0xf3   :  { %v194_v30 = vsub.s32 32, %v193_v19  ;;  %v196_v36 = vshll.u32 %v2077_v1, %v193_v19  ;;  %v199_v4 = vshll.u32 %v2078_v6, %v193_v19  ;;  %v154_v26 = vor.u32 4788187, %v153_v58 }
  0xf4   :  { %v157_v31 = vcvt.s32.f32 %v150_v0  ;;  %v448_v25 = vadd.s32 536870912, %v447_v56  ;;  %v202_v48 = vshll.u32 %v3656_v9, %v193_v19  ;;  %vm3184_vm15 = vcmp.le.f32.partialorder %v75_v51, 0.7853982 }
  0xf5   :  { %v197_v50 = vshrl.u32 %v2078_v6, %v194_v30  ;;  %v200_v59 = vshrl.u32 %v3656_v9, %v194_v30  ;;  %v203_v22 = vshrl.u32 %v3654_v21, %v194_v30  ;;  %v205_v44 = vshll.u32 %v3654_v21, %v193_v19 }
  0xf6   :  { %v155_v5 = vand.u32 2147483647, %v154_v26  ;;  %v3192_v15 = vshrl.u32 %v448_v25, 30  ;;  %v206_v13 = vshrl.u32 %v2081_v24, %v194_v30  ;;  %v208_v55 = vshll.u32 %v2081_v24, %v193_v19 }
  0xf7   :  { %v198_v2 = vor.u32 %v197_v50, %v196_v36  ;;  %v201_v51 = vor.u32 %v200_v59, %v199_v4  ;;  %v204_v27 = vor.u32 %v203_v22, %v202_v48  ;;  %v209_v20 = vshrl.u32 %v3658_v29, %v194_v30 }
  0xf8   :  { %v158_v17 = vmul.f32 %v157_v31, %v155_v5  ;;  %v450_v63 = vshll.u32 %v3192_v15, 30  ;;  %v195_v10 = vshrl.u32 %v2077_v1, %v194_v30  ;;  %v207_v49 = vor.u32 %v206_v13, %v205_v44 }
  0xf9   :  { %v210_v23 = vor.u32 %v209_v20, %v208_v55  ;;  %vm211_vm1 = vcmp.lt.s32.totalorder %v192_v8, 1  ;;  %vm212_vm2 = vcmp.lt.s32.totalorder %v192_v8, 2  ;;  %vm214_vm3 = vcmp.lt.s32.totalorder %v192_v8, 4  ;;  %v3223_v55 = vpop.f32.mrb[4].mxu1 }
  0xfa   :  { %v159_v61 = vxor.u32 2147483648, %v158_v17  ;;  %v3199_v3 = vsub.s32 %v447_v56, %v450_v63  ;;  %vm213_vm4 = vcmp.lt.s32.totalorder %v192_v8, 3  ;;  %v216_v45 = vsel %vm214_vm3, %v204_v27, 2102212464 }
  0xfb   :  { %v215_v62 = vsel %vm211_vm1, %v195_v10, %v198_v2  ;;  %v217_v42 = vsel %vm213_vm4, %v201_v51, %v216_v45  ;;  %v219_v19 = vsel %vm211_vm1, %v198_v2, %v201_v51  ;;  %v220_v0 = vsel %vm214_vm3, %v207_v49, 920167782 }
  0xfc   :  { %v160_v58 = vsel %vm77_vm13, %v159_v61, %v158_v17  ;;  %v453_v30 = vsub.s32 0, %v3199_v3  ;;  %v221_v36 = vsel %vm213_vm4, %v204_v27, %v220_v0  ;;  %v223_v4 = vsel %vm211_vm1, %v201_v51, %v204_v27  ;;  %v1921_v17 = vpop.f32.mrb[5].mxu1 }
  0xfd   :  { %v371_v56 = vsel %vm3177_vm14, %v2852_v12, %v3159_v57  ;;  %v222_v26 = vsel %vm212_vm2, %v219_v19, %v221_v36  ;;  %v224_v31 = vsel %vm214_vm3, %v210_v23, 1326507024  ;;  %v227_v25 = vshll.u32 %v187_v41, 8  ;;  %v3225_v41 = vpop.f32.mrb[6].mxu0 }
  0xfe   :  { %v163_v48 = vsel %vm3184_vm15, %v2868_v11, %v160_v58  ;;  %v1837_v50 = vmin.u32 %v453_v30, %v3199_v3  ;;  %v218_v59 = vsel %vm212_vm2, %v215_v62, %v217_v42  ;;  %v225_v22 = vsel %vm213_vm4, %v207_v49, %v224_v31  ;;  %v1912_v63 = vpop.f32.mrb[7].mxu0  ;;  %v50_v49 = vpop.permute.xlu0 %49 }
  0xff   :  { %v226_v44 = vsel %vm212_vm2, %v223_v4, %v225_v22  ;;  %v3218_v5 = vmul.u32.u64.low %v227_v25, %v222_v26  ;;  %v3219_v13 = vmul.u32.u64.high %v227_v25, %v222_v26, %v3218_v5  ;;  %v603_v57 = vor.u32 8388608, %v3170_v38 }
 0x100   :  { %v455_v2 = vclz %v1837_v50  ;;  %v3227_v51 = vmul.u32.u64.low %v227_v25, %v226_v44  ;;  %v3228_v27 = vmul.u32.u64.high %v227_v25, %v226_v44, %v3227_v51  ;;  %v605_v20 = vadd.s32 1, %v1844_v47 }
 0x101   :  { %2025 = vcosq.f32 %v371_v56  ;;  %v443_v8 = vadd.s32 %v3129_v46, %v3139_v28  ;;  %v234_v38 = vmul.u32 %v227_v25, %v218_v59  ;;  %v237_v23 = vadd.s32 1, %v3219_v13 }
 0x102   :  { %2027 = vsinq.f32 %v371_v56  ;;  %v1838_v10 = vadd.s32 4294967294, %v455_v2  ;;  %vm606_vm5 = vcmp.gt.s32.totalorder %v605_v20, 0  ;;  %vm236_vm0 = vc.u32 %v3228_v27, %v3218_v5  ;;  %v60_v50 = vpop.permute.xlu0 %59 }
 0x103   :  { %2029 = vcosq.f32 %v163_v48  ;;  %v607_v61 = vsel %vm606_vm5, %v605_v20, 0  ;;  %v3235_v47 = vshll.u32 %v603_v57, 8  ;;  %v238_v62 = vsel %vm236_vm0, %v237_v23, %v3219_v13 }
 0x104   :  { %2031 = vsinq.f32 %v163_v48  ;;  %vm1839_vm6 = vcmp.lt.s32.totalorder %v1838_v10, 0  ;;  %v609_v42 = vand.u32 31, %v607_v61  ;;  %v3239_v46 = vmul.f32 %v2835_v52, %v50_v49 }
 0x105   :  { %v458_v45 = vsel %vm1839_vm6, 0, %v1838_v10  ;;  %v239_v0 = vadd.s32 %v238_v62, %v234_v38  ;;  %v3241_v58 = vshrl.u32 %v607_v61, 5  ;;  %v3257_v10 = vmul.f32 %v2835_v52, %v60_v50 }
 0x106   :  { %v459_v28 = vsub.s32 32, %v458_v45  ;;  %v463_v19 = vsub.s32 4294967266, %v458_v45  ;;  %v460_v30 = vshll.u32 %v3199_v3, %v458_v45  ;;  %v610_v36 = vsub.s32 32, %v609_v42 }
 0x107   :  { %v612_v4 = vshll.u32 %v2077_v1, %v609_v42  ;;  %v615_v56 = vshll.u32 %v2078_v6, %v609_v42  ;;  %v240_v25 = vadd.s32 536870912, %v239_v0  ;;  %v618_v48 = vshll.u32 %v3656_v9, %v609_v42 }
 0x108   :  { %v461_v26 = vshrl.u32 %v443_v8, %v459_v28  ;;  %v464_v31 = vadd.s32 127, %v463_v19  ;;  %v613_v59 = vshrl.u32 %v2078_v6, %v610_v36  ;;  %v616_v22 = vshrl.u32 %v3656_v9, %v610_v36 }
 0x109   :  { %v619_v44 = vshrl.u32 %v3654_v21, %v610_v36  ;;  %v621_v13 = vshll.u32 %v3654_v21, %v609_v42  ;;  %v3251_v2 = vshrl.u32 %v240_v25, 30  ;;  %v622_v51 = vshrl.u32 %v2081_v24, %v610_v36 }
 0x10a   :  { %v462_v3 = vor.u32 %v461_v26, %v460_v30  ;;  %v465_v57 = vshll.u32 %v464_v31, 23  ;;  %v614_v17 = vor.u32 %v613_v59, %v612_v4  ;;  %v617_v63 = vor.u32 %v616_v22, %v615_v56 }
 0x10b   :  { %v3254_v20 = vpop.eup %2025  ;;  %v620_v8 = vor.u32 %v619_v44, %v618_v48  ;;  %vm389_vm7 = vcmp.lt.s32.totalorder %v2905_v37, 0  ;;  %v242_v23 = vshll.u32 %v3251_v2, 30  ;;  %v611_v61 = vshrl.u32 %v2077_v1, %v610_v36 }
 0x10c   :  { %v3259_v49 = vpop.eup %2027  ;;  %v466_v38 = vor.u32 4788187, %v465_v57  ;;  %v623_v45 = vor.u32 %v622_v51, %v621_v13  ;;  %v469_v28 = vcvt.s32.f32 %v462_v3  ;;  %v624_v19 = vshll.u32 %v2081_v24, %v609_v42  ;;  %v820_v13 = vpop.permute.xlu1 %819 }
 0x10d   :  { %v3264_v62 = vpop.eup %2029  ;;  %v625_v30 = vshrl.u32 %v3658_v29, %v610_v36  ;;  %vm627_vm8 = vcmp.lt.s32.totalorder %v3241_v58, 1  ;;  %v3271_v56 = vsub.s32 %v239_v0, %v242_v23  ;;  %vm629_vm10 = vcmp.lt.s32.totalorder %v3241_v58, 3 }
 0x10e   :  { %v3269_v52 = vpop.eup %2031  ;;  %v467_v4 = vand.u32 2147483647, %v466_v38  ;;  %vm630_vm12 = vcmp.lt.s32.totalorder %v3241_v58, 4  ;;  %v635_v25 = vsel %vm627_vm8, %v614_v17, %v617_v63  ;;  %vm628_vm11 = vcmp.lt.s32.totalorder %v3241_v58, 2 }
 0x10f   :  { %v626_v26 = vor.u32 %v625_v30, %v624_v19  ;;  %v632_v31 = vsel %vm630_vm12, %v620_v8, 2102212464  ;;  %v636_v48 = vsel %vm630_vm12, %v623_v45, 920167782  ;;  %v245_v36 = vsub.s32 0, %v3271_v56 }
 0x110   :  { %v470_v42 = vmul.f32 %v469_v28, %v467_v4  ;;  %v637_v50 = vsel %vm629_vm10, %v620_v8, %v636_v48  ;;  %v631_v0 = vsel %vm627_vm8, %v611_v61, %v614_v17  ;;  %v639_v22 = vsel %vm627_vm8, %v617_v63, %v620_v8  ;;  %v825_v28 = vpop.permute.xlu0 %824 }
 0x111   :  { %v638_v59 = vsel %vm628_vm11, %v635_v25, %v637_v50  ;;  %v640_v44 = vsel %vm630_vm12, %v626_v26, 1326507024  ;;  %v1829_v57 = vmin.u32 %v245_v36, %v3271_v56  ;;  %v633_v51 = vsel %vm629_vm10, %v617_v63, %v632_v31 }
 0x112   :  { %v471_v3 = vxor.u32 2147483648, %v470_v42  ;;  %v641_v38 = vsel %vm629_vm10, %v623_v45, %v640_v44  ;;  %v3295_v23 = vmul.u32.u64.low %v3235_v47, %v638_v59  ;;  %v3296_v61 = vmul.u32.u64.high %v3235_v47, %v638_v59, %v3295_v23 }
 0x113   :  { %v642_v17 = vsel %vm628_vm11, %v639_v22, %v641_v38  ;;  %v494_v8 = vand.u32 2139095040, %v3239_v46  ;;  %v247_v19 = vclz %v1829_v57  ;;  %2033 = vrcp.f32 %v820_v13 }
 0x114   :  { %v3300_v30 = vmul.u32.u64.low %v3235_v47, %v642_v17  ;;  %v3301_v4 = vmul.u32.u64.high %v3235_v47, %v642_v17, %v3300_v30  ;;  %v472_v63 = vsel %vm389_vm7, %v471_v3, %v470_v42  ;;  %v634_v45 = vsel %vm628_vm11, %v631_v0, %v633_v51 }
 0x115   :  { %v3652_v26 = vand.u32 2147483647, %v3239_v46  ;;  %v495_v31 = vshrl.u32 %v494_v8, 23  ;;  %vm3310_vm1 = vcmp.le.f32.partialorder %v387_v35, 0.7853982  ;;  %v1830_v48 = vadd.s32 4294967294, %v247_v19 }
 0x116   :  { %2035 = vrcp.f32 %v825_v28  ;;  %v235_v50 = vadd.s32 %v3218_v5, %v3228_v27  ;;  %v653_v42 = vadd.s32 1, %v3296_v61  ;;  %v702_v0 = vand.u32 2139095040, %v3257_v10 }
 0x117   :  { %v1840_v58 = vadd.s32 4294967169, %v495_v31  ;;  %v475_v59 = vsel %vm3310_vm1, %v2905_v37, %v472_v63  ;;  %vm1831_vm2 = vcmp.lt.s32.totalorder %v1830_v48, 0  ;;  %v650_v35 = vmul.u32 %v3235_v47, %v634_v45 }
 0x118   :  { %vm652_vm3 = vc.u32 %v3301_v4, %v3295_v23  ;;  %v250_v22 = vsel %vm1831_vm2, 0, %v1830_v48  ;;  %v3327_v5 = vand.u32 8388607, %v3652_v26  ;;  %v3659_v51 = vand.u32 2147483647, %v3257_v10 }
 0x119   :  { %v654_v44 = vsel %vm652_vm3, %v653_v42, %v3296_v61  ;;  %v501_v27 = vadd.s32 1, %v1840_v58  ;;  %v251_v13 = vsub.s32 32, %v250_v22  ;;  %v255_v3 = vsub.s32 4294967266, %v250_v22 }
 0x11a   :  { %v655_v57 = vadd.s32 %v654_v44, %v650_v35  ;;  %2037 = vcosq.f32 %v475_v59  ;;  %v252_v38 = vshll.u32 %v3271_v56, %v250_v22  ;;  %v703_v47 = vshrl.u32 %v702_v0, 23 }
 0x11b   :  { %vm502_vm4 = vcmp.gt.s32.totalorder %v501_v27, 0  ;;  %v253_v17 = vshrl.u32 %v235_v50, %v251_v13  ;;  %v256_v8 = vadd.s32 127, %v255_v3  ;;  %2039 = vsinq.f32 %v475_v59 }
 0x11c   :  { %v656_v28 = vadd.s32 536870912, %v655_v57  ;;  %v503_v19 = vsel %vm502_vm4, %v501_v27, 0  ;;  %v3332_v61 = vadd.s32 %v3295_v23, %v3301_v4  ;;  %v499_v30 = vor.u32 8388608, %v3327_v5 }
 0x11d   :  { %v505_v63 = vand.u32 31, %v503_v19  ;;  %v3335_v45 = vpop.eup %2033  ;;  %v254_v31 = vor.u32 %v253_v17, %v252_v38  ;;  %v257_v48 = vshll.u32 %v256_v8, 23  ;;  %v504_v56 = vshrl.u32 %v503_v19, 5 }
 0x11e   :  { %v3337_v42 = vshrl.u32 %v656_v28, 30  ;;  %vm181_vm5 = vcmp.lt.s32.totalorder %v2912_v40, 0  ;;  %v1848_v59 = vadd.s32 4294967169, %v703_v47  ;;  %vm3352_vm6 = vcmp.le.f32.partialorder %v179_v34, 0.7853982 }
 0x11f   :  { %v506_v50 = vsub.s32 32, %v505_v63  ;;  %v508_v58 = vshll.u32 %v2077_v1, %v505_v63  ;;  %v511_v0 = vshll.u32 %v2078_v6, %v505_v63  ;;  %v258_v4 = vor.u32 4788187, %v257_v48 }
 0x120   :  { %v3342_v23 = vpop.eup %2035  ;;  %v261_v35 = vcvt.s32.f32 %v254_v31  ;;  %v658_v22 = vshll.u32 %v3337_v42, 30  ;;  %v514_v44 = vshll.u32 %v3656_v9, %v505_v63  ;;  %v517_v3 = vshll.u32 %v3654_v21, %v505_v63 }
 0x121   :  { %v509_v5 = vshrl.u32 %v2078_v6, %v506_v50  ;;  %v512_v27 = vshrl.u32 %v3656_v9, %v506_v50  ;;  %v515_v13 = vshrl.u32 %v3654_v21, %v506_v50  ;;  %v259_v47 = vand.u32 2147483647, %v258_v4 }
 0x122   :  { %v3356_v17 = vsub.s32 %v655_v57, %v658_v22  ;;  %v518_v8 = vshrl.u32 %v2081_v24, %v506_v50  ;;  %v520_v28 = vshll.u32 %v2081_v24, %v505_v63  ;;  %v521_v26 = vshrl.u32 %v3658_v29, %v506_v50  ;;  %v830_v29 = vpop.permute.xlu1 %829 }
 0x123   :  { %v510_v19 = vor.u32 %v509_v5, %v508_v58  ;;  %v513_v31 = vor.u32 %v512_v27, %v511_v0  ;;  %v516_v48 = vor.u32 %v515_v13, %v514_v44  ;;  %v262_v36 = vmul.f32 %v261_v35, %v259_v47 }
 0x124   :  { %v661_v7 = vsub.s32 0, %v3356_v17  ;;  %v507_v34 = vshrl.u32 %v2077_v1, %v506_v50  ;;  %v519_v21 = vor.u32 %v518_v8, %v517_v3  ;;  %v3363_v9 = vpop.eup %2037  ;;  %v522_v4 = vor.u32 %v521_v26, %v520_v28 }
 0x125   :  { %vm523_vm0 = vcmp.lt.s32.totalorder %v504_v56, 1  ;;  %vm524_vm8 = vcmp.lt.s32.totalorder %v504_v56, 2  ;;  %vm526_vm10 = vcmp.lt.s32.totalorder %v504_v56, 4  ;;  %v263_v57 = vxor.u32 2147483648, %v262_v36  ;;  %v3366_v0 = vpop.eup %2039 }
 0x126   :  { %v1845_v63 = vmin.u32 %v661_v7, %v3356_v17  ;;  %vm525_vm12 = vcmp.lt.s32.totalorder %v504_v56, 3  ;;  %v528_v58 = vsel %vm526_vm10, %v516_v48, 2102212464  ;;  %v527_v22 = vsel %vm523_vm0, %v507_v34, %v510_v19 }
 0x127   :  { %v529_v35 = vsel %vm525_vm12, %v513_v31, %v528_v58  ;;  %v531_v44 = vsel %vm523_vm0, %v510_v19, %v513_v31  ;;  %v532_v5 = vsel %vm526_vm10, %v519_v21, 920167782  ;;  %v264_v50 = vsel %vm181_vm5, %v263_v57, %v262_v36 }
 0x128   :  { %v663_v27 = vclz %v1845_v63  ;;  %v533_v26 = vsel %vm525_vm12, %v516_v48, %v532_v5  ;;  %v535_v13 = vsel %vm523_vm0, %v513_v31, %v516_v48  ;;  %v536_v47 = vsel %vm526_vm10, %v522_v4, 1326507024 }
 0x129   :  { %v534_v3 = vsel %vm524_vm8, %v531_v44, %v533_v26  ;;  %v539_v7 = vshll.u32 %v499_v30, 8  ;;  %v3375_v8 = vand.u32 8388607, %v3659_v51  ;;  %v530_v34 = vsel %vm524_vm8, %v527_v22, %v529_v35 }
 0x12a   :  { %v1846_v28 = vadd.s32 4294967294, %v663_v27  ;;  %v537_v19 = vsel %vm525_vm12, %v519_v21, %v536_v47  ;;  %v709_v58 = vadd.s32 1, %v1848_v59  ;;  %v267_v36 = vsel %vm3352_vm6, %v2912_v40, %v264_v50 }
 0x12b   :  { %v538_v31 = vsel %vm524_vm8, %v535_v13, %v537_v19  ;;  %v3383_v48 = vmul.u32.u64.low %v539_v7, %v534_v3  ;;  %v3384_v4 = vmul.u32.u64.high %v539_v7, %v534_v3, %v3383_v48  ;;  %v707_v21 = vor.u32 8388608, %v3375_v8 }
 0x12c   :  { %vm1847_vm11 = vcmp.lt.s32.totalorder %v1846_v28, 0  ;;  %v3387_v30 = vmul.u32.u64.low %v539_v7, %v538_v31  ;;  %v3388_v57 = vmul.u32.u64.high %v539_v7, %v538_v31, %v3387_v30  ;;  %vm710_vm2 = vcmp.gt.s32.totalorder %v709_v58, 0 }
 0x12d   :  { %v666_v63 = vsel %vm1847_vm11, 0, %v1846_v28  ;;  %v711_v59 = vsel %vm710_vm2, %v709_v58, 0  ;;  %2041 = vrcp.f32 %v830_v29  ;;  %v546_v44 = vmul.u32 %v539_v7, %v530_v34 }
 0x12e   :  { %2043 = vcosq.f32 %v267_v36  ;;  %v667_v22 = vsub.s32 32, %v666_v63  ;;  %v671_v35 = vsub.s32 4294967266, %v666_v63  ;;  %v668_v56 = vshll.u32 %v3356_v17, %v666_v63 }
 0x12f   :  { %2045 = vsinq.f32 %v267_v36  ;;  %v549_v5 = vadd.s32 1, %v3384_v4  ;;  %v713_v50 = vand.u32 31, %v711_v59  ;;  %vm548_vm3 = vc.u32 %v3388_v57, %v3383_v48 }
 0x130   :  { %v669_v27 = vshrl.u32 %v3332_v61, %v667_v22  ;;  %v672_v26 = vadd.s32 127, %v671_v35  ;;  %v712_v13 = vshrl.u32 %v711_v59, 5  ;;  %v3684_v19 = vmov 2131351028  }
 0x131   :  { %v550_v3 = vsel %vm548_vm3, %v549_v5, %v3384_v4  ;;  %v714_v29 = vsub.s32 32, %v713_v50  ;;  %v716_v47 = vshll.u32 %v2077_v1, %v713_v50  ;;  %v719_v7 = vshll.u32 %v2078_v6, %v713_v50 }
 0x132   :  { %v670_v28 = vor.u32 %v669_v27, %v668_v56  ;;  %v673_v34 = vshll.u32 %v672_v26, 23  ;;  %v551_v17 = vadd.s32 %v550_v3, %v546_v44  ;;  %v722_v58 = vshll.u32 %v3684_v19, %v713_v50 }
 0x133   :  { %vm597_vm4 = vcmp.lt.s32.totalorder %v3072_v39, 0  ;;  %v715_v61 = vshrl.u32 %v2077_v1, %v714_v29  ;;  %v717_v36 = vshrl.u32 %v2078_v6, %v714_v29  ;;  %v720_v31 = vshrl.u32 %v3684_v19, %v714_v29 }
 0x134   :  { %v3685_v30 = vmov 2102212464   ;;  %v674_v63 = vor.u32 4788187, %v673_v34  ;;  %v677_v59 = vcvt.s32.f32 %v670_v28  ;;  %v552_v22 = vadd.s32 536870912, %v551_v17 }
 0x135   :  { %v723_v4 = vshrl.u32 %v3685_v30, %v714_v29  ;;  %v725_v35 = vshll.u32 %v3685_v30, %v713_v50  ;;  %v3686_v56 = vand.u32 2147483647, %v3072_v39  ;;  %v718_v5 = vor.u32 %v717_v36, %v716_v47 }
 0x136   :  { %v721_v27 = vor.u32 %v720_v31, %v719_v7  ;;  %v726_v6 = vshrl.u32 %v2081_v24, %v714_v29  ;;  %v675_v26 = vand.u32 2147483647, %v674_v63  ;;  %v3413_v3 = vshrl.u32 %v552_v22, 30 }
 0x137   :  { %vm3408_vm0 = vcmp.le.f32.partialorder %v3686_v56, 0.7853982  ;;  %v724_v1 = vor.u32 %v723_v4, %v722_v58  ;;  %v728_v34 = vshll.u32 %v2081_v24, %v713_v50  ;;  %v3689_v28 = vmov 1326507024   ;;  %v3417_v51 = vpop.eup %2041 }
 0x138   :  { %v729_v19 = vshrl.u32 %v3689_v28, %v714_v29  ;;  %v727_v30 = vor.u32 %v726_v6, %v725_v35  ;;  %vm731_vm8 = vcmp.lt.s32.totalorder %v712_v13, 1  ;;  %vm732_vm10 = vcmp.lt.s32.totalorder %v712_v13, 2  ;;  %v3419_v56 = vpop.eup %2043  ;;  %v835_v28 = vpop.permute.xlu0 %834 }
 0x139   :  { %vm733_vm12 = vcmp.lt.s32.totalorder %v712_v13, 3  ;;  %v678_v47 = vmul.f32 %v677_v59, %v675_v26  ;;  %v554_v7 = vshll.u32 %v3413_v3, 30  ;;  %vm734_vm11 = vcmp.lt.s32.totalorder %v712_v13, 4  ;;  %v3422_v36 = vpop.eup %2045 }
 0x13a   :  { %v730_v58 = vor.u32 %v729_v19, %v728_v34  ;;  %v735_v31 = vsel %vm731_vm8, %v715_v61, %v718_v5  ;;  %v736_v24 = vsel %vm734_vm11, %v724_v1, 2102212464  ;;  %v739_v50 = vsel %vm731_vm8, %v718_v5, %v721_v27 }
 0x13b   :  { %v740_v29 = vsel %vm734_vm11, %v727_v30, 920167782  ;;  %v679_v4 = vxor.u32 2147483648, %v678_v47  ;;  %v3426_v63 = vsub.s32 %v551_v17, %v554_v7  ;;  %v737_v22 = vsel %vm733_vm12, %v721_v27, %v736_v24 }
 0x13c   :  { %v741_v35 = vsel %vm733_vm12, %v724_v1, %v740_v29  ;;  %v743_v6 = vsel %vm731_vm8, %v721_v27, %v724_v1  ;;  %v744_v26 = vsel %vm734_vm11, %v730_v58, 1326507024  ;;  %v747_v34 = vshll.u32 %v707_v21, 8 }
 0x13d   :  { %v742_v59 = vsel %vm732_vm10, %v739_v50, %v741_v35  ;;  %v680_v61 = vsel %vm597_vm4, %v679_v4, %v678_v47  ;;  %v557_v5 = vsub.s32 0, %v3426_v63  ;;  %v745_v17 = vsel %vm733_vm12, %v727_v30, %v744_v26 }
 0x13e   :  { %v3690_v19 = vsub.s32 4, %v3099_v53  ;;  %v738_v27 = vsel %vm732_vm10, %v735_v31, %v737_v22  ;;  %v746_v1 = vsel %vm732_vm10, %v743_v6, %v745_v17  ;;  %v3452_v47 = vsel %vm3408_vm0, %v3072_v39, %v680_v61 }
 0x13f   :  { %v3445_v8 = vmul.u32.u64.low %v747_v34, %v742_v59  ;;  %v3446_v21 = vmul.u32.u64.high %v747_v34, %v742_v59, %v3445_v8  ;;  %v1841_v30 = vmin.u32 %v557_v5, %v3426_v63  ;;  %2047 = vrcp.f32 %v835_v28 }
 0x140   :  { %v162_v7 = vsel %vm77_vm13, %v3690_v19, %v3099_v53  ;;  %v3455_v58 = vmul.u32.u64.low %v747_v34, %v746_v1  ;;  %v3456_v24 = vmul.u32.u64.high %v747_v34, %v746_v1, %v3455_v58  ;;  %v547_v13 = vadd.s32 %v3383_v48, %v3388_v57 }
 0x141   :  { %v164_v53 = vsel %vm3184_vm15, 0, %v162_v7  ;;  %v559_v31 = vclz %v1841_v30  ;;  %v754_v50 = vmul.u32 %v747_v34, %v738_v27  ;;  %2049 = vcosq.f32 %v3452_v47 }
 0x142   :  { %v168_v29 = vadd.s32 3, %v164_v53  ;;  %v757_v4 = vadd.s32 1, %v3446_v21  ;;  %v172_v22 = vxor.u32 2147483648, %v3269_v52  ;;  %v265_v35 = vsub.s32 4, %v3251_v2 }
 0x143   :  { %v1842_v59 = vadd.s32 4294967294, %v559_v31  ;;  %vm756_vm13 = vc.u32 %v3456_v24, %v3445_v8  ;;  %vm167_vm15 = vweird.f32 %v2868_v11  ;;  %v175_v57 = vxor.u32 2147483648, %v3264_v62 }
 0x144   :  { %v169_v54 = vand.u32 3, %v168_v29  ;;  %v758_v48 = vsel %vm756_vm13, %v757_v4, %v3446_v21  ;;  %v266_v6 = vsel %vm181_vm5, %v265_v35, %v3251_v2  ;;  %v276_v26 = vxor.u32 2147483648, %v3422_v36  ;;  %v3480_v2 = vpop.permute.xlu0 %844 }
 0x145   :  { %vm1843_vm2 = vcmp.lt.s32.totalorder %v1842_v59, 0  ;;  %v759_v34 = vadd.s32 %v758_v48, %v754_v50  ;;  %vm1664_vm12 = vcmask 162816   ;;  %v268_v17 = vsel %vm3352_vm6, 0, %v266_v6 }
 0x146   :  { %vm170_vm3 = vcmp.lt.s32.totalorder %v169_v54, 2  ;;  %vm171_vm8 = vcmp.eq.s32.totalorder %v169_v54, 0  ;;  %v562_v61 = vsel %vm1843_vm2, 0, %v1842_v59  ;;  %vm174_vm10 = vcmp.eq.s32.totalorder %v169_v54, 2 }
 0x147   :  { %v173_v5 = vsel %vm171_vm8, %v3264_v62, %v172_v22  ;;  %v563_v28 = vsub.s32 32, %v562_v61  ;;  %v564_v19 = vshll.u32 %v3426_v63, %v562_v61  ;;  %v567_v7 = vsub.s32 4294967266, %v562_v61 }
 0x148   :  { %v760_v27 = vadd.s32 536870912, %v759_v34  ;;  %vm271_vm5 = vweird.f32 %v2912_v40  ;;  %v176_v1 = vsel %vm174_vm10, %v175_v57, %v3269_v52  ;;  %v272_v21 = vadd.s32 3, %v268_v17  ;;  %v1625_v50 = vpop.permute.xlu0 %1624 }
 0x149   :  { %vm1807_vm11 = vcmask 785408   ;;  %v369_v62 = vsub.s32 4, %v3032_v16  ;;  %v565_v30 = vshrl.u32 %v547_v13, %v563_v28  ;;  %v568_v58 = vadd.s32 127, %v567_v7 }
 0x14a   :  { %v3484_v53 = vshrl.u32 %v760_v27, 30  ;;  %v177_v38 = vsel %vm170_vm3, %v173_v5, %v176_v1  ;;  %1808 = vst.msk [vmem:[%s3650_s5] sm:$0xff] %vm1807_vm11, %v3124_v18  ;;  %1812 = vst.msk [vmem:[%s3650_s5 + $0x20] sm:$0xff] %vm1807_vm11, %v3133_v14  ;;  %v3515_v18 = vpop.eup %2047  ;;  %v3517_v14 = vpop.permute.xlu1 %839  ;;  %vm493_vm6 = vcmp.lt.s32.totalorder %v3239_v46, 0  ;;  %v3691_v29 = vand.u32 2147483647, %v3239_v46 }
 0x14b   :  { %1809 = vst.msk [vmem:[%s3650_s5 + $0x8] sm:$0xff] %vm1807_vm11, %v3141_v60  ;;  %1813 = vst.msk [vmem:[%s3650_s5 + $0x28] sm:$0xff] %vm1807_vm11, %v3153_v33  ;;  %v178_v60 = vsel %vm167_vm15, nan, %v177_v38  ;;  %v273_v33 = vand.u32 3, %v272_v21  ;;  %v370_v52 = vsel %vm285_vm9, %v369_v62, %v3032_v16  ;;  %v569_v63 = vshll.u32 %v568_v58, 23 }
 0x14c   :  { %1810 = vst.msk [vmem:[%s3650_s5 + $0x10] sm:$0xff] %vm1807_vm11, %v3155_v43  ;;  %1814 = vst.msk [vmem:[%s3650_s5 + $0x30] sm:$0xff] %vm1807_vm11, %v3223_v55  ;;  %v279_v43 = vxor.u32 2147483648, %v3419_v56  ;;  %v566_v55 = vor.u32 %v565_v30, %v564_v19  ;;  %v762_v13 = vshll.u32 %v3484_v53, 30  ;;  %v803_v31 = vmul.f32 0.6324555, %v178_v60 }
 0x14d   :  { %1811 = vst.msk [vmem:[%s3650_s5 + $0x18] sm:$0xff] %vm1807_vm11, %v3225_v41  ;;  %v3526_v41 = vpop.eup %2049  ;;  %vm274_vm13 = vcmp.lt.s32.totalorder %v273_v33, 2  ;;  %vm275_vm2 = vcmp.eq.s32.totalorder %v273_v33, 0  ;;  %vm278_vm15 = vcmp.eq.s32.totalorder %v273_v33, 2  ;;  %v372_v11 = vsel %vm3177_vm14, 0, %v370_v52 }
 0x14e   :  { %vm3533_vm3 = vcmp.le.f32.partialorder %v3691_v29, 0.7853982  ;;  %v570_v4 = vor.u32 4788187, %v569_v63  ;;  %v573_v22 = vcvt.s32.f32 %v566_v55  ;;  %v3537_v35 = vsub.s32 %v759_v34, %v762_v13  ;;  %v3545_v28 = vpop.permute.xlu1 %849  ;;  %v1635_v13 = vpop.permute.xlu0 %1634 }
 0x14f   :  { %v853_v59 = vmul.f32 %v3335_v45, %v803_v31  ;;  %v277_v54 = vsel %vm275_vm2, %v3419_v56, %v276_v26  ;;  %v280_v48 = vsel %vm278_vm15, %v279_v43, %v3422_v36  ;;  %v376_v57 = vadd.s32 3, %v372_v11 }
 0x150   :  { %v380_v32 = vxor.u32 2147483648, %v3259_v49  ;;  %v571_v6 = vand.u32 2147483647, %v570_v4  ;;  %v765_v61 = vsub.s32 0, %v3537_v35  ;;  %v281_v17 = vsel %vm274_vm13, %v277_v54, %v280_v48 }
 0x151   :  { %v1657_v5 = vmul.f32 %v1625_v50, %v853_v59  ;;  %v282_v34 = vsel %vm271_vm5, nan, %v281_v17  ;;  %v377_v19 = vand.u32 3, %v376_v57  ;;  %v383_v45 = vxor.u32 2147483648, %v3254_v20 }
 0x152   :  { %v473_v56 = vsub.s32 4, %v3192_v15  ;;  %2051 = vsinq.f32 %v3452_v47  ;;  %v574_v36 = vmul.f32 %v573_v22, %v571_v6  ;;  %v1849_v26 = vmin.u32 %v765_v61, %v3537_v35  ;;  %v1630_v62 = vpop.permute.xlu1 %1629 }
 0x153   :  { %1665 = vst.msk [vmem:[%s3651_s4] sm:$0xff] %vm1664_vm12, %v1657_v5  ;;  %v804_v7 = vmul.f32 0.6324555, %v282_v34  ;;  %vm375_vm9 = vweird.f32 %v2852_v12  ;;  %vm379_vm14 = vcmp.eq.s32.totalorder %v377_v19, 0  ;;  %vm382_vm8 = vcmp.eq.s32.totalorder %v377_v19, 2 }
 0x154   :  { %v474_v40 = vsel %vm389_vm7, %v473_v56, %v3192_v15  ;;  %v575_v27 = vxor.u32 2147483648, %v574_v36  ;;  %v767_v1 = vclz %v1849_v26  ;;  %v381_v21 = vsel %vm379_vm14, %v3254_v20, %v380_v32 }
 0x155   :  { %v855_v47 = vmul.f32 %v3342_v23, %v804_v7  ;;  %vm378_vm10 = vcmp.lt.s32.totalorder %v377_v19, 2  ;;  %v384_v30 = vsel %vm382_vm8, %v383_v45, %v3259_v49  ;;  %v476_v58 = vsel %vm3310_vm1, 0, %v474_v40 }
 0x156   :  { %v484_v38 = vxor.u32 2147483648, %v3366_v0  ;;  %v576_v60 = vsel %vm493_vm6, %v575_v27, %v574_v36  ;;  %v1850_v33 = vadd.s32 4294967294, %v767_v1  ;;  %v385_v43 = vsel %vm378_vm10, %v381_v21, %v384_v30 }
 0x157   :  { %v1658_v15 = vmul.f32 %v1630_v62, %v855_v47  ;;  %v579_v23 = vsel %vm3533_vm3, %v3239_v46, %v576_v60  ;;  %v386_v20 = vsel %vm375_vm9, nan, %v385_v43  ;;  %v480_v52 = vadd.s32 3, %v476_v58 }
 0x158   :  { %v577_v49 = vsub.s32 4, %v3413_v3  ;;  %2053 = vcosq.f32 %v579_v23  ;;  %vm1851_vm7 = vcmp.lt.s32.totalorder %v1850_v33, 0  ;;  %v805_v25 = vmul.f32 0.6324555, %v386_v20 }
 0x159   :  { %1666 = vst.msk [vmem:[%s3651_s4 + $0x8] sm:$0xff] %vm1664_vm12, %v1658_v15  ;;  %v487_v55 = vxor.u32 2147483648, %v3363_v9  ;;  %2055 = vsinq.f32 %v579_v23  ;;  %v770_v63 = vsel %vm1851_vm7, 0, %v1850_v33  ;;  %v481_v31 = vand.u32 3, %v480_v52 }
 0x15a   :  { %v578_v12 = vsel %vm493_vm6, %v577_v49, %v3413_v3  ;;  %v755_v50 = vadd.s32 %v3445_v8, %v3456_v24  ;;  %v771_v11 = vsub.s32 32, %v770_v63  ;;  %v775_v29 = vsub.s32 4294967266, %v770_v63 }
 0x15b   :  { %v857_v4 = vmul.f32 %v3417_v51, %v805_v25  ;;  %v772_v22 = vshll.u32 %v3537_v35, %v770_v63  ;;  %vm483_vm1 = vcmp.eq.s32.totalorder %v481_v31, 0  ;;  %vm486_vm5 = vcmp.eq.s32.totalorder %v481_v31, 2 }
 0x15c   :  { %v580_v59 = vsel %vm3533_vm3, 0, %v578_v12  ;;  %v2052_v54 = vpop.eup %2051  ;;  %v773_v48 = vshrl.u32 %v755_v50, %v771_v11  ;;  %v776_v57 = vadd.s32 127, %v775_v29  ;;  %v485_v3 = vsel %vm483_vm1, %v3363_v9, %v484_v38 }
 0x15d   :  { %v1659_v32 = vmul.f32 %v1635_v13, %v857_v4  ;;  %vm482_vm11 = vcmp.lt.s32.totalorder %v481_v31, 2  ;;  %v488_v8 = vsel %vm486_vm5, %v487_v55, %v3366_v0  ;;  %v584_v24 = vadd.s32 3, %v580_v59 }
 0x15e   :  { %v681_v6 = vsub.s32 4, %v3337_v42  ;;  %v774_v51 = vor.u32 %v773_v48, %v772_v22  ;;  %v777_v61 = vshll.u32 %v776_v57, 23  ;;  %vm479_vm6 = vweird.f32 %v2905_v37 }
 0x15f   :  { %1667 = vst.msk [vmem:[%s3651_s4 + $0x10] sm:$0xff] %vm1664_vm12, %v1659_v32  ;;  %v489_v16 = vsel %vm482_vm11, %v485_v3, %v488_v8  ;;  %vm701_vm13 = vcmp.lt.s32.totalorder %v3257_v10, 0  ;;  %2057 = vrcp.f32 %v3517_v14  ;;  %v585_v35 = vand.u32 3, %v584_v24  ;;  %v1640_v14 = vpop.permute.xlu1 %1639 }
 0x160   :  { %v490_v9 = vsel %vm479_vm6, nan, %v489_v16  ;;  %v682_v0 = vsel %vm597_vm4, %v681_v6, %v3337_v42  ;;  %v778_v5 = vor.u32 4788187, %v777_v61  ;;  %2059 = vrcp.f32 %v3480_v2 }
 0x161   :  { %v806_v17 = vmul.f32 0.6324555, %v490_v9  ;;  %v684_v34 = vsel %vm3408_vm0, 0, %v682_v0  ;;  %v3694_v37 = vand.u32 2147483647, %v3257_v10  ;;  %v692_v56 = vxor.u32 2147483648, %v2052_v54 }
 0x162   :  { %v688_v45 = vadd.s32 3, %v684_v34  ;;  %v695_v36 = vxor.u32 2147483648, %v3526_v41  ;;  %v2054_v26 = vpop.eup %2053  ;;  %v779_v42 = vand.u32 2147483647, %v778_v5  ;;  %v781_v7 = vcvt.s32.f32 %v774_v51 }
 0x163   :  { %vm3607_vm2 = vcmp.le.f32.partialorder %v3694_v37, 0.7853982  ;;  %v859_v2 = vmul.f32 %v3515_v18, %v806_v17  ;;  %vm586_vm4 = vcmp.lt.s32.totalorder %v585_v35, 2  ;;  %v2056_v40 = vpop.eup %2055  ;;  %vm587_vm15 = vcmp.eq.s32.totalorder %v585_v35, 0  ;;  %v1650_v63 = vpop.permute.xlu1 %1649 }
 0x164   :  { %vm590_vm0 = vcmp.eq.s32.totalorder %v585_v35, 2  ;;  %v591_v44 = vxor.u32 2147483648, %v2054_v26  ;;  %v689_v27 = vand.u32 3, %v688_v45  ;;  %v782_v1 = vmul.f32 %v781_v7, %v779_v42 }
 0x165   :  { %v1660_v47 = vmul.f32 %v1640_v14, %v859_v2  ;;  %v588_v21 = vxor.u32 2147483648, %v2056_v40  ;;  %v785_v62 = vsub.s32 4, %v3484_v53  ;;  %vm583_vm8 = vweird.f32 %v3239_v46 }
 0x166   :  { %v592_v30 = vsel %vm590_vm0, %v591_v44, %v2056_v40  ;;  %vm690_vm3 = vcmp.lt.s32.totalorder %v689_v27, 2  ;;  %vm691_vm9 = vcmp.eq.s32.totalorder %v689_v27, 0  ;;  %vm694_vm14 = vcmp.eq.s32.totalorder %v689_v27, 2 }
 0x167   :  { %v783_v58 = vxor.u32 2147483648, %v782_v1  ;;  %1668 = vst.msk [vmem:[%s3651_s4 + $0x18] sm:$0xff] %vm1664_vm12, %v1660_v47  ;;  %v589_v18 = vsel %vm587_vm15, %v2054_v26, %v588_v21  ;;  %v693_v38 = vsel %vm691_vm9, %v3526_v41, %v692_v56  ;;  %v696_v60 = vsel %vm694_vm14, %v695_v36, %v2052_v54 }
 0x168   :  { %v593_v33 = vsel %vm586_vm4, %v589_v18, %v592_v30  ;;  %vm687_vm10 = vweird.f32 %v3072_v39  ;;  %v697_v15 = vsel %vm690_vm3, %v693_v38, %v696_v60  ;;  %v786_v52 = vsel %vm701_vm13, %v785_v62, %v3484_v53  ;;  %v1645_v39 = vpop.permute.xlu0 %1644 }
 0x169   :  { %v784_v43 = vsel %vm701_vm13, %v783_v58, %v782_v1  ;;  %v594_v23 = vsel %vm583_vm8, nan, %v593_v33  ;;  %v698_v20 = vsel %vm687_vm10, nan, %v697_v15  ;;  %v2058_v49 = vpop.eup %2057  ;;  %v788_v12 = vsel %vm3607_vm2, 0, %v786_v52 }
 0x16a   :  { %v787_v41 = vsel %vm3607_vm2, %v3257_v10, %v784_v43  ;;  %v807_v46 = vmul.f32 0.6324555, %v594_v23  ;;  %v808_v25 = vmul.f32 0.6324555, %v698_v20  ;;  %v2060_v55 = vpop.eup %2059  ;;  %v792_v53 = vadd.s32 3, %v788_v12 }
 0x16b   :  { %2061 = vcosq.f32 %v787_v41  ;;  %vm791_vm11 = vweird.f32 %v3257_v10 }
 0x16c   :  { %2063 = vsinq.f32 %v787_v41  ;;  %v861_v13 = vmul.f32 %v2058_v49, %v807_v46  ;;  %v863_v31 = vmul.f32 %v2060_v55, %v808_v25  ;;  %v793_v29 = vand.u32 3, %v792_v53  ;;  %v1655_v6 = vpop.permute.xlu0 %1654 }
 0x16d   :  { %2065 = vrcp.f32 %v3545_v28 }
 0x16e   :  { %v1661_v50 = vmul.f32 %v1645_v39, %v861_v13  ;;  %v1662_v11 = vmul.f32 %v1650_v63, %v863_v31  ;;  %vm798_vm7 = vcmp.eq.s32.totalorder %v793_v29, 2  ;;  %vm795_vm1 = vcmp.eq.s32.totalorder %v793_v29, 0 }
 0x16f   :  { %vm794_vm5 = vcmp.lt.s32.totalorder %v793_v29, 2 }
 0x170   :  { %1669 = vst.msk [vmem:[%s3651_s4 + $0x20] sm:$0xff] %vm1664_vm12, %v1661_v50  ;;  %1670 = vst.msk [vmem:[%s3651_s4 + $0x28] sm:$0xff] %vm1664_vm12, %v1662_v11 }
 0x175   :  { %v2062_v4 = vpop.eup %2061 }
 0x176   :  { %v2064_v22 = vpop.eup %2063  ;;  %v799_v59 = vxor.u32 2147483648, %v2062_v4 }
 0x177   :  { %v796_v54 = vxor.u32 2147483648, %v2064_v22  ;;  %v2066_v24 = vpop.eup %2065 }
 0x178   :  { %v800_v48 = vsel %vm798_vm7, %v799_v59, %v2064_v22 }
 0x179   :  { %v797_v57 = vsel %vm795_vm1, %v2062_v4, %v796_v54 }
 0x17a   :  { %v801_v32 = vsel %vm794_vm5, %v797_v57, %v800_v48 }
 0x17b   :  { %v802_v3 = vsel %vm791_vm11, nan, %v801_v32 }
 0x17c   :  { %v809_v8 = vmul.f32 0.6324555, %v802_v3 }
 0x17e   :  { %v865_v51 = vmul.f32 %v2066_v24, %v809_v8 }
 0x180   :  { %v1663_v61 = vmul.f32 %v1655_v6, %v865_v51 }
 0x182   :  { %1671 = vst.msk [vmem:[%s3651_s4 + $0x30] sm:$0xff] %vm1664_vm12, %v1663_v61 }

// kernel: savenet_forward.8
= control target key start
LH: loop header
LB: loop body
LE: loop exit
PB: predicated region body
PF: predicated region fallthrough
CT: control target
= control target key end

     0   :  { %v676_v0 = vmov 0.0|0.0   ;;  %vm677_vm0 = vmmov 0   ;;  %v678_v4 = vmov 0.0   ;;  %vm62_vm1 = vcmask 1043456   ;;  %s679_s11 = smov 64   ;;  %s680_s7 = smov 32   ;;  %s1104_s4 = inlined_call_operand.vmem [shape: f32[20,96], index: 4, kind: input, shape index: {}]   ;;  %s1105_s2 = inlined_call_operand.vmem [shape: f32[56,192], index: 2, kind: input, shape index: {}]   ;;  %s1106_s0 = inlined_call_operand.vmem [shape: f32[56,20], index: 0, kind: input, shape index: {}]   ;;  %s1107_s1 = inlined_call_operand.vmem [shape: f32[56,96], index: 1, kind: input, shape index: {}]   ;;  %s1108_s5 = inlined_call_operand.vmem [shape: f32[1,96], index: 5, kind: input, shape index: {}]   ;;  %s1109_s3 = inlined_call_operand.vmem [shape: f32[56,1], index: 3, kind: input, shape index: {}]   ;;  %s1110_s6 = inlined_call_operand.vmem [shape: f32[56,128], index: 6, kind: output, shape index: {}]  }
   0x1   :  { %660 = vmatprep.subr.bf16.mxu0 %v676_v0  ;;  %663 = vmatprep.subr.bf16.mxu1 %v676_v0  ;;  %v30_v1 = vld [vmem:[%s1104_s4] sm:$0xff]  ;;  %v31_v2 = vld [vmem:[%s1104_s4 + $0x8] sm:$0xff]  ;;  %v32_v6 = vld [vmem:[%s1104_s4 + $0x10] sm:$0xf]  ;;  %vm40_vm2 = vcmask 162816   ;;  %s681_s23 = smov 96  }
   0x2   :  { %v661_v3 = vpack.c.bf16 %v31_v2, %v30_v1  ;;  %639 = vmatprep.mubr.msk.f32.mxu0 %vm677_vm0, %v678_v4  ;;  %651 = vmatprep.mubr.msk.f32.mxu1 %vm677_vm0, %v678_v4  ;;  %v167_v5 = vld [vmem:[%s1105_s2 + $0x8] sm:$0xff]  ;;  %v23_v8 = vld [vmem:[%s1106_s0] sm:$0xff]  ;;  %v169_v10 = vld [vmem:[%s1105_s2 + $0x18] sm:$0xff]  ;;  %v682_v34 = vmov 0   ;;  %vm530_vm3 = vcmask 261120   ;;  %vm538_vm4 = vcmask 523264  }
   0x3   :  { %v171_v7 = vld [vmem:[%s1105_s2 + $0x28] sm:$0xff]  ;;  %v27_v9 = vld [vmem:[%s1106_s0 + $0x20] sm:$0xff]  ;;  %320 = vrot.lane.b32.xlu0 %v167_v5, %s679_s11  ;;  %v173_v11 = vld [vmem:[%s1105_s2 + $0x38] sm:$0xff]  ;;  %674 = vset.pattern.permute.xlu1 %v682_v34  ;;  %vm546_vm5 = vcmask 785408  }
   0x4   :  { %662 = vmatpush3.bf16.msra.mxu0 %v661_v3  ;;  %665 = vmatpush3.bf16.msra.mxu1 %v661_v3  ;;  %v24_v12 = vld [vmem:[%s1106_s0 + $0x8] sm:$0xff]  ;;  %v177_v15 = vld [vmem:[%s1105_s2 + $0x58] sm:$0xff]  ;;  %v25_v16 = vld [vmem:[%s1106_s0 + $0x10] sm:$0xff] }
   0x5   :  { %637 = vmatprep.subr.mxu0 %v678_v4  ;;  %664 = vmatprep.subr.mxu1 %v678_v4  ;;  %v28_v13 = vld [vmem:[%s1106_s0 + $0x28] sm:$0xff]  ;;  %v29_v17 = vld [vmem:[%s1106_s0 + $0x30] sm:$0xff]  ;;  %v26_v19 = vld [vmem:[%s1106_s0 + $0x18] sm:$0xff] }
   0x6   :  { %324 = vrot.lane.b32.xlu1 %v171_v7, %s679_s11  ;;  %v175_v14 = vld [vmem:[%s1105_s2 + $0x48] sm:$0xff]  ;;  %v800_v20 = vld [vmem:[%s1107_s1] sm:$0xff]  ;;  %v814_v22 = vld [vmem:[%s1107_s1 + $0x10] sm:$0xff]  ;;  %675 = vset.pattern.permute.xlu0 %v682_v34 }
   0x7   :  { %322 = vrot.lane.b32.xlu0 %v169_v10, %s679_s11  ;;  %v179_v18 = vld [vmem:[%s1105_s2 + $0x68] sm:$0xff]  ;;  %v819_v23 = vld [vmem:[%s1107_s1 + $0x18] sm:$0xff]  ;;  %v828_v24 = vld [vmem:[%s1107_s1 + $0x20] sm:$0xff] }
   0x8   :  { %638 = vmatpush3.msk.msra.mxu0 %vm62_vm1, %v32_v6  ;;  %666 = vmatpush3.msk.msra.mxu1 %vm62_vm1, %v32_v6  ;;  %v805_v21 = vld [vmem:[%s1107_s1 + $0x8] sm:$0xff]  ;;  %v842_v26 = vld [vmem:[%s1107_s1 + $0x30] sm:$0xff]  ;;  %v166_v27 = vld [vmem:[%s1105_s2] sm:$0xff] }
   0x9   :  { %640 = vmatmul.mubr.msk.f32.vlgmr.msra.gmra.mrb[0].mxu0 %vm40_vm2, %v23_v8  ;;  %652 = vmatmul.mubr.msk.f32.vlgmr.msra.gmra.mrb[0].mxu1 %vm40_vm2, %v27_v9  ;;  %v833_v25 = vld [vmem:[%s1107_s1 + $0x28] sm:$0xff]  ;;  %v168_v28 = vld [vmem:[%s1105_s2 + $0x10] sm:$0xff]  ;;  %v856_v29 = vld [vmem:[%s1105_s2 + $0x20] sm:$0xff] }
   0xa   :  { %642 = vmatprep.mubr.msk.f32.mxu0 %vm677_vm0, %v678_v4  ;;  %654 = vmatprep.mubr.msk.f32.mxu1 %vm677_vm0, %v678_v4  ;;  %v864_v30 = vld [vmem:[%s1105_s2 + $0x30] sm:$0xff]  ;;  %v174_v31 = vld [vmem:[%s1105_s2 + $0x40] sm:$0xff] }
   0xb   :  { %326 = vrot.lane.b32.xlu1 %v173_v11, %s679_s11  ;;  %328 = vrot.lane.b32.xlu0 %v175_v14, %s679_s11  ;;  %v176_v32 = vld [vmem:[%s1105_s2 + $0x50] sm:$0xff]  ;;  %v878_v33 = vld [vmem:[%s1105_s2 + $0x60] sm:$0xff] }
   0xc   :  { %v614_v46 = vld [vmem:[%s1108_s5] ss:$0 sm:$0xff] }
   0xd   :  { %643 = vmatmul.mubr.msk.f32.gmra.mrb[2].mxu0 %vm40_vm2, %v24_v12  ;;  %655 = vmatmul.mubr.msk.f32.gmra.mrb[2].mxu1 %vm40_vm2, %v28_v13 }
   0xe   :  { %645 = vmatprep.mubr.msk.f32.mxu0 %vm677_vm0, %v678_v4  ;;  %657 = vmatprep.mubr.msk.f32.mxu1 %vm677_vm0, %v678_v4 }
   0xf   :  { %330 = vrot.lane.b32.xlu1 %v177_v15, %s679_s11  ;;  %332 = vrot.lane.b32.xlu0 %v179_v18, %s679_s11 }
  0x11   :  { %646 = vmatmul.mubr.msk.f32.gmra.mrb[4].mxu0 %vm40_vm2, %v25_v16  ;;  %658 = vmatmul.mubr.msk.f32.gmra.mrb[4].mxu1 %vm40_vm2, %v29_v17 }
  0x12   :  { %648 = vmatprep.mubr.msk.f32.mxu0 %vm677_vm0, %v678_v4 }
  0x13   :  { %411 = vrot.lane.b32.xlu1 %v167_v5, %s680_s7  ;;  %413 = vrot.lane.b32.xlu0 %v169_v10, %s680_s7 }
  0x15   :  { %649 = vmatmul.mubr.msk.f32.gmra.mrb[6].mxu0 %vm40_vm2, %v26_v19 }
  0x17   :  { %415 = vrot.lane.b32.xlu1 %v171_v7, %s680_s7  ;;  %417 = vrot.lane.b32.xlu0 %v173_v11, %s680_s7 }
  0x1b   :  { %419 = vrot.lane.b32.xlu1 %v175_v14, %s680_s7  ;;  %421 = vrot.lane.b32.xlu0 %v177_v15, %s680_s7 }
  0x1f   :  { %423 = vrot.lane.b32.xlu1 %v179_v18, %s680_s7  ;;  %201 = vrot.lane.b32.xlu0 %v800_v20, %s680_s7 }
  0x23   :  { %203 = vrot.lane.b32.xlu1 %v805_v21, %s680_s7  ;;  %205 = vrot.lane.b32.xlu0 %v814_v22, %s680_s7 }
  0x27   :  { %207 = vrot.lane.b32.xlu1 %v819_v23, %s680_s7  ;;  %209 = vrot.lane.b32.xlu0 %v828_v24, %s680_s7 }
  0x2b   :  { %211 = vrot.lane.b32.xlu1 %v833_v25, %s680_s7  ;;  %213 = vrot.lane.b32.xlu0 %v842_v26, %s680_s7 }
  0x2f   :  { %243 = vrot.lane.b32.xlu1 %v166_v27, %s681_s23  ;;  %245 = vrot.lane.b32.xlu0 %v168_v28, %s681_s23 }
  0x33   :  { %247 = vrot.lane.b32.xlu1 %v856_v29, %s681_s23  ;;  %249 = vrot.lane.b32.xlu0 %v864_v30, %s681_s23 }
  0x37   :  { %251 = vrot.lane.b32.xlu1 %v174_v31, %s681_s23  ;;  %253 = vrot.lane.b32.xlu0 %v176_v32, %s681_s23 }
  0x3b   :  { %255 = vrot.lane.b32.xlu1 %v878_v33, %s681_s23  ;;  %383 = vrot.lane.b32.xlu0 %v800_v20, %s681_s23 }
  0x3f   :  { %385 = vrot.lane.b32.xlu1 %v805_v21, %s681_s23  ;;  %387 = vrot.lane.b32.xlu0 %v814_v22, %s681_s23 }
  0x43   :  { %389 = vrot.lane.b32.xlu1 %v819_v23, %s681_s23  ;;  %391 = vrot.lane.b32.xlu0 %v828_v24, %s681_s23 }
  0x47   :  { %393 = vrot.lane.b32.xlu1 %v833_v25, %s681_s23  ;;  %395 = vrot.lane.b32.xlu0 %v842_v26, %s681_s23 }
  0x75   :  { %v321_v35 = vpop.permute.xlu0 %320 }
  0x78   :  { %v897_v37 = vpop.permute.xlu1 %324 }
  0x79   :  { %v323_v36 = vpop.permute.xlu0 %322 }
  0x7d   :  { %v329_v38 = vpop.permute.xlu0 %328  ;;  %v899_v39 = vpop.permute.xlu1 %326 }
  0x81   :  { %v901_v40 = vpop.permute.xlu0 %332  ;;  %v331_v41 = vpop.permute.xlu1 %330 }
  0x85   :  { %v414_v42 = vpop.permute.xlu0 %413  ;;  %v412_v43 = vpop.permute.xlu1 %411 }
  0x89   :  { %v903_v44 = vpop.permute.xlu0 %417  ;;  %v416_v45 = vpop.permute.xlu1 %415 }
  0x8d   :  { %v422_v53 = vpop.permute.xlu0 %421  ;;  %v420_v54 = vpop.permute.xlu1 %419 }
  0x91   :  { %v921_v9 = vpop.permute.xlu0 %201  ;;  %v424_v10 = vpop.permute.xlu1 %423 }
  0x95   :  { %v935_v34 = vpop.permute.xlu1 %203 }
  0xdc   :  { %v132_v47 = vpop.f32.mrb[0].mxu0  ;;  %v152_v48 = vpop.f32.mrb[0].mxu1 }
  0xdd   :  { %v133_v49 = vadd.f32 %v614_v46, %v132_v47  ;;  %v153_v50 = vadd.f32 %v614_v46, %v152_v48  ;;  %v641_v51 = vpop.f32.mrb[1].mxu0  ;;  %v653_v52 = vpop.f32.mrb[1].mxu1 }
  0xdf   :  { %v908_v55 = vmul.f32 %v166_v27, %v133_v49  ;;  %v910_v56 = vmul.f32 %v174_v31, %v153_v50 }
  0xe0   :  { %v137_v57 = vpop.f32.mrb[2].mxu0  ;;  %v157_v58 = vpop.f32.mrb[2].mxu1 }
  0xe1   :  { %v138_v59 = vadd.f32 %v614_v46, %v137_v57  ;;  %v644_v60 = vpop.f32.mrb[3].mxu0  ;;  %v656_v61 = vpop.f32.mrb[3].mxu1  ;;  %v229_v62 = vmul.f32 0.57735026, %v908_v55  ;;  %v158_v63 = vadd.f32 %v614_v46, %v157_v58  ;;  %v916_v3 = vmul.f32 0.57735026, %v910_v56 }
  0xe2   :  { %v556_v57 = vld [vmem:[%s1109_s3 + $0x10] sm:$0xff]  ;;  %v558_v58 = vld [vmem:[%s1109_s3 + $0x20] sm:$0xff]  ;;  %v557_v60 = vld [vmem:[%s1109_s3 + $0x18] sm:$0xff] }
  0xe3   :  { %v913_v0 = vmul.f32 %v168_v28, %v138_v59  ;;  %v432_v1 = vmul.f32 %v412_v43, %v229_v62  ;;  %v341_v2 = vmul.f32 %v321_v35, %v229_v62  ;;  %v436_v7 = vmul.f32 %v420_v54, %v916_v3  ;;  %v560_v61 = vld [vmem:[%s1109_s3 + $0x30] sm:$0xff] }
  0xe4   :  { %v142_v4 = vpop.f32.mrb[4].mxu0  ;;  %v162_v5 = vpop.f32.mrb[4].mxu1  ;;  %v923_v11 = vmul.f32 %v176_v32, %v158_v63  ;;  %v345_v13 = vmul.f32 %v329_v38, %v916_v3 }
  0xe5   :  { %446 = vrot.lane.b32.xlu0 %v432_v1, %s681_s23  ;;  %355 = vrot.lane.b32.xlu1 %v341_v2, %s681_s23  ;;  %v647_v6 = vpop.f32.mrb[5].mxu0  ;;  %v659_v8 = vpop.f32.mrb[5].mxu1  ;;  %v143_v12 = vadd.f32 %v614_v46, %v142_v4  ;;  %v230_v14 = vmul.f32 0.57735026, %v913_v0  ;;  %v163_v17 = vadd.f32 %v614_v46, %v162_v5  ;;  %v559_v1 = vld [vmem:[%s1109_s3 + $0x28] sm:$0xff] }
  0xe6   :  { %v234_v18 = vmul.f32 0.57735026, %v923_v11  ;;  %v933_v32 = vpop.permute.xlu0 %205 }
  0xe7   :  { %v931_v19 = vmul.f32 %v856_v29, %v143_v12  ;;  %v433_v28 = vmul.f32 %v414_v42, %v230_v14  ;;  %v342_v31 = vmul.f32 %v323_v36, %v230_v14  ;;  %v940_v38 = vmul.f32 %v878_v33, %v163_v17  ;;  %v950_v42 = vpop.permute.xlu1 %207 }
  0xe8   :  { %v147_v15 = vpop.f32.mrb[6].mxu0  ;;  %v437_v35 = vmul.f32 %v422_v53, %v234_v18  ;;  %v346_v29 = vmul.f32 %v331_v41, %v234_v18 }
  0xe9   :  { %454 = vrot.lane.b32.xlu0 %v436_v7, %s681_s23  ;;  %363 = vrot.lane.b32.xlu1 %v345_v13, %s681_s23  ;;  %v650_v16 = vpop.f32.mrb[7].mxu0  ;;  %v148_v27 = vadd.f32 %v614_v46, %v147_v15  ;;  %v231_v46 = vmul.f32 0.57735026, %v931_v19  ;;  %v235_v33 = vmul.f32 0.57735026, %v940_v38 }
  0xea   :  { %v948_v36 = vpop.permute.xlu0 %209 }
  0xeb   :  { %v943_v43 = vmul.f32 %v864_v30, %v148_v27  ;;  %v434_v47 = vmul.f32 %v416_v45, %v231_v46  ;;  %v343_v48 = vmul.f32 %v897_v37, %v231_v46  ;;  %v347_v30 = vmul.f32 %v901_v40, %v235_v33  ;;  %v961_v51 = vpop.permute.xlu1 %211 }
  0xec   :  { %v438_v45 = vmul.f32 %v424_v10, %v235_v33 }
  0xed   :  { %448 = vrot.lane.b32.xlu1 %v433_v28, %s681_s23  ;;  %357 = vrot.lane.b32.xlu0 %v342_v31, %s681_s23  ;;  %v232_v49 = vmul.f32 0.57735026, %v943_v43  ;;  %v306_v28 = vmul.f32 %v800_v20, %v908_v55  ;;  %v307_v20 = vmul.f32 %v805_v21, %v913_v0  ;;  %v308_v21 = vmul.f32 %v814_v22, %v931_v19 }
  0xee   :  { %v959_v50 = vpop.permute.xlu0 %213 }
  0xef   :  { %v344_v41 = vmul.f32 %v899_v39, %v232_v49  ;;  %v435_v37 = vmul.f32 %v903_v44, %v232_v49  ;;  %v244_v53 = vpop.permute.xlu1 %243  ;;  %v554_v39 = vld [vmem:[%s1109_s3] sm:$0xff]  ;;  %v555_v44 = vld [vmem:[%s1109_s3 + $0x8] sm:$0xff] }
  0xf0   :  { %v264_v40 = vmul.f32 %v244_v53, %v229_v62 }
  0xf1   :  { %456 = vrot.lane.b32.xlu1 %v437_v35, %s681_s23  ;;  %365 = vrot.lane.b32.xlu0 %v346_v29, %s681_s23 }
  0xf2   :  { %v246_v52 = vpop.permute.xlu0 %245 }
  0xf3   :  { %v265_v54 = vmul.f32 %v246_v52, %v230_v14  ;;  %v248_v62 = vpop.permute.xlu1 %247 }
  0xf4   :  { %v266_v4 = vmul.f32 %v248_v62, %v231_v46 }
  0xf5   :  { %450 = vrot.lane.b32.xlu0 %v434_v47, %s681_s23  ;;  %359 = vrot.lane.b32.xlu1 %v343_v48, %s681_s23  ;;  %v310_v47 = vmul.f32 %v828_v24, %v910_v56  ;;  %v311_v24 = vmul.f32 %v833_v25, %v923_v11  ;;  %v312_v25 = vmul.f32 %v842_v26, %v940_v38 }
  0xf6   :  { %v250_v59 = vpop.permute.xlu0 %249 }
  0xf7   :  { %v267_v5 = vmul.f32 %v250_v59, %v232_v49  ;;  %v252_v6 = vpop.permute.xlu1 %251 }
  0xf8   :  { %v268_v7 = vmul.f32 %v252_v6, %v916_v3 }
  0xf9   :  { %367 = vrot.lane.b32.xlu1 %v347_v30, %s681_s23  ;;  %361 = vrot.lane.b32.xlu0 %v344_v41, %s681_s23 }
  0xfa   :  { %v254_v63 = vpop.permute.xlu0 %253 }
  0xfb   :  { %v269_v2 = vmul.f32 %v254_v63, %v234_v18  ;;  %v256_v8 = vpop.permute.xlu1 %255 }
  0xfc   :  { %v270_v10 = vmul.f32 %v256_v8, %v235_v33 }
  0xfd   :  { %452 = vrot.lane.b32.xlu1 %v435_v37, %s681_s23  ;;  %458 = vrot.lane.b32.xlu0 %v438_v45, %s681_s23 }
  0xfe   :  { %v384_v12 = vpop.permute.xlu0 %383 }
  0xff   :  { %v386_v13 = vpop.permute.xlu1 %385  ;;  %v404_v27 = vmul.f32 %v384_v12, %v908_v55 }
 0x100   :  { %v405_v41 = vmul.f32 %v386_v13, %v913_v0 }
 0x101   :  { %278 = vrot.lane.b32.xlu1 %v264_v40, %s681_s23  ;;  %280 = vrot.lane.b32.xlu0 %v265_v54, %s681_s23 }
 0x102   :  { %v388_v14 = vpop.permute.xlu0 %387 }
 0x103   :  { %v390_v15 = vpop.permute.xlu1 %389 }
 0x105   :  { %563 = vperm.xlu1 %674, %v554_v39   ;;  %568 = vperm.xlu0 %675, %v555_v44   ;;  %v406_v44 = vmul.f32 %v388_v14, %v931_v19 }
 0x106   :  { %v392_v16 = vpop.permute.xlu0 %391 }
 0x107   :  { %v394_v17 = vpop.permute.xlu1 %393  ;;  %v408_v46 = vmul.f32 %v392_v16, %v910_v56 }
 0x108   :  { %v409_v26 = vmul.f32 %v394_v17, %v923_v11 }
 0x109   :  { %573 = vperm.xlu1 %674, %v556_v57   ;;  %583 = vperm.xlu0 %675, %v558_v58  }
 0x10a   :  { %v396_v18 = vpop.permute.xlu0 %395 }
 0x10b   :  { %v410_v22 = vmul.f32 %v396_v18, %v940_v38 }
 0x10d   :  { %578 = vperm.xlu1 %674, %v557_v60   ;;  %593 = vperm.xlu0 %675, %v560_v61   ;;  %v309_v61 = vmul.f32 %v819_v23, %v943_v43 }
 0x111   :  { %588 = vperm.xlu1 %674, %v559_v1   ;;  %288 = vrot.lane.b32.xlu0 %v269_v2, %s681_s23 }
 0x115   :  { %282 = vrot.lane.b32.xlu1 %v266_v4, %s681_s23  ;;  %284 = vrot.lane.b32.xlu0 %v267_v5, %s681_s23  ;;  %v407_v4 = vmul.f32 %v390_v15, %v943_v43 }
 0x119   :  { %286 = vrot.lane.b32.xlu1 %v268_v7, %s681_s23 }
 0x11d   :  { %290 = vrot.lane.b32.xlu1 %v270_v10, %s681_s23 }
 0x157   :  { %v447_v31 = vpop.permute.xlu0 %446  ;;  %v356_v3 = vpop.permute.xlu1 %355 }
 0x158   :  { %v467_v35 = vadd.f32 %v447_v31, %v404_v27  ;;  %v376_v29 = vadd.f32 %v356_v3, %v306_v28 }
 0x15a   :  { %509 = vrot.lane.b32.xlu1 %v467_v35, %s679_s11  ;;  %481 = vrot.lane.b32.xlu0 %v376_v29, %s680_s7  ;;  %v222_v35 = vmul.f32 %v921_v9, %v908_v55  ;;  %v223_v9 = vmul.f32 %v935_v34, %v913_v0 }
 0x15b   :  { %v455_v48 = vpop.permute.xlu0 %454  ;;  %v364_v33 = vpop.permute.xlu1 %363 }
 0x15c   :  { %v471_v49 = vadd.f32 %v455_v48, %v408_v46  ;;  %v380_v30 = vadd.f32 %v364_v33, %v310_v47  ;;  %v226_v48 = vmul.f32 %v948_v36, %v910_v56 }
 0x15e   :  { %517 = vrot.lane.b32.xlu1 %v471_v49, %s679_s11  ;;  %489 = vrot.lane.b32.xlu0 %v380_v30, %s680_s7 }
 0x15f   :  { %v449_v37 = vpop.permute.xlu1 %448  ;;  %v358_v45 = vpop.permute.xlu0 %357 }
 0x160   :  { %v468_v52 = vadd.f32 %v449_v37, %v405_v41  ;;  %v377_v53 = vadd.f32 %v358_v45, %v307_v20 }
 0x162   :  { %483 = vrot.lane.b32.xlu1 %v377_v53, %s680_s7  ;;  %511 = vrot.lane.b32.xlu0 %v468_v52, %s679_s11 }
 0x163   :  { %v457_v40 = vpop.permute.xlu1 %456  ;;  %v366_v54 = vpop.permute.xlu0 %365 }
 0x164   :  { %v381_v39 = vadd.f32 %v366_v54, %v311_v24  ;;  %v472_v23 = vadd.f32 %v457_v40, %v409_v26 }
 0x166   :  { %491 = vrot.lane.b32.xlu1 %v381_v39, %s680_s7 }
 0x167   :  { %v451_v57 = vpop.permute.xlu0 %450  ;;  %v360_v58 = vpop.permute.xlu1 %359 }
 0x168   :  { %v469_v59 = vadd.f32 %v451_v57, %v406_v44  ;;  %v378_v60 = vadd.f32 %v360_v58, %v308_v21  ;;  %v224_v21 = vmul.f32 %v933_v32, %v931_v19  ;;  %v228_v32 = vmul.f32 %v959_v50, %v940_v38 }
 0x16a   :  { %513 = vrot.lane.b32.xlu1 %v469_v59, %s679_s11  ;;  %485 = vrot.lane.b32.xlu0 %v378_v60, %s680_s7 }
 0x16b   :  { %v368_v62 = vpop.permute.xlu1 %367  ;;  %v362_v63 = vpop.permute.xlu0 %361 }
 0x16c   :  { %v382_v1 = vadd.f32 %v368_v62, %v312_v25  ;;  %v379_v2 = vadd.f32 %v362_v63, %v309_v61  ;;  %v225_v62 = vmul.f32 %v950_v42, %v943_v43 }
 0x16e   :  { %487 = vrot.lane.b32.xlu1 %v379_v2, %s680_s7  ;;  %493 = vrot.lane.b32.xlu0 %v382_v1, %s680_s7 }
 0x16f   :  { %v453_v5 = vpop.permute.xlu1 %452  ;;  %v459_v6 = vpop.permute.xlu0 %458 }
 0x170   :  { %v470_v7 = vadd.f32 %v453_v5, %v407_v4  ;;  %v473_v8 = vadd.f32 %v459_v6, %v410_v22 }
 0x172   :  { %521 = vrot.lane.b32.xlu1 %v473_v8, %s679_s11  ;;  %515 = vrot.lane.b32.xlu0 %v470_v7, %s679_s11  ;;  %v227_v7 = vmul.f32 %v961_v51, %v923_v11 }
 0x173   :  { %v279_v10 = vpop.permute.xlu1 %278  ;;  %v281_v14 = vpop.permute.xlu0 %280 }
 0x174   :  { %v299_v29 = vadd.f32 %v279_v10, %v222_v35  ;;  %v300_v52 = vadd.f32 %v281_v14, %v223_v9 }
 0x176   :  { %519 = vrot.lane.b32.xlu0 %v472_v23, %s679_s11  ;;  %v531_v30 = vsel %vm530_vm3, %v908_v55, %v299_v29  ;;  %v532_v34 = vsel %vm530_vm3, %v913_v0, %v300_v52 }
 0x184   :  { %v564_v12 = vpop.permute.xlu1 %563  ;;  %v569_v16 = vpop.permute.xlu0 %568 }
 0x188   :  { %v574_v13 = vpop.permute.xlu1 %573  ;;  %v584_v15 = vpop.permute.xlu0 %583 }
 0x18c   :  { %v1032_v18 = vpop.permute.xlu1 %578  ;;  %v1036_v28 = vpop.permute.xlu0 %593 }
 0x190   :  { %v1034_v27 = vpop.permute.xlu1 %588  ;;  %v289_v31 = vpop.permute.xlu0 %288 }
 0x194   :  { %v283_v17 = vpop.permute.xlu1 %282  ;;  %v285_v46 = vpop.permute.xlu0 %284 }
 0x195   :  { %v301_v59 = vadd.f32 %v283_v17, %v224_v21  ;;  %v302_v2 = vadd.f32 %v285_v46, %v225_v62 }
 0x197   :  { %v533_v25 = vsel %vm530_vm3, %v931_v19, %v301_v59  ;;  %v304_v19 = vadd.f32 %v289_v31, %v227_v7  ;;  %v534_v42 = vsel %vm530_vm3, %v943_v43, %v302_v2 }
 0x198   :  { %v287_v3 = vpop.permute.xlu1 %286 }
 0x199   :  { %v303_v33 = vadd.f32 %v287_v3, %v226_v48  ;;  %v536_v43 = vsel %vm530_vm3, %v923_v11, %v304_v19 }
 0x19b   :  { %v535_v36 = vsel %vm530_vm3, %v910_v56, %v303_v33 }
 0x19c   :  { %v291_v47 = vpop.permute.xlu1 %290 }
 0x19d   :  { %v305_v22 = vadd.f32 %v291_v47, %v228_v32 }
 0x19f   :  { %v537_v50 = vsel %vm530_vm3, %v940_v38, %v305_v22 }
 0x1cc   :  { %v510_v49 = vpop.permute.xlu1 %509  ;;  %v482_v41 = vpop.permute.xlu0 %481 }
 0x1cd   :  { %v539_v20 = vsel %vm538_vm4, %v531_v30, %v482_v41 }
 0x1ce   :  { %v547_v37 = vsel %vm546_vm5, %v539_v20, %v510_v49 }
 0x1cf   :  { %v596_v45 = vmul.f32 %v564_v12, %v547_v37 }
 0x1d0   :  { %v518_v53 = vpop.permute.xlu1 %517  ;;  %v490_v24 = vpop.permute.xlu0 %489 }
 0x1d1   :  { %603 = vst [vmem:[%s1110_s6] sm:$0xff] %v596_v45  ;;  %v543_v55 = vsel %vm538_vm4, %v535_v36, %v490_v24 }
 0x1d2   :  { %v551_v40 = vsel %vm546_vm5, %v543_v55, %v518_v53 }
 0x1d3   :  { %v600_v54 = vmul.f32 %v584_v15, %v551_v40 }
 0x1d4   :  { %v484_v39 = vpop.permute.xlu1 %483  ;;  %v512_v44 = vpop.permute.xlu0 %511 }
 0x1d5   :  { %607 = vst [vmem:[%s1110_s6 + $0x20] sm:$0xff] %v600_v54  ;;  %v540_v56 = vsel %vm538_vm4, %v532_v34, %v484_v39 }
 0x1d6   :  { %v548_v57 = vsel %vm546_vm5, %v540_v56, %v512_v44 }
 0x1d7   :  { %v597_v58 = vmul.f32 %v569_v16, %v548_v57 }
 0x1d8   :  { %v492_v60 = vpop.permute.xlu1 %491 }
 0x1d9   :  { %604 = vst [vmem:[%s1110_s6 + $0x8] sm:$0xff] %v597_v58  ;;  %v544_v16 = vsel %vm538_vm4, %v536_v43, %v492_v60 }
 0x1dc   :  { %v514_v0 = vpop.permute.xlu1 %513  ;;  %v486_v61 = vpop.permute.xlu0 %485 }
 0x1dd   :  { %v541_v63 = vsel %vm538_vm4, %v533_v25, %v486_v61 }
 0x1de   :  { %v549_v1 = vsel %vm546_vm5, %v541_v63, %v514_v0 }
 0x1df   :  { %v598_v4 = vmul.f32 %v574_v13, %v549_v1 }
 0x1e0   :  { %v488_v5 = vpop.permute.xlu1 %487  ;;  %v494_v6 = vpop.permute.xlu0 %493 }
 0x1e1   :  { %605 = vst [vmem:[%s1110_s6 + $0x10] sm:$0xff] %v598_v4  ;;  %v542_v8 = vsel %vm538_vm4, %v534_v42, %v488_v5  ;;  %v545_v26 = vsel %vm538_vm4, %v537_v50, %v494_v6 }
 0x1e4   :  { %v522_v23 = vpop.permute.xlu1 %521  ;;  %v516_v10 = vpop.permute.xlu0 %515 }
 0x1e5   :  { %v553_v12 = vsel %vm546_vm5, %v545_v26, %v522_v23  ;;  %v550_v51 = vsel %vm546_vm5, %v542_v8, %v516_v10 }
 0x1e6   :  { %v602_v13 = vmul.f32 %v1036_v28, %v553_v12  ;;  %v599_v14 = vmul.f32 %v1032_v18, %v550_v51 }
 0x1e8   :  { %609 = vst [vmem:[%s1110_s6 + $0x30] sm:$0xff] %v602_v13  ;;  %606 = vst [vmem:[%s1110_s6 + $0x18] sm:$0xff] %v599_v14  ;;  %v520_v38 = vpop.permute.xlu0 %519 }
 0x1e9   :  { %v552_v15 = vsel %vm546_vm5, %v544_v16, %v520_v38 }
 0x1ea   :  { %v601_v28 = vmul.f32 %v1034_v27, %v552_v15 }
 0x1ec   :  { %608 = vst [vmem:[%s1110_s6 + $0x28] sm:$0xff] %v601_v28 }

// kernel: savenet_forward.11
= control target key start
LH: loop header
LB: loop body
LE: loop exit
PB: predicated region body
PF: predicated region fallthrough
CT: control target
= control target key end

     0   :  { %v900_v2 = vmov 0.0|0.0   ;;  %vm901_vm0 = vmmov 0   ;;  %v902_v8 = vmov 0.0   ;;  %s903_s18 = smov 96   ;;  %s904_s19 = smov 32   ;;  %vm55_vm1 = vcmask 261120   ;;  %s1141_s0 = inlined_call_operand.vmem [shape: f32[8,128], index: 0, kind: input, shape index: {}, may-alias: {0,12}]   ;;  %s1142_s1 = inlined_call_operand.vmem [shape: f32[8,128], index: 1, kind: input, shape index: {}]   ;;  %s1143_s2 = inlined_call_operand.vmem [shape: f32[32,32], index: 2, kind: input, shape index: {}]   ;;  %s1144_s3 = inlined_call_operand.vmem [shape: f32[64,32], index: 3, kind: input, shape index: {}]   ;;  %s1145_s7 = inlined_call_operand.vmem [shape: f32[1,32], index: 7, kind: input, shape index: {}]   ;;  %s1146_s5 = inlined_call_operand.vmem [shape: f32[32,64], index: 5, kind: input, shape index: {}]   ;;  %s1147_s4 = inlined_call_operand.vmem [shape: f32[1,32], index: 4, kind: input, shape index: {}]   ;;  %s1148_s8 = inlined_call_operand.vmem [shape: f32[32,16], index: 8, kind: input, shape index: {}]   ;;  %s1149_s6 = inlined_call_operand.vmem [shape: f32[1,64], index: 6, kind: input, shape index: {}]   ;;  %s1150_s10 = inlined_call_operand.vmem [shape: f32[16,1], index: 10, kind: input, shape index: {}]   ;;  %s1151_s11 = inlined_call_operand.<no memory space> [shape: f32[1,1], index: 11, kind: input, shape index: {}]   ;;  %s1152_s9 = inlined_call_operand.vmem [shape: f32[1,16], index: 9, kind: input, shape index: {}]   ;;  %s1153_s12 = inlined_call_operand.vmem [shape: f32[8,128], index: 12, kind: output, shape index: {0}, may-alias: {0,12}]   ;;  %s1154_s13 = inlined_call_operand.vmem [shape: f32[8,1], index: 13, kind: output, shape index: {1}]  }
   0x1   :  { %v45_v0 = vld [vmem:[%s1141_s0] sm:$0xff]  ;;  %835 = vmatprep.subr.bf16.mxu0 %v900_v2  ;;  %841 = vmatprep.subr.bf16.mxu1 %v900_v2  ;;  %v49_v5 = vld [vmem:[%s1143_s2 + $0x8] sm:$0xff]  ;;  %v50_v6 = vld [vmem:[%s1143_s2 + $0x10] sm:$0xff]  ;;  %vm309_vm4 = vcmask 523264   ;;  %vm518_vm5 = vcmask 785408   ;;  %vm621_vm6 = vcmask 130048  }
   0x2   :  { %v46_v1 = vld [vmem:[%s1142_s1] sm:$0xff]  ;;  %v51_v7 = vld [vmem:[%s1143_s2 + $0x18] sm:$0xff]  ;;  %762 = vmatprep.mubr.msk.f32.mxu0 %vm901_vm0, %v902_v8  ;;  %773 = vmatprep.mubr.msk.f32.mxu1 %vm901_vm0, %v902_v8  ;;  %v295_v15 = vld [vmem:[%s1144_s3 + $0x8] sm:$0xff]  ;;  %vm695_vm7 = vcmask 7168  }
   0x3   :  { %v48_v3 = vld [vmem:[%s1143_s2] sm:$0xff]  ;;  %v987_v4 = vadd.f32 %v46_v1, %v45_v0  ;;  %v839_v10 = vpack.c.bf16 %v51_v7, %v50_v6  ;;  %s905_s2 = smov 64   ;;  %v296_v16 = vld [vmem:[%s1144_s3 + $0x10] sm:$0xff]  ;;  %v297_v18 = vld [vmem:[%s1144_s3 + $0x18] sm:$0xff] }
   0x4   :  { %v836_v9 = vpack.c.bf16 %v49_v5, %v48_v3  ;;  %v294_v14 = vld [vmem:[%s1144_s3] sm:$0xff]  ;;  %v857_v19 = vpack.c.bf16 %v297_v18, %v296_v16  ;;  %v299_v21 = vld [vmem:[%s1144_s3 + $0x28] sm:$0xff]  ;;  %v300_v23 = vld [vmem:[%s1144_s3 + $0x30] sm:$0xff] }
   0x5   :  { %53 = vrot.lane.b32.xlu0 %v987_v4, %s903_s18  ;;  %202 = vrot.lane.b32.xlu1 %v987_v4, %s904_s19  ;;  %v854_v17 = vpack.c.bf16 %v295_v15, %v294_v14  ;;  %v298_v20 = vld [vmem:[%s1144_s3 + $0x20] sm:$0xff]  ;;  %v301_v24 = vld [vmem:[%s1144_s3 + $0x38] sm:$0xff] }
   0x6   :  { %837 = vmatpush3.bf16.msra.mxu0 %v836_v9  ;;  %843 = vmatpush3.bf16.msra.mxu1 %v836_v9  ;;  %v860_v22 = vpack.c.bf16 %v299_v21, %v298_v20  ;;  %v863_v25 = vpack.c.bf16 %v301_v24, %v300_v23  ;;  %v712_v41 = vld [vmem:[%s1145_s7] ss:$0 sm:$0xff]  ;;  %v391_v53 = vld [vmem:[%s1146_s5 + $0x8] sm:$0xff]  ;;  %v392_v55 = vld [vmem:[%s1146_s5 + $0x10] sm:$0xff]  ;;  %v19_v24 = vstv %s1151_s11 }
   0x7   :  { %838 = vmatprep.subr.bf16.mxu0 %v900_v2  ;;  %844 = vmatprep.subr.bf16.mxu1 %v900_v2  ;;  %v390_v52 = vld [vmem:[%s1146_s5] sm:$0xff]  ;;  %v393_v56 = vld [vmem:[%s1146_s5 + $0x18] sm:$0xff]  ;;  %v522_v5 = vld [vmem:[%s1148_s8 + $0x8] sm:$0xff]  ;;  %20 = vst [vmem:[#allocation2] sm:$0x1] %v19_v24 }
   0x8   :  { %v866_v54 = vpack.c.bf16 %v391_v53, %v390_v52  ;;  %v869_v57 = vpack.c.bf16 %v393_v56, %v392_v55  ;;  %v708_v58 = vld [vmem:[%s1147_s4] ss:$0 sm:$0xff] }
   0x9   :  { %128 = vrot.lane.b32.xlu0 %v987_v4, %s905_s2  ;;  %v521_v3 = vld [vmem:[%s1148_s8] sm:$0xff] }
   0xa   :  { %840 = vmatpush3.bf16.msra.mxu0 %v839_v10  ;;  %846 = vmatpush3.bf16.msra.mxu1 %v839_v10  ;;  %v872_v7 = vpack.c.bf16 %v522_v5, %v521_v3  ;;  %v612_v18 = vld [vmem:[%s1150_s10] sm:$0xff] }
   0xb   :  { %847 = vmatprep.subr.bf16.mxu0 %v900_v2  ;;  %853 = vmatprep.subr.bf16.mxu1 %v900_v2 }
  0x77   :  { %v54_v11 = vpop.permute.xlu0 %53  ;;  %v203_v13 = vpop.permute.xlu1 %202 }
  0x78   :  { %763 = vmatmul.mubr.msk.f32.vlgmr.msra.gmra.mrb[0].mxu0 %vm55_vm1, %v54_v11  ;;  %v524_v11 = vld [vmem:[%s1148_s8 + $0x18] sm:$0xff] }
  0x79   :  { %849 = vmatpush3.bf16.msra.mxu0 %v836_v9  ;;  %784 = vmatprep.mubr.msk.f32.mxu0 %vm901_vm0, %v902_v8 }
  0x7a   :  { %850 = vmatprep.subr.bf16.mxu0 %v900_v2 }
  0x7b   :  { %v129_v12 = vpop.permute.xlu0 %128 }
  0x7c   :  { %774 = vmatmul.mubr.msk.f32.vlgmr.msra.gmra.mrb[0].mxu1 %vm55_vm1, %v129_v12 }
  0x7d   :  { %852 = vmatpush3.bf16.msra.mxu0 %v839_v10  ;;  %803 = vmatprep.mubr.msk.f32.mxu1 %vm901_vm0, %v902_v8  ;;  %v523_v10 = vld [vmem:[%s1148_s8 + $0x10] sm:$0xff] }
  0x7e   :  { %865 = vmatprep.subr.bf16.mxu0 %v900_v2  ;;  %855 = vmatpush3.bf16.msra.mxu1 %v854_v17  ;;  %v875_v12 = vpack.c.bf16 %v524_v11, %v523_v10 }
  0x7f   :  { %856 = vmatprep.subr.bf16.mxu1 %v900_v2 }
  0x80   :  { %785 = vmatmul.mubr.msk.f32.vlgmr.msra.gmra.mrb[2].mxu0 %vm55_vm1, %v203_v13  ;;  %v710_v13 = vld [vmem:[%s1149_s6] ss:$0 sm:$0xff] }
  0x81   :  { %814 = vmatprep.mubr.msk.f32.mxu0 %vm901_vm0, %v902_v8  ;;  %867 = vmatpush3.bf16.msra.mxu0 %v866_v54 }
  0x82   :  { %858 = vmatpush3.bf16.msra.mxu1 %v857_v19  ;;  %868 = vmatprep.subr.bf16.mxu0 %v900_v2  ;;  %v613_v19 = vld [vmem:[%s1150_s10 + $0x8] sm:$0xff] }
  0x83   :  { %859 = vmatprep.subr.bf16.mxu1 %v900_v2  ;;  %v878_v20 = vpack.c.bf16 %v613_v19, %v612_v18 }
  0x85   :  { %870 = vmatpush3.bf16.msra.mxu0 %v869_v57 }
  0x86   :  { %861 = vmatpush3.bf16.msra.mxu1 %v860_v22  ;;  %871 = vmatprep.subr.bf16.mxu0 %v900_v2 }
  0x87   :  { %862 = vmatprep.subr.bf16.mxu1 %v900_v2 }
  0x8a   :  { %864 = vmatpush3.bf16.msra.mxu1 %v863_v25 }
  0x8b   :  { %877 = vmatprep.subr.bf16.mxu1 %v900_v2 }
 0x14b   :  { %v1051_v26 = vpop.f32.mrb[0].mxu0 }
 0x14c   :  { %v764_v27 = vpop.f32.mrb[1].mxu0  ;;  %v276_v29 = vmul.f32 %v1051_v26, %v1051_v26 }
 0x14d   :  { %v713_v27 = vld [vmem:[%s1152_s9] ss:$0 sm:$0xff] }
 0x14f   :  { %v1053_v28 = vpop.f32.mrb[0].mxu1 }
 0x150   :  { %v277_v30 = vmul.f32 %v1053_v28, %v1053_v28  ;;  %v775_v31 = vpop.f32.mrb[1].mxu1 }
 0x152   :  { %v278_v32 = vadd.f32 %v277_v30, %v276_v29 }
 0x153   :  { %v1059_v33 = vpop.f32.mrb[2].mxu0 }
 0x154   :  { %v279_v34 = vmul.f32 %v1059_v33, %v1059_v33  ;;  %v786_v35 = vpop.f32.mrb[3].mxu0 }
 0x156   :  { %v280_v36 = vadd.f32 %v279_v34, %v278_v32 }
 0x158   :  { %v281_v37 = vadd.f32 1e-08, %v280_v36 }
 0x15a   :  { %886 = vrsqrt.f32 %v281_v37  ;;  %vm284_vm2 = vcmp.eq.f32.partialorder %v281_v37, inf  ;;  %v287_v40 = vand.u32 2147483648, %v281_v37  ;;  %vm286_vm3 = vcmp.eq.f32.partialorder %v281_v37, 0.0 }
 0x164   :  { %v887_v38 = vpop.eup %886 }
 0x165   :  { %v283_v39 = vmul.f32 %v887_v38, %v281_v37 }
 0x167   :  { %v285_v42 = vsel %vm284_vm2, %v281_v37, %v283_v39 }
 0x168   :  { %v288_v43 = vsel %vm286_vm3, %v287_v40, %v285_v42 }
 0x169   :  { %290 = vrot.lane.b32.xlu1 %v288_v43, %s904_s19  ;;  %v481_v44 = vadd.f32 %v712_v41, %v288_v43 }
 0x16b   :  { %v482_v45 = vsub.f32 0.0, %v481_v44 }
 0x16d   :  { %v483_v46 = vmul.f32 1.442695, %v482_v45  ;;  %v715_v45 = vld [vmem:[#allocation2] ss:$0 sm:$0xff] }
 0x16f   :  { %888 = vpow2.f32 %v483_v46 }
 0x179   :  { %v889_v47 = vpop.eup %888 }
 0x17a   :  { %v485_v48 = vadd.f32 1.0, %v889_v47 }
 0x17c   :  { %890 = vrcp.f32 %v485_v48 }
 0x186   :  { %v891_v49 = vpop.eup %890 }
 0x187   :  { %489 = vrot.lane.b32.xlu0 %v891_v49, %s904_s19 }
 0x1db   :  { %v291_v50 = vpop.permute.xlu1 %290 }
 0x1dc   :  { %v293_v51 = vsel %vm55_vm1, %v987_v4, %v291_v50 }
 0x1dd   :  { %804 = vmatmul.mubr.msk.f32.vlgmr.msra.gmra.mrb[2].mxu1 %vm309_vm4, %v293_v51 }
 0x1de   :  { %832 = vmatprep.mubr.msk.f32.mxu1 %vm901_vm0, %v902_v8  ;;  %879 = vmatpush3.bf16.msra.mxu1 %v878_v20 }
 0x2b0   :  { %v379_v59 = vpop.f32.mrb[2].mxu1 }
 0x2b1   :  { %v380_v60 = vadd.f32 %v708_v58, %v379_v59  ;;  %v805_v61 = vpop.f32.mrb[3].mxu1 }
 0x2b3   :  { %v383_v62 = vsub.f32 0.0, %v380_v60 }
 0x2b5   :  { %v384_v63 = vmul.f32 1.442695, %v383_v62 }
 0x2b7   :  { %892 = vpow2.f32 %v384_v63 }
 0x2c1   :  { %v893_v0 = vpop.eup %892 }
 0x2c2   :  { %v386_v1 = vadd.f32 1.0, %v893_v0 }
 0x2c4   :  { %894 = vrcp.f32 %v386_v1 }
 0x2ce   :  { %v895_v6 = vpop.eup %894 }
 0x2cf   :  { %v389_v9 = vmul.f32 %v895_v6, %v380_v60 }
 0x2d1   :  { %815 = vmatmul.mubr.msk.f32.vlgmr.msra.gmra.mrb[4].mxu0 %vm55_vm1, %v389_v9 }
 0x2d2   :  { %873 = vmatpush3.bf16.msra.mxu0 %v872_v7  ;;  %825 = vmatprep.mubr.msk.f32.mxu0 %vm901_vm0, %v902_v8  ;;  %v490_v8 = vpop.permute.xlu0 %489 }
 0x2d3   :  { %874 = vmatprep.subr.bf16.mxu0 %v900_v2 }
 0x2d6   :  { %876 = vmatpush3.bf16.msra.mxu0 %v875_v12 }
 0x3a4   :  { %v470_v14 = vpop.f32.mrb[4].mxu0 }
 0x3a5   :  { %v471_v15 = vadd.f32 %v710_v13, %v470_v14  ;;  %v816_v16 = vpop.f32.mrb[5].mxu0 }
 0x3a7   :  { %v492_v17 = vmul.f32 %v490_v8, %v471_v15  ;;  %v493_v2 = vadd.f32 %v471_v15, %v987_v4 }
 0x3a9   :  { %826 = vmatmul.mubr.msk.f32.vlgmr.msra.gmra.mrb[6].mxu0 %vm55_vm1, %v493_v2  ;;  %495 = vrot.lane.b32.xlu1 %v492_v17, %s903_s18 }
 0x41b   :  { %v496_v21 = vpop.permute.xlu1 %495 }
 0x41c   :  { %v498_v22 = vmul.f32 %v496_v21, %v1051_v26  ;;  %v504_v23 = vmul.f32 %v496_v21, %v1053_v28  ;;  %v510_v25 = vmul.f32 %v496_v21, %v1059_v33 }
 0x41e   :  { %506 = vrot.lane.b32.xlu1 %v504_v23, %s905_s2  ;;  %500 = vrot.lane.b32.xlu0 %v498_v22, %s904_s19 }
 0x422   :  { %512 = vrot.lane.b32.xlu0 %v510_v25, %s903_s18 }
 0x47c   :  { %v601_v26 = vpop.f32.mrb[6].mxu0 }
 0x47d   :  { %v602_v29 = vadd.f32 %v713_v27, %v601_v26  ;;  %v827_v28 = vpop.f32.mrb[7].mxu0 }
 0x47f   :  { %v605_v30 = vsub.f32 0.0, %v602_v29 }
 0x481   :  { %v606_v31 = vmul.f32 1.442695, %v605_v30 }
 0x483   :  { %896 = vpow2.f32 %v606_v31 }
 0x48d   :  { %v897_v32 = vpop.eup %896 }
 0x48e   :  { %v608_v34 = vadd.f32 1.0, %v897_v32 }
 0x490   :  { %898 = vrcp.f32 %v608_v34  ;;  %v507_v35 = vpop.permute.xlu1 %506  ;;  %v501_v36 = vpop.permute.xlu0 %500 }
 0x491   :  { %v503_v37 = vadd.f32 %v501_v36, %v987_v4  ;;  %v509_v33 = vadd.f32 %v507_v35, %v987_v4 }
 0x493   :  { %v516_v38 = vsel %vm55_vm1, %v493_v2, %v503_v37 }
 0x494   :  { %v513_v39 = vpop.permute.xlu0 %512  ;;  %v517_v41 = vsel %vm309_vm4, %v516_v38, %v509_v33 }
 0x495   :  { %v515_v40 = vadd.f32 %v513_v39, %v987_v4 }
 0x497   :  { %v519_v42 = vsel %vm518_vm5, %v517_v41, %v515_v40 }
 0x498   :  { %520 = vst [vmem:[%s1153_s12] sm:$0xff] %v519_v42 }
 0x49a   :  { %v899_v43 = vpop.eup %898 }
 0x49b   :  { %v611_v44 = vmul.f32 %v899_v43, %v602_v29 }
 0x49d   :  { %833 = vmatmul.mubr.msk.f32.vlgmr.msra.gmra.mrb[4].mxu1 %vm621_vm6, %v611_v44 }
 0x570   :  { %v691_v46 = vpop.f32.mrb[4].mxu1 }
 0x571   :  { %v692_v47 = vadd.f32 %v715_v45, %v691_v46  ;;  %v834_v48 = vpop.f32.mrb[5].mxu1 }
 0x573   :  { %696 = vst.msk [vmem:[%s1154_s13] sm:$0xff] %vm695_vm7, %v692_v47 }

// kernel: savenet_forward.9
= control target key start
LH: loop header
LB: loop body
LE: loop exit
PB: predicated region body
PF: predicated region fallthrough
CT: control target
= control target key end

     0   :  { %v922_v2 = vmov 0.0|0.0   ;;  %vm923_vm0 = vmmov 0   ;;  %v924_v8 = vmov 0.0   ;;  %s925_s18 = smov 96   ;;  %s926_s19 = smov 32   ;;  %vm53_vm1 = vcmask 261120   ;;  %s1181_s0 = inlined_call_operand.vmem [shape: f32[8,128], index: 0, kind: input, shape index: {}, may-alias: {0,12}]   ;;  %s1182_s1 = inlined_call_operand.vmem [shape: f32[8,128], index: 1, kind: input, shape index: {}]   ;;  %s1183_s2 = inlined_call_operand.vmem [shape: f32[32,32], index: 2, kind: input, shape index: {}]   ;;  %s1184_s3 = inlined_call_operand.vmem [shape: f32[64,32], index: 3, kind: input, shape index: {}]   ;;  %s1185_s7 = inlined_call_operand.vmem [shape: f32[1,32], index: 7, kind: input, shape index: {}]   ;;  %s1186_s5 = inlined_call_operand.vmem [shape: f32[32,64], index: 5, kind: input, shape index: {}]   ;;  %s1187_s4 = inlined_call_operand.vmem [shape: f32[1,32], index: 4, kind: input, shape index: {}]   ;;  %s1188_s8 = inlined_call_operand.vmem [shape: f32[32,32], index: 8, kind: input, shape index: {}]   ;;  %s1189_s6 = inlined_call_operand.vmem [shape: f32[1,64], index: 6, kind: input, shape index: {}]   ;;  %s1190_s10 = inlined_call_operand.vmem [shape: f32[32,96], index: 10, kind: input, shape index: {}]   ;;  %s1191_s9 = inlined_call_operand.vmem [shape: f32[1,32], index: 9, kind: input, shape index: {}]   ;;  %s1192_s12 = inlined_call_operand.vmem [shape: f32[8,128], index: 12, kind: output, shape index: {0}, may-alias: {0,12}]   ;;  %s1193_s13 = inlined_call_operand.vmem [shape: f32[8,192], index: 13, kind: output, shape index: {1}]   ;;  %s1194_s11 = inlined_call_operand.vmem [shape: f32[1,96], index: 11, kind: input, shape index: {}]  }
   0x1   :  { %v43_v0 = vld [vmem:[%s1181_s0] sm:$0xff]  ;;  %854 = vmatprep.subr.bf16.mxu0 %v922_v2  ;;  %860 = vmatprep.subr.bf16.mxu1 %v922_v2  ;;  %v47_v5 = vld [vmem:[%s1183_s2 + $0x8] sm:$0xff]  ;;  %v48_v6 = vld [vmem:[%s1183_s2 + $0x10] sm:$0xff]  ;;  %vm307_vm4 = vcmask 523264   ;;  %vm516_vm5 = vcmask 785408  }
   0x2   :  { %v44_v1 = vld [vmem:[%s1182_s1] sm:$0xff]  ;;  %v49_v7 = vld [vmem:[%s1183_s2 + $0x18] sm:$0xff]  ;;  %777 = vmatprep.mubr.msk.f32.mxu0 %vm923_vm0, %v924_v8  ;;  %788 = vmatprep.mubr.msk.f32.mxu1 %vm923_vm0, %v924_v8  ;;  %v293_v15 = vld [vmem:[%s1184_s3 + $0x8] sm:$0xff] }
   0x3   :  { %v46_v3 = vld [vmem:[%s1183_s2] sm:$0xff]  ;;  %v1009_v4 = vadd.f32 %v44_v1, %v43_v0  ;;  %v858_v10 = vpack.c.bf16 %v49_v7, %v48_v6  ;;  %s927_s2 = smov 64   ;;  %v294_v16 = vld [vmem:[%s1184_s3 + $0x10] sm:$0xff]  ;;  %v295_v18 = vld [vmem:[%s1184_s3 + $0x18] sm:$0xff] }
   0x4   :  { %v855_v9 = vpack.c.bf16 %v47_v5, %v46_v3  ;;  %v292_v14 = vld [vmem:[%s1184_s3] sm:$0xff]  ;;  %v876_v19 = vpack.c.bf16 %v295_v18, %v294_v16  ;;  %v297_v21 = vld [vmem:[%s1184_s3 + $0x28] sm:$0xff]  ;;  %v298_v23 = vld [vmem:[%s1184_s3 + $0x30] sm:$0xff] }
   0x5   :  { %51 = vrot.lane.b32.xlu0 %v1009_v4, %s925_s18  ;;  %200 = vrot.lane.b32.xlu1 %v1009_v4, %s926_s19  ;;  %v873_v17 = vpack.c.bf16 %v293_v15, %v292_v14  ;;  %v296_v20 = vld [vmem:[%s1184_s3 + $0x20] sm:$0xff]  ;;  %v299_v24 = vld [vmem:[%s1184_s3 + $0x38] sm:$0xff] }
   0x6   :  { %856 = vmatpush3.bf16.msra.mxu0 %v855_v9  ;;  %862 = vmatpush3.bf16.msra.mxu1 %v855_v9  ;;  %v879_v22 = vpack.c.bf16 %v297_v21, %v296_v20  ;;  %v882_v25 = vpack.c.bf16 %v299_v24, %v298_v23  ;;  %v725_v41 = vld [vmem:[%s1185_s7] ss:$0 sm:$0xff]  ;;  %v389_v53 = vld [vmem:[%s1186_s5 + $0x8] sm:$0xff]  ;;  %v390_v55 = vld [vmem:[%s1186_s5 + $0x10] sm:$0xff] }
   0x7   :  { %857 = vmatprep.subr.bf16.mxu0 %v922_v2  ;;  %863 = vmatprep.subr.bf16.mxu1 %v922_v2  ;;  %v388_v52 = vld [vmem:[%s1186_s5] sm:$0xff]  ;;  %v391_v56 = vld [vmem:[%s1186_s5 + $0x18] sm:$0xff]  ;;  %v520_v5 = vld [vmem:[%s1188_s8 + $0x8] sm:$0xff] }
   0x8   :  { %v885_v54 = vpack.c.bf16 %v389_v53, %v388_v52  ;;  %v888_v57 = vpack.c.bf16 %v391_v56, %v390_v55  ;;  %v721_v58 = vld [vmem:[%s1187_s4] ss:$0 sm:$0xff]  ;;  %v611_v20 = vld [vmem:[%s1190_s10 + $0x8] sm:$0xff]  ;;  %v613_v23 = vld [vmem:[%s1190_s10 + $0x18] sm:$0xff] }
   0x9   :  { %126 = vrot.lane.b32.xlu0 %v1009_v4, %s927_s2  ;;  %v519_v3 = vld [vmem:[%s1188_s8] sm:$0xff] }
   0xa   :  { %859 = vmatpush3.bf16.msra.mxu0 %v858_v10  ;;  %865 = vmatpush3.bf16.msra.mxu1 %v858_v10  ;;  %v891_v7 = vpack.c.bf16 %v520_v5, %v519_v3 }
   0xb   :  { %866 = vmatprep.subr.bf16.mxu0 %v922_v2  ;;  %872 = vmatprep.subr.bf16.mxu1 %v922_v2 }
  0x77   :  { %v52_v11 = vpop.permute.xlu0 %51  ;;  %v201_v13 = vpop.permute.xlu1 %200 }
  0x78   :  { %778 = vmatmul.mubr.msk.f32.vlgmr.msra.gmra.mrb[0].mxu0 %vm53_vm1, %v52_v11  ;;  %v522_v11 = vld [vmem:[%s1188_s8 + $0x18] sm:$0xff] }
  0x79   :  { %868 = vmatpush3.bf16.msra.mxu0 %v855_v9  ;;  %799 = vmatprep.mubr.msk.f32.mxu0 %vm923_vm0, %v924_v8 }
  0x7a   :  { %869 = vmatprep.subr.bf16.mxu0 %v922_v2 }
  0x7b   :  { %v127_v12 = vpop.permute.xlu0 %126 }
  0x7c   :  { %789 = vmatmul.mubr.msk.f32.vlgmr.msra.gmra.mrb[0].mxu1 %vm53_vm1, %v127_v12 }
  0x7d   :  { %871 = vmatpush3.bf16.msra.mxu0 %v858_v10  ;;  %818 = vmatprep.mubr.msk.f32.mxu1 %vm923_vm0, %v924_v8  ;;  %v521_v10 = vld [vmem:[%s1188_s8 + $0x10] sm:$0xff] }
  0x7e   :  { %884 = vmatprep.subr.bf16.mxu0 %v922_v2  ;;  %874 = vmatpush3.bf16.msra.mxu1 %v873_v17  ;;  %v894_v12 = vpack.c.bf16 %v522_v11, %v521_v10 }
  0x7f   :  { %875 = vmatprep.subr.bf16.mxu1 %v922_v2 }
  0x80   :  { %800 = vmatmul.mubr.msk.f32.vlgmr.msra.gmra.mrb[2].mxu0 %vm53_vm1, %v201_v13  ;;  %v723_v13 = vld [vmem:[%s1189_s6] ss:$0 sm:$0xff] }
  0x81   :  { %829 = vmatprep.mubr.msk.f32.mxu0 %vm923_vm0, %v924_v8  ;;  %886 = vmatpush3.bf16.msra.mxu0 %v885_v54 }
  0x82   :  { %877 = vmatpush3.bf16.msra.mxu1 %v876_v19  ;;  %887 = vmatprep.subr.bf16.mxu0 %v922_v2  ;;  %v610_v19 = vld [vmem:[%s1190_s10] sm:$0xff] }
  0x83   :  { %878 = vmatprep.subr.bf16.mxu1 %v922_v2  ;;  %v897_v21 = vpack.c.bf16 %v611_v20, %v610_v19 }
  0x85   :  { %889 = vmatpush3.bf16.msra.mxu0 %v888_v57 }
  0x86   :  { %880 = vmatpush3.bf16.msra.mxu1 %v879_v22  ;;  %890 = vmatprep.subr.bf16.mxu0 %v922_v2  ;;  %v612_v22 = vld [vmem:[%s1190_s10 + $0x10] sm:$0xff] }
  0x87   :  { %881 = vmatprep.subr.bf16.mxu1 %v922_v2  ;;  %v900_v24 = vpack.c.bf16 %v613_v23, %v612_v22 }
  0x8a   :  { %883 = vmatpush3.bf16.msra.mxu1 %v882_v25 }
  0x8b   :  { %896 = vmatprep.subr.bf16.mxu1 %v922_v2 }
 0x14b   :  { %v1073_v26 = vpop.f32.mrb[0].mxu0 }
 0x14c   :  { %v779_v27 = vpop.f32.mrb[1].mxu0  ;;  %v274_v29 = vmul.f32 %v1073_v26, %v1073_v26 }
 0x14f   :  { %v1075_v28 = vpop.f32.mrb[0].mxu1 }
 0x150   :  { %v275_v30 = vmul.f32 %v1075_v28, %v1075_v28  ;;  %v790_v31 = vpop.f32.mrb[1].mxu1 }
 0x152   :  { %v276_v32 = vadd.f32 %v275_v30, %v274_v29  ;;  %v726_v30 = vld [vmem:[%s1191_s9] ss:$0 sm:$0xff] }
 0x153   :  { %v1081_v33 = vpop.f32.mrb[2].mxu0 }
 0x154   :  { %v277_v34 = vmul.f32 %v1081_v33, %v1081_v33  ;;  %v801_v35 = vpop.f32.mrb[3].mxu0 }
 0x156   :  { %v278_v36 = vadd.f32 %v277_v34, %v276_v32 }
 0x158   :  { %v279_v37 = vadd.f32 1e-08, %v278_v36 }
 0x15a   :  { %908 = vrsqrt.f32 %v279_v37  ;;  %vm282_vm2 = vcmp.eq.f32.partialorder %v279_v37, inf  ;;  %v285_v40 = vand.u32 2147483648, %v279_v37  ;;  %vm284_vm3 = vcmp.eq.f32.partialorder %v279_v37, 0.0 }
 0x164   :  { %v909_v38 = vpop.eup %908 }
 0x165   :  { %v281_v39 = vmul.f32 %v909_v38, %v279_v37 }
 0x167   :  { %v283_v42 = vsel %vm282_vm2, %v279_v37, %v281_v39 }
 0x168   :  { %v286_v43 = vsel %vm284_vm3, %v285_v40, %v283_v42 }
 0x169   :  { %288 = vrot.lane.b32.xlu1 %v286_v43, %s926_s19  ;;  %v479_v44 = vadd.f32 %v725_v41, %v286_v43 }
 0x16b   :  { %v480_v45 = vsub.f32 0.0, %v479_v44 }
 0x16d   :  { %v481_v46 = vmul.f32 1.442695, %v480_v45 }
 0x16f   :  { %910 = vpow2.f32 %v481_v46 }
 0x179   :  { %v911_v47 = vpop.eup %910 }
 0x17a   :  { %v483_v48 = vadd.f32 1.0, %v911_v47 }
 0x17c   :  { %912 = vrcp.f32 %v483_v48 }
 0x186   :  { %v913_v49 = vpop.eup %912 }
 0x187   :  { %487 = vrot.lane.b32.xlu0 %v913_v49, %s926_s19 }
 0x1db   :  { %v289_v50 = vpop.permute.xlu1 %288 }
 0x1dc   :  { %v291_v51 = vsel %vm53_vm1, %v1009_v4, %v289_v50 }
 0x1dd   :  { %819 = vmatmul.mubr.msk.f32.vlgmr.msra.gmra.mrb[2].mxu1 %vm307_vm4, %v291_v51 }
 0x1de   :  { %851 = vmatprep.mubr.msk.f32.mxu1 %vm923_vm0, %v924_v8  ;;  %898 = vmatpush3.bf16.msra.mxu1 %v897_v21 }
 0x1df   :  { %899 = vmatprep.subr.bf16.mxu1 %v922_v2 }
 0x1e2   :  { %901 = vmatpush3.bf16.msra.mxu1 %v900_v24 }
 0x2b0   :  { %v377_v59 = vpop.f32.mrb[2].mxu1 }
 0x2b1   :  { %v378_v60 = vadd.f32 %v721_v58, %v377_v59  ;;  %v820_v61 = vpop.f32.mrb[3].mxu1 }
 0x2b3   :  { %v381_v62 = vsub.f32 0.0, %v378_v60 }
 0x2b5   :  { %v382_v63 = vmul.f32 1.442695, %v381_v62 }
 0x2b7   :  { %914 = vpow2.f32 %v382_v63 }
 0x2c1   :  { %v915_v0 = vpop.eup %914 }
 0x2c2   :  { %v384_v1 = vadd.f32 1.0, %v915_v0 }
 0x2c4   :  { %916 = vrcp.f32 %v384_v1 }
 0x2ce   :  { %v917_v6 = vpop.eup %916 }
 0x2cf   :  { %v387_v9 = vmul.f32 %v917_v6, %v378_v60 }
 0x2d1   :  { %830 = vmatmul.mubr.msk.f32.vlgmr.msra.gmra.mrb[4].mxu0 %vm53_vm1, %v387_v9 }
 0x2d2   :  { %892 = vmatpush3.bf16.msra.mxu0 %v891_v7  ;;  %840 = vmatprep.mubr.msk.f32.mxu0 %vm923_vm0, %v924_v8  ;;  %v488_v8 = vpop.permute.xlu0 %487 }
 0x2d3   :  { %893 = vmatprep.subr.bf16.mxu0 %v922_v2 }
 0x2d6   :  { %895 = vmatpush3.bf16.msra.mxu0 %v894_v12 }
 0x3a4   :  { %v468_v14 = vpop.f32.mrb[4].mxu0 }
 0x3a5   :  { %v469_v15 = vadd.f32 %v723_v13, %v468_v14  ;;  %v831_v16 = vpop.f32.mrb[5].mxu0 }
 0x3a7   :  { %v490_v17 = vmul.f32 %v488_v8, %v469_v15  ;;  %v491_v18 = vadd.f32 %v469_v15, %v1009_v4 }
 0x3a9   :  { %841 = vmatmul.mubr.msk.f32.vlgmr.msra.gmra.mrb[6].mxu0 %vm53_vm1, %v491_v18  ;;  %493 = vrot.lane.b32.xlu1 %v490_v17, %s925_s18 }
 0x41b   :  { %v494_v25 = vpop.permute.xlu1 %493 }
 0x41c   :  { %v496_v27 = vmul.f32 %v494_v25, %v1073_v26  ;;  %v502_v29 = vmul.f32 %v494_v25, %v1075_v28  ;;  %v508_v2 = vmul.f32 %v494_v25, %v1081_v33 }
 0x41e   :  { %504 = vrot.lane.b32.xlu1 %v502_v29, %s927_s2  ;;  %498 = vrot.lane.b32.xlu0 %v496_v27, %s926_s19 }
 0x422   :  { %510 = vrot.lane.b32.xlu0 %v508_v2, %s925_s18 }
 0x47c   :  { %v599_v31 = vpop.f32.mrb[6].mxu0 }
 0x47d   :  { %v600_v32 = vadd.f32 %v726_v30, %v599_v31  ;;  %v842_v34 = vpop.f32.mrb[7].mxu0 }
 0x47f   :  { %v603_v35 = vsub.f32 0.0, %v600_v32 }
 0x481   :  { %v604_v36 = vmul.f32 1.442695, %v603_v35 }
 0x483   :  { %918 = vpow2.f32 %v604_v36 }
 0x48d   :  { %v919_v26 = vpop.eup %918 }
 0x48e   :  { %v606_v28 = vadd.f32 1.0, %v919_v26 }
 0x490   :  { %920 = vrcp.f32 %v606_v28  ;;  %v505_v37 = vpop.permute.xlu1 %504  ;;  %v499_v38 = vpop.permute.xlu0 %498 }
 0x491   :  { %v507_v39 = vadd.f32 %v505_v37, %v1009_v4  ;;  %v501_v33 = vadd.f32 %v499_v38, %v1009_v4 }
 0x493   :  { %v514_v40 = vsel %vm53_vm1, %v491_v18, %v501_v33  ;;  %699 = vrot.lane.b32.xlu0 %v507_v39, %s927_s2  ;;  %695 = vrot.lane.b32.xlu1 %v501_v33, %s927_s2 }
 0x494   :  { %v511_v41 = vpop.permute.xlu0 %510  ;;  %v515_v43 = vsel %vm307_vm4, %v514_v40, %v507_v39 }
 0x495   :  { %v513_v42 = vadd.f32 %v511_v41, %v1009_v4  ;;  %v728_v4 = vld [vmem:[%s1194_s11] ss:$0 sm:$0xff] }
 0x497   :  { %v517_v44 = vsel %vm516_vm5, %v515_v43, %v513_v42  ;;  %703 = vrot.lane.b32.xlu1 %v513_v42, %s927_s2 }
 0x498   :  { %518 = vst [vmem:[%s1192_s12] sm:$0xff] %v517_v44 }
 0x49a   :  { %v921_v45 = vpop.eup %920 }
 0x49b   :  { %v609_v46 = vmul.f32 %v921_v45, %v600_v32 }
 0x49d   :  { %852 = vmatmul.mubr.msk.f32.vlgmr.msra.gmra.mrb[4].mxu1 %vm53_vm1, %v609_v46 }
 0x505   :  { %v696_v47 = vpop.permute.xlu1 %695  ;;  %v700_v48 = vpop.permute.xlu0 %699 }
 0x509   :  { %v704_v49 = vpop.permute.xlu1 %703 }
 0x50a   :  { %v707_v50 = vsel %vm53_vm1, %v700_v48, %v704_v49 }
 0x50b   :  { %709 = vst.msk [vmem:[%s1193_s13 + $0x8] sm:$0xff] %vm307_vm4, %v707_v50 }
 0x570   :  { %v690_v51 = vpop.f32.mrb[4].mxu1 }
 0x571   :  { %v691_v52 = vadd.f32 %v728_v4, %v690_v51  ;;  %v853_v53 = vpop.f32.mrb[5].mxu1 }
 0x573   :  { %v706_v54 = vsel %vm516_vm5, %v691_v52, %v696_v47 }
 0x574   :  { %708 = vst [vmem:[%s1193_s13] sm:$0xff] %v706_v54 }

</bundles_post_ra>
